<compile_context>
chip_gen: v7x
topology: tpu7x:2x2x1
jax: 0.10.0
libtpu: 0.0.40
codegen_flags: <defaults>
</compile_context>

<pallas_src>
import jax
import jax.numpy as jnp
from jax import lax
from jax.experimental import pallas as pl
from jax.experimental.pallas import tpu as pltpu


# --------------------------------------------------------------- utilities --

_TAPS = [(dh, dw) for dh in range(3) for dw in range(3)]   # 3x3 kernel taps


def _round_up(n, m):
    return ((n + m - 1) // m) * m


def _pick_tb(batch, rows_per_image, bytes_per_image):
    """Images per grid step: divides batch, keeps >=2 grid steps (pipelining /
    megacore), <=1024 output rows and <=4 MiB of block data per step."""
    tb = 1
    for cand in range(1, min(batch, 8) + 1):
        if batch % cand:
            continue
        if batch > 1 and batch // cand < 2:
            continue
        if cand * rows_per_image > 1024:
            continue
        if cand * bytes_per_image > (4 << 20):
            continue
        tb = cand
    return tb


# ------------------------------------------------------------------ kernels --

def _make_conv_block_kernel(tb, wp, mj):
    """Fused conv(3x3,s2,p1) + bias + LeakyReLU(0.2) + folded BN for TB images."""

    def kernel(x_ref, w_ref, prm_ref, o_ref):
        # x_ref:  (TB, 4, NR, C)  bf16 phase-split padded input
        # w_ref:  (9, C, N)       bf16 per-tap weights (VMEM-resident)
        # prm_ref:(3, N)          f32  [bias; bn_scale; bn_shift]
        # o_ref:  (TB, MJ, N)     bf16 flattened (ho, wo_pad) x channels
        bias = prm_ref[0:1, :]
        scale = prm_ref[1:2, :]
        shift = prm_ref[2:3, :]
        for b in range(tb):
            acc = None
            for t, (dh, dw) in enumerate(_TAPS):
                p = (dh % 2) * 2 + (dw % 2)          # parity phase of this tap
                off = (dh // 2) * wp + (dw // 2)     # constant row offset
                d = jnp.dot(x_ref[b, p, off:off + mj, :], w_ref[t],
                            preferred_element_type=jnp.float32)
                acc = d if acc is None else acc + d
            y = acc + bias                           # conv bias
            y = jnp.where(y > 0.0, y, 0.2 * y)       # LeakyReLU(0.2)
            # Dropout2d(0.25): identity in eval mode
            y = y * scale + shift                    # folded BatchNorm(eps=0.8)
            o_ref[b] = y.astype(o_ref.dtype)

    return kernel


def _make_head_kernel(batch, wp, mj):
    """Last conv block fused with flatten + adv Linear -> (B, 1) validity."""

    def kernel(x_ref, w_ref, prm_ref, aw_ref, ab_ref, o_ref):
        # x_ref: (B, 4, NR, 64) bf16 ; w_ref: (9, 64, 128) bf16
        # prm_ref: (3, 128) f32 ; aw_ref: (MJ, 128) f32 (junk rows zeroed)
        # ab_ref: (1, 1) f32 ; o_ref: (B, 1) f32
        n = w_ref.shape[2]
        bias = prm_ref[0:1, :]
        scale = prm_ref[1:2, :]
        shift = prm_ref[2:3, :]
        aw = aw_ref[...]
        ab = ab_ref[...]

        def one_image(xb):                           # xb: (4, NR, 64) value
            acc = jnp.zeros((mj, n), jnp.float32)
            for t, (dh, dw) in enumerate(_TAPS):
                p = (dh % 2) * 2 + (dw % 2)
                off = (dh // 2) * wp + (dw // 2)
                acc = acc + jnp.dot(xb[p, off:off + mj, :], w_ref[t],
                                    preferred_element_type=jnp.float32)
            y = acc + bias
            y = jnp.where(y > 0.0, y, 0.2 * y)
            y = y * scale + shift
            v = jnp.sum(jnp.sum(y * aw, axis=1, keepdims=True),
                        axis=0, keepdims=True)       # (1, 1) fused adv Linear
            return v + ab

        if batch <= 16:                              # static unroll (small B)
            for b in range(batch):
                o_ref[b:b + 1, :] = one_image(x_ref[b])
        else:                                        # bounded code size (big B)
            def body(b, carry):
                o_ref[pl.ds(b, 1), :] = one_image(x_ref[b])
                return carry
            lax.fori_loop(0, batch, body, 0)

    return kernel


# ------------------------------------------------------------ pallas wrappers --

def conv_block_pallas(x4, w9, prm, ho, wo, wp):
    del wo  # junk column is kept in the output layout and dropped by the caller
    batch, _, nr, c = x4.shape
    n = w9.shape[-1]
    mj = ho * wp
    bytes_per_img = 4 * nr * c * 2 + mj * n * (2 + 4)
    tb = _pick_tb(batch, mj, bytes_per_img)
    est = tb * bytes_per_img + 9 * c * n * 2 + 3 * n * 4
    vmem_limit = int(min(56 << 20, max(16 << 20, 8 * est)))
    return pl.pallas_call(
        _make_conv_block_kernel(tb, wp, mj),
        out_shape=jax.ShapeDtypeStruct((batch, mj, n), jnp.bfloat16),
        grid=(batch // tb,),
        in_specs=[
            pl.BlockSpec((tb, 4, nr, c), lambda i: (i, 0, 0, 0)),
            pl.BlockSpec((9, c, n), lambda i: (0, 0, 0)),
            pl.BlockSpec((3, n), lambda i: (0, 0)),
        ],
        out_specs=pl.BlockSpec((tb, mj, n), lambda i: (i, 0, 0)),
        compiler_params=pltpu.CompilerParams(
            dimension_semantics=("parallel",),
            vmem_limit_bytes=vmem_limit),
    )(x4, w9, prm)


def head_pallas(x4, w9, prm, aw, ab, ho, wo, wp):
    del wo
    batch, _, nr, c = x4.shape
    n = w9.shape[-1]
    mj = ho * wp
    est = batch * 4 * nr * c * 2 + 9 * c * n * 2 + mj * n * 4 + 3 * n * 4
    vmem_limit = int(min(56 << 20, max(16 << 20, 4 * est)))
    return pl.pallas_call(
        _make_head_kernel(batch, wp, mj),
        out_shape=jax.ShapeDtypeStruct((batch, 1), jnp.float32),
        in_specs=[
            pl.BlockSpec((batch, 4, nr, c), lambda: (0, 0, 0, 0)),
            pl.BlockSpec((9, c, n), lambda: (0, 0, 0)),
            pl.BlockSpec((3, n), lambda: (0, 0)),
            pl.BlockSpec((mj, n), lambda: (0, 0)),
            pl.BlockSpec((1, 1), lambda: (0, 0)),
        ],
        out_specs=pl.BlockSpec((batch, 1), lambda: (0, 0)),
        compiler_params=pltpu.CompilerParams(vmem_limit_bytes=vmem_limit),
    )(x4, w9, prm, aw, ab)


# --------------------------------------------------------------------- glue --

def _phase_split(x_nhwc):
    """Pad spatially by 1, split into 4 parity phases, flatten phase rows.

    Returns x4 (B, 4, NR, C) bf16 with NR >= (Ho+1)*(Wo+1)+1 (zero padded) and
    (Ho, Wo, Wp).  For output (ho, wo) and tap (dh, dw) the needed input value
    lives at phase 2*(dh%2)+(dw%2), flat row ho*Wp + wo + (dh//2)*Wp + (dw//2),
    i.e. every tap is a contiguous row window — no strided access in-kernel.
    """
    b, h, w, c = x_nhwc.shape
    ho, wo = h // 2, w // 2
    hp, wp = ho + 1, wo + 1
    xp = jnp.pad(x_nhwc, ((0, 0), (1, 1), (1, 1), (0, 0)))
    phases = []
    for p in range(2):
        for q in range(2):
            phases.append(xp[:, p::2, q::2, :].reshape(b, hp * wp, c))
    x4 = jnp.stack(phases, axis=1)                       # (B, 4, Hp*Wp, C)
    nr = _round_up(hp * wp + 1, 8)
    x4 = jnp.pad(x4, ((0, 0), (0, 0), (0, nr - hp * wp), (0, 0)))
    return x4.astype(jnp.bfloat16), (ho, wo, wp)


def init_params(key, channels, img_size):
    specs = [(channels, 16, False), (16, 32, True), (32, 64, True), (64, 128, True)]
    eps = 0.8  # nn.BatchNorm2d(out_filters, 0.8) -> eps = 0.8
    keys = jax.random.split(key, 4 * len(specs) + 2)
    blocks = []
    ki = 0
    for cin, cout, bn in specs:
        w = 0.05 * jax.random.normal(keys[ki], (cout, cin, 3, 3), jnp.float32); ki += 1
        b = 0.01 * jax.random.normal(keys[ki], (cout,), jnp.float32); ki += 1
        if bn:
            gamma = 1.0 + 0.1 * jax.random.normal(keys[ki], (cout,), jnp.float32); ki += 1
            beta = 0.05 * jax.random.normal(keys[ki], (cout,), jnp.float32); ki += 1
            running_mean = jnp.zeros((cout,), jnp.float32)
            running_var = jnp.ones((cout,), jnp.float32)
            scale = gamma / jnp.sqrt(running_var + eps)
            shift = beta - running_mean * scale
        else:
            ki += 2
            scale = jnp.ones((cout,), jnp.float32)
            shift = jnp.zeros((cout,), jnp.float32)
        # per-tap weight matrices, bf16 for the MXU
        w9 = jnp.transpose(w, (2, 3, 1, 0)).reshape(9, cin, cout).astype(jnp.bfloat16)
        prm = jnp.stack([b, scale, shift], axis=0)       # (3, cout) f32 epilogue params
        blocks.append(dict(w_oihw=w, b=b, scale=scale, shift=shift, w9=w9, prm=prm))

    ds = img_size // 2 ** 4
    feat = 128 * ds * ds
    adv_w = 0.05 * jax.random.normal(keys[ki], (1, feat), jnp.float32); ki += 1
    adv_b = 0.01 * jax.random.normal(keys[ki], (1,), jnp.float32)
    # Permute adv weight once into the head kernel's (h, w_pad) x channel layout
    # (PyTorch NCHW flatten order), zero weight on the padding column.
    wp4 = ds + 1
    aw = jnp.transpose(adv_w.reshape(128, ds, ds), (1, 2, 0))     # (ds, ds, 128)
    aw = jnp.pad(aw, ((0, 0), (0, 1), (0, 0))).reshape(ds * wp4, 128)
    return dict(blocks=blocks, adv_w=adv_w, adv_b=adv_b,
                aw_head=aw, ab_head=adv_b.reshape(1, 1))


def discriminator_forward(img_nchw, params):
    x = jnp.transpose(img_nchw, (0, 2, 3, 1)).astype(jnp.float32)   # NCHW -> NHWC
    batch = x.shape[0]
    blocks = params["blocks"]
    for li, blk in enumerate(blocks):
        x4, (ho, wo, wp) = _phase_split(x)
        if li < len(blocks) - 1:
            y = conv_block_pallas(x4, blk["w9"], blk["prm"], ho, wo, wp)
            # drop the padding column, back to NHWC for the next phase split
            x = y.reshape(batch, ho, wp, y.shape[-1])[:, :, :wo, :]
        else:
            # fused: last conv block + flatten + adv Linear
            return head_pallas(x4, blk["w9"], blk["prm"],
                               params["aw_head"], params["ab_head"], ho, wo, wp)


# ----------------------------------------------------------- f32 reference --

def reference_forward(img_nchw, params):
    x = img_nchw.astype(jnp.float32)
    for blk in params["blocks"]:
        y = lax.conv_general_dilated(
            x, blk["w_oihw"], window_strides=(2, 2), padding=((1, 1), (1, 1)),
            dimension_numbers=("NCHW", "OIHW", "NCHW"))
        y = y + blk["b"][None, :, None, None]
        y = jnp.where(y > 0, y, 0.2 * y)
        y = y * blk["scale"][None, :, None, None] + blk["shift"][None, :, None, None]
        x = y
    feat = x.reshape(x.shape[0], -1)
    return feat @ params["adv_w"].T + params["adv_b"][None, :]


# --------------------------------------------------------------------- main --

if __name__ == "__main__":
    B, C, IMG = 2, 4, 16
    key = jax.random.PRNGKey(0)
    k_img, k_par = jax.random.split(key)
    img = jax.random.normal(k_img, (B, C, IMG, IMG), jnp.float32)
    params = init_params(k_par, C, IMG)

    validity = jax.block_until_ready(jax.jit(discriminator_forward)(img, params))
    assert validity.shape == (B, 1), validity.shape
    assert bool(jnp.all(jnp.isfinite(validity)))

    # loose tolerance: kernels run the matmuls in bf16, reference is pure f32
    ref = jax.block_until_ready(jax.jit(reference_forward)(img, params))
    err = float(jnp.max(jnp.abs(validity - ref)))
    tol = 5e-2 + 5e-2 * float(jnp.max(jnp.abs(ref)))
    assert err <= tol, (err, tol)

    print("KERNEL_OK")
</pallas_src>

<mosaic_0001>
module attributes {stable_mosaic.version = 11 : i64} {
  func.func @kernel(%arg0: i32, %arg1: memref<1x4x88x4xbf16, #tpu.memory_space<vmem>>, %arg2: memref<9x4x16xbf16, #tpu.memory_space<vmem>>, %arg3: memref<3x16xf32, #tpu.memory_space<vmem>>, %arg4: memref<1x72x16xbf16, #tpu.memory_space<vmem>>) attributes {dimension_semantics = [#tpu.dimension_semantics<parallel>], iteration_bounds = array<i64: 2>, scalar_prefetch = 0 : i64, scratch_operands = 0 : i64, tpu.core_type = #tpu.core_type<tc>, window_params = [{transform_indices = @transform_0, window_bounds = array<i64: 1, 4, 88, 4>}, {pipeline_mode = #tpu.pipeline_mode<synchronous>, transform_indices = @transform_1, window_bounds = array<i64: 9, 4, 16>}, {pipeline_mode = #tpu.pipeline_mode<synchronous>, transform_indices = @transform_2, window_bounds = array<i64: 3, 16>}, {transform_indices = @transform_3, window_bounds = array<i64: 1, 72, 16>}]} {
    %c0 = arith.constant 0 : index
    %c0_0 = arith.constant 0 : index
    %0 = vector.load %arg3[%c0, %c0_0] : memref<3x16xf32, #tpu.memory_space<vmem>>, vector<1x16xf32>
    %c1 = arith.constant 1 : index
    %c0_1 = arith.constant 0 : index
    %1 = vector.load %arg3[%c1, %c0_1] : memref<3x16xf32, #tpu.memory_space<vmem>>, vector<1x16xf32>
    %c2 = arith.constant 2 : index
    %c0_2 = arith.constant 0 : index
    %2 = vector.load %arg3[%c2, %c0_2] : memref<3x16xf32, #tpu.memory_space<vmem>>, vector<1x16xf32>
    %c0_3 = arith.constant 0 : index
    %c0_4 = arith.constant 0 : index
    %c0_5 = arith.constant 0 : index
    %c0_6 = arith.constant 0 : index
    %3 = vector.load %arg1[%c0_3, %c0_4, %c0_5, %c0_6] : memref<1x4x88x4xbf16, #tpu.memory_space<vmem>>, vector<1x1x72x4xbf16>
    %4 = vector.shape_cast %3 : vector<1x1x72x4xbf16> to vector<72x4xbf16>
    %c0_7 = arith.constant 0 : index
    %c0_8 = arith.constant 0 : index
    %c0_9 = arith.constant 0 : index
    %5 = vector.load %arg2[%c0_7, %c0_8, %c0_9] : memref<9x4x16xbf16, #tpu.memory_space<vmem>>, vector<1x4x16xbf16>
    %6 = vector.shape_cast %5 : vector<1x4x16xbf16> to vector<4x16xbf16>
    %cst = arith.constant dense<0.000000e+00> : vector<72x16xf32>
    %7 = tpu.matmul %4, %6, %cst {dimension_numbers = #tpu.dot_dimension_numbers<[1], [0], [0], [1], [0, 0, 1, 1], [], []>} : vector<72x4xbf16>, vector<4x16xbf16>, vector<72x16xf32> -> vector<72x16xf32>
    %c0_10 = arith.constant 0 : index
    %c1_11 = arith.constant 1 : index
    %c0_12 = arith.constant 0 : index
    %c0_13 = arith.constant 0 : index
    %8 = vector.load %arg1[%c0_10, %c1_11, %c0_12, %c0_13] : memref<1x4x88x4xbf16, #tpu.memory_space<vmem>>, vector<1x1x72x4xbf16>
    %9 = vector.shape_cast %8 : vector<1x1x72x4xbf16> to vector<72x4xbf16>
    %c1_14 = arith.constant 1 : index
    %c0_15 = arith.constant 0 : index
    %c0_16 = arith.constant 0 : index
    %10 = vector.load %arg2[%c1_14, %c0_15, %c0_16] : memref<9x4x16xbf16, #tpu.memory_space<vmem>>, vector<1x4x16xbf16>
    %11 = vector.shape_cast %10 : vector<1x4x16xbf16> to vector<4x16xbf16>
    %cst_17 = arith.constant dense<0.000000e+00> : vector<72x16xf32>
    %12 = tpu.matmul %9, %11, %cst_17 {dimension_numbers = #tpu.dot_dimension_numbers<[1], [0], [0], [1], [0, 0, 1, 1], [], []>} : vector<72x4xbf16>, vector<4x16xbf16>, vector<72x16xf32> -> vector<72x16xf32>
    %13 = arith.addf %7, %12 : vector<72x16xf32>
    %c0_18 = arith.constant 0 : index
    %c0_19 = arith.constant 0 : index
    %c1_20 = arith.constant 1 : index
    %c0_21 = arith.constant 0 : index
    %14 = vector.load %arg1[%c0_18, %c0_19, %c1_20, %c0_21] : memref<1x4x88x4xbf16, #tpu.memory_space<vmem>>, vector<1x1x72x4xbf16>
    %15 = vector.shape_cast %14 : vector<1x1x72x4xbf16> to vector<72x4xbf16>
    %c2_22 = arith.constant 2 : index
    %c0_23 = arith.constant 0 : index
    %c0_24 = arith.constant 0 : index
    %16 = vector.load %arg2[%c2_22, %c0_23, %c0_24] : memref<9x4x16xbf16, #tpu.memory_space<vmem>>, vector<1x4x16xbf16>
    %17 = vector.shape_cast %16 : vector<1x4x16xbf16> to vector<4x16xbf16>
    %cst_25 = arith.constant dense<0.000000e+00> : vector<72x16xf32>
    %18 = tpu.matmul %15, %17, %cst_25 {dimension_numbers = #tpu.dot_dimension_numbers<[1], [0], [0], [1], [0, 0, 1, 1], [], []>} : vector<72x4xbf16>, vector<4x16xbf16>, vector<72x16xf32> -> vector<72x16xf32>
    %19 = arith.addf %13, %18 : vector<72x16xf32>
    %c0_26 = arith.constant 0 : index
    %c2_27 = arith.constant 2 : index
    %c0_28 = arith.constant 0 : index
    %c0_29 = arith.constant 0 : index
    %20 = vector.load %arg1[%c0_26, %c2_27, %c0_28, %c0_29] : memref<1x4x88x4xbf16, #tpu.memory_space<vmem>>, vector<1x1x72x4xbf16>
    %21 = vector.shape_cast %20 : vector<1x1x72x4xbf16> to vector<72x4xbf16>
    %c3 = arith.constant 3 : index
    %c0_30 = arith.constant 0 : index
    %c0_31 = arith.constant 0 : index
    %22 = vector.load %arg2[%c3, %c0_30, %c0_31] : memref<9x4x16xbf16, #tpu.memory_space<vmem>>, vector<1x4x16xbf16>
    %23 = vector.shape_cast %22 : vector<1x4x16xbf16> to vector<4x16xbf16>
    %cst_32 = arith.constant dense<0.000000e+00> : vector<72x16xf32>
    %24 = tpu.matmul %21, %23, %cst_32 {dimension_numbers = #tpu.dot_dimension_numbers<[1], [0], [0], [1], [0, 0, 1, 1], [], []>} : vector<72x4xbf16>, vector<4x16xbf16>, vector<72x16xf32> -> vector<72x16xf32>
    %25 = arith.addf %19, %24 : vector<72x16xf32>
    %c0_33 = arith.constant 0 : index
    %c3_34 = arith.constant 3 : index
    %c0_35 = arith.constant 0 : index
    %c0_36 = arith.constant 0 : index
    %26 = vector.load %arg1[%c0_33, %c3_34, %c0_35, %c0_36] : memref<1x4x88x4xbf16, #tpu.memory_space<vmem>>, vector<1x1x72x4xbf16>
    %27 = vector.shape_cast %26 : vector<1x1x72x4xbf16> to vector<72x4xbf16>
    %c4 = arith.constant 4 : index
    %c0_37 = arith.constant 0 : index
    %c0_38 = arith.constant 0 : index
    %28 = vector.load %arg2[%c4, %c0_37, %c0_38] : memref<9x4x16xbf16, #tpu.memory_space<vmem>>, vector<1x4x16xbf16>
    %29 = vector.shape_cast %28 : vector<1x4x16xbf16> to vector<4x16xbf16>
    %cst_39 = arith.constant dense<0.000000e+00> : vector<72x16xf32>
    %30 = tpu.matmul %27, %29, %cst_39 {dimension_numbers = #tpu.dot_dimension_numbers<[1], [0], [0], [1], [0, 0, 1, 1], [], []>} : vector<72x4xbf16>, vector<4x16xbf16>, vector<72x16xf32> -> vector<72x16xf32>
    %31 = arith.addf %25, %30 : vector<72x16xf32>
    %c0_40 = arith.constant 0 : index
    %c2_41 = arith.constant 2 : index
    %c1_42 = arith.constant 1 : index
    %c0_43 = arith.constant 0 : index
    %32 = vector.load %arg1[%c0_40, %c2_41, %c1_42, %c0_43] : memref<1x4x88x4xbf16, #tpu.memory_space<vmem>>, vector<1x1x72x4xbf16>
    %33 = vector.shape_cast %32 : vector<1x1x72x4xbf16> to vector<72x4xbf16>
    %c5 = arith.constant 5 : index
    %c0_44 = arith.constant 0 : index
    %c0_45 = arith.constant 0 : index
    %34 = vector.load %arg2[%c5, %c0_44, %c0_45] : memref<9x4x16xbf16, #tpu.memory_space<vmem>>, vector<1x4x16xbf16>
    %35 = vector.shape_cast %34 : vector<1x4x16xbf16> to vector<4x16xbf16>
    %cst_46 = arith.constant dense<0.000000e+00> : vector<72x16xf32>
    %36 = tpu.matmul %33, %35, %cst_46 {dimension_numbers = #tpu.dot_dimension_numbers<[1], [0], [0], [1], [0, 0, 1, 1], [], []>} : vector<72x4xbf16>, vector<4x16xbf16>, vector<72x16xf32> -> vector<72x16xf32>
    %37 = arith.addf %31, %36 : vector<72x16xf32>
    %c0_47 = arith.constant 0 : index
    %c0_48 = arith.constant 0 : index
    %c9 = arith.constant 9 : index
    %c0_49 = arith.constant 0 : index
    %38 = vector.load %arg1[%c0_47, %c0_48, %c9, %c0_49] : memref<1x4x88x4xbf16, #tpu.memory_space<vmem>>, vector<1x1x72x4xbf16>
    %39 = vector.shape_cast %38 : vector<1x1x72x4xbf16> to vector<72x4xbf16>
    %c6 = arith.constant 6 : index
    %c0_50 = arith.constant 0 : index
    %c0_51 = arith.constant 0 : index
    %40 = vector.load %arg2[%c6, %c0_50, %c0_51] : memref<9x4x16xbf16, #tpu.memory_space<vmem>>, vector<1x4x16xbf16>
    %41 = vector.shape_cast %40 : vector<1x4x16xbf16> to vector<4x16xbf16>
    %cst_52 = arith.constant dense<0.000000e+00> : vector<72x16xf32>
    %42 = tpu.matmul %39, %41, %cst_52 {dimension_numbers = #tpu.dot_dimension_numbers<[1], [0], [0], [1], [0, 0, 1, 1], [], []>} : vector<72x4xbf16>, vector<4x16xbf16>, vector<72x16xf32> -> vector<72x16xf32>
    %43 = arith.addf %37, %42 : vector<72x16xf32>
    %c0_53 = arith.constant 0 : index
    %c1_54 = arith.constant 1 : index
    %c9_55 = arith.constant 9 : index
    %c0_56 = arith.constant 0 : index
    %44 = vector.load %arg1[%c0_53, %c1_54, %c9_55, %c0_56] : memref<1x4x88x4xbf16, #tpu.memory_space<vmem>>, vector<1x1x72x4xbf16>
    %45 = vector.shape_cast %44 : vector<1x1x72x4xbf16> to vector<72x4xbf16>
    %c7 = arith.constant 7 : index
    %c0_57 = arith.constant 0 : index
    %c0_58 = arith.constant 0 : index
    %46 = vector.load %arg2[%c7, %c0_57, %c0_58] : memref<9x4x16xbf16, #tpu.memory_space<vmem>>, vector<1x4x16xbf16>
    %47 = vector.shape_cast %46 : vector<1x4x16xbf16> to vector<4x16xbf16>
    %cst_59 = arith.constant dense<0.000000e+00> : vector<72x16xf32>
    %48 = tpu.matmul %45, %47, %cst_59 {dimension_numbers = #tpu.dot_dimension_numbers<[1], [0], [0], [1], [0, 0, 1, 1], [], []>} : vector<72x4xbf16>, vector<4x16xbf16>, vector<72x16xf32> -> vector<72x16xf32>
    %49 = arith.addf %43, %48 : vector<72x16xf32>
    %c0_60 = arith.constant 0 : index
    %c0_61 = arith.constant 0 : index
    %c10 = arith.constant 10 : index
    %c0_62 = arith.constant 0 : index
    %50 = vector.load %arg1[%c0_60, %c0_61, %c10, %c0_62] : memref<1x4x88x4xbf16, #tpu.memory_space<vmem>>, vector<1x1x72x4xbf16>
    %51 = vector.shape_cast %50 : vector<1x1x72x4xbf16> to vector<72x4xbf16>
    %c8 = arith.constant 8 : index
    %c0_63 = arith.constant 0 : index
    %c0_64 = arith.constant 0 : index
    %52 = vector.load %arg2[%c8, %c0_63, %c0_64] : memref<9x4x16xbf16, #tpu.memory_space<vmem>>, vector<1x4x16xbf16>
    %53 = vector.shape_cast %52 : vector<1x4x16xbf16> to vector<4x16xbf16>
    %cst_65 = arith.constant dense<0.000000e+00> : vector<72x16xf32>
    %54 = tpu.matmul %51, %53, %cst_65 {dimension_numbers = #tpu.dot_dimension_numbers<[1], [0], [0], [1], [0, 0, 1, 1], [], []>} : vector<72x4xbf16>, vector<4x16xbf16>, vector<72x16xf32> -> vector<72x16xf32>
    %55 = arith.addf %49, %54 : vector<72x16xf32>
    %56 = vector.broadcast %0 : vector<1x16xf32> to vector<72x16xf32>
    %57 = arith.addf %55, %56 : vector<72x16xf32>
    %cst_66 = arith.constant 0.000000e+00 : f32
    %58 = vector.broadcast %cst_66 : f32 to vector<72x16xf32>
    %59 = arith.cmpf ogt, %57, %58 : vector<72x16xf32>
    %cst_67 = arith.constant 2.000000e-01 : f32
    %60 = vector.broadcast %cst_67 : f32 to vector<72x16xf32>
    %61 = arith.mulf %60, %57 : vector<72x16xf32>
    %62 = arith.select %59, %57, %61 : vector<72x16xi1>, vector<72x16xf32>
    %63 = vector.broadcast %1 : vector<1x16xf32> to vector<72x16xf32>
    %64 = arith.mulf %62, %63 : vector<72x16xf32>
    %65 = vector.broadcast %2 : vector<1x16xf32> to vector<72x16xf32>
    %66 = arith.addf %64, %65 : vector<72x16xf32>
    %67 = arith.truncf %66 : vector<72x16xf32> to vector<72x16xbf16>
    %c0_68 = arith.constant 0 : index
    %c0_69 = arith.constant 0 : index
    %c0_70 = arith.constant 0 : index
    %68 = vector.load %arg4[%c0_68, %c0_69, %c0_70] : memref<1x72x16xbf16, #tpu.memory_space<vmem>>, vector<1x72x16xbf16>
    %69 = vector.shape_cast %68 : vector<1x72x16xbf16> to vector<72x16xbf16>
    %70 = vector.shape_cast %67 : vector<72x16xbf16> to vector<1x72x16xbf16>
    tpu.vector_store %arg4[%c0_68, %c0_69, %c0_70], %70 {strides = array<i32>} : memref<1x72x16xbf16, #tpu.memory_space<vmem>>, vector<1x72x16xbf16>,
    return
  }
  func.func @transform_0(%arg0: i32) -> (i32, i32, i32, i32) {
    %c0_i32 = arith.constant 0 : i32
    %c0_i32_0 = arith.constant 0 : i32
    %c0_i32_1 = arith.constant 0 : i32
    %c0_i32_2 = arith.constant 0 : i32
    return %arg0, %c0_i32, %c0_i32_0, %c0_i32_1 : i32, i32, i32, i32
  }
  func.func @transform_1(%arg0: i32) -> (i32, i32, i32) {
    %c0_i32 = arith.constant 0 : i32
    %c0_i32_0 = arith.constant 0 : i32
    %c0_i32_1 = arith.constant 0 : i32
    %c0_i32_2 = arith.constant 0 : i32
    return %c0_i32, %c0_i32_0, %c0_i32_1 : i32, i32, i32
  }
  func.func @transform_2(%arg0: i32) -> (i32, i32) {
    %c0_i32 = arith.constant 0 : i32
    %c0_i32_0 = arith.constant 0 : i32
    %c0_i32_1 = arith.constant 0 : i32
    return %c0_i32, %c0_i32_0 : i32, i32
  }
  func.func @transform_3(%arg0: i32) -> (i32, i32, i32) {
    %c0_i32 = arith.constant 0 : i32
    %c0_i32_0 = arith.constant 0 : i32
    %c0_i32_1 = arith.constant 0 : i32
    return %arg0, %c0_i32, %c0_i32_0 : i32, i32, i32
  }
}

module attributes {stable_mosaic.version = 11 : i64} {
  func.func @kernel(%arg0: i32, %arg1: memref<1x4x32x16xbf16, #tpu.memory_space<vmem>>, %arg2: memref<9x16x32xbf16, #tpu.memory_space<vmem>>, %arg3: memref<3x32xf32, #tpu.memory_space<vmem>>, %arg4: memref<1x20x32xbf16, #tpu.memory_space<vmem>>) attributes {dimension_semantics = [#tpu.dimension_semantics<parallel>], iteration_bounds = array<i64: 2>, scalar_prefetch = 0 : i64, scratch_operands = 0 : i64, tpu.core_type = #tpu.core_type<tc>, window_params = [{transform_indices = @transform_0, window_bounds = array<i64: 1, 4, 32, 16>}, {pipeline_mode = #tpu.pipeline_mode<synchronous>, transform_indices = @transform_1, window_bounds = array<i64: 9, 16, 32>}, {pipeline_mode = #tpu.pipeline_mode<synchronous>, transform_indices = @transform_2, window_bounds = array<i64: 3, 32>}, {transform_indices = @transform_3, window_bounds = array<i64: 1, 20, 32>}]} {
    %c0 = arith.constant 0 : index
    %c0_0 = arith.constant 0 : index
    %0 = vector.load %arg3[%c0, %c0_0] : memref<3x32xf32, #tpu.memory_space<vmem>>, vector<1x32xf32>
    %c1 = arith.constant 1 : index
    %c0_1 = arith.constant 0 : index
    %1 = vector.load %arg3[%c1, %c0_1] : memref<3x32xf32, #tpu.memory_space<vmem>>, vector<1x32xf32>
    %c2 = arith.constant 2 : index
    %c0_2 = arith.constant 0 : index
    %2 = vector.load %arg3[%c2, %c0_2] : memref<3x32xf32, #tpu.memory_space<vmem>>, vector<1x32xf32>
    %c0_3 = arith.constant 0 : index
    %c0_4 = arith.constant 0 : index
    %c0_5 = arith.constant 0 : index
    %c0_6 = arith.constant 0 : index
    %3 = vector.load %arg1[%c0_3, %c0_4, %c0_5, %c0_6] : memref<1x4x32x16xbf16, #tpu.memory_space<vmem>>, vector<1x1x20x16xbf16>
    %4 = vector.shape_cast %3 : vector<1x1x20x16xbf16> to vector<20x16xbf16>
    %c0_7 = arith.constant 0 : index
    %c0_8 = arith.constant 0 : index
    %c0_9 = arith.constant 0 : index
    %5 = vector.load %arg2[%c0_7, %c0_8, %c0_9] : memref<9x16x32xbf16, #tpu.memory_space<vmem>>, vector<1x16x32xbf16>
    %6 = vector.shape_cast %5 : vector<1x16x32xbf16> to vector<16x32xbf16>
    %cst = arith.constant dense<0.000000e+00> : vector<20x32xf32>
    %7 = tpu.matmul %4, %6, %cst {dimension_numbers = #tpu.dot_dimension_numbers<[1], [0], [0], [1], [0, 0, 1, 1], [], []>} : vector<20x16xbf16>, vector<16x32xbf16>, vector<20x32xf32> -> vector<20x32xf32>
    %c0_10 = arith.constant 0 : index
    %c1_11 = arith.constant 1 : index
    %c0_12 = arith.constant 0 : index
    %c0_13 = arith.constant 0 : index
    %8 = vector.load %arg1[%c0_10, %c1_11, %c0_12, %c0_13] : memref<1x4x32x16xbf16, #tpu.memory_space<vmem>>, vector<1x1x20x16xbf16>
    %9 = vector.shape_cast %8 : vector<1x1x20x16xbf16> to vector<20x16xbf16>
    %c1_14 = arith.constant 1 : index
    %c0_15 = arith.constant 0 : index
    %c0_16 = arith.constant 0 : index
    %10 = vector.load %arg2[%c1_14, %c0_15, %c0_16] : memref<9x16x32xbf16, #tpu.memory_space<vmem>>, vector<1x16x32xbf16>
    %11 = vector.shape_cast %10 : vector<1x16x32xbf16> to vector<16x32xbf16>
    %cst_17 = arith.constant dense<0.000000e+00> : vector<20x32xf32>
    %12 = tpu.matmul %9, %11, %cst_17 {dimension_numbers = #tpu.dot_dimension_numbers<[1], [0], [0], [1], [0, 0, 1, 1], [], []>} : vector<20x16xbf16>, vector<16x32xbf16>, vector<20x32xf32> -> vector<20x32xf32>
    %13 = arith.addf %7, %12 : vector<20x32xf32>
    %c0_18 = arith.constant 0 : index
    %c0_19 = arith.constant 0 : index
    %c1_20 = arith.constant 1 : index
    %c0_21 = arith.constant 0 : index
    %14 = vector.load %arg1[%c0_18, %c0_19, %c1_20, %c0_21] : memref<1x4x32x16xbf16, #tpu.memory_space<vmem>>, vector<1x1x20x16xbf16>
    %15 = vector.shape_cast %14 : vector<1x1x20x16xbf16> to vector<20x16xbf16>
    %c2_22 = arith.constant 2 : index
    %c0_23 = arith.constant 0 : index
    %c0_24 = arith.constant 0 : index
    %16 = vector.load %arg2[%c2_22, %c0_23, %c0_24] : memref<9x16x32xbf16, #tpu.memory_space<vmem>>, vector<1x16x32xbf16>
    %17 = vector.shape_cast %16 : vector<1x16x32xbf16> to vector<16x32xbf16>
    %cst_25 = arith.constant dense<0.000000e+00> : vector<20x32xf32>
    %18 = tpu.matmul %15, %17, %cst_25 {dimension_numbers = #tpu.dot_dimension_numbers<[1], [0], [0], [1], [0, 0, 1, 1], [], []>} : vector<20x16xbf16>, vector<16x32xbf16>, vector<20x32xf32> -> vector<20x32xf32>
    %19 = arith.addf %13, %18 : vector<20x32xf32>
    %c0_26 = arith.constant 0 : index
    %c2_27 = arith.constant 2 : index
    %c0_28 = arith.constant 0 : index
    %c0_29 = arith.constant 0 : index
    %20 = vector.load %arg1[%c0_26, %c2_27, %c0_28, %c0_29] : memref<1x4x32x16xbf16, #tpu.memory_space<vmem>>, vector<1x1x20x16xbf16>
    %21 = vector.shape_cast %20 : vector<1x1x20x16xbf16> to vector<20x16xbf16>
    %c3 = arith.constant 3 : index
    %c0_30 = arith.constant 0 : index
    %c0_31 = arith.constant 0 : index
    %22 = vector.load %arg2[%c3, %c0_30, %c0_31] : memref<9x16x32xbf16, #tpu.memory_space<vmem>>, vector<1x16x32xbf16>
    %23 = vector.shape_cast %22 : vector<1x16x32xbf16> to vector<16x32xbf16>
    %cst_32 = arith.constant dense<0.000000e+00> : vector<20x32xf32>
    %24 = tpu.matmul %21, %23, %cst_32 {dimension_numbers = #tpu.dot_dimension_numbers<[1], [0], [0], [1], [0, 0, 1, 1], [], []>} : vector<20x16xbf16>, vector<16x32xbf16>, vector<20x32xf32> -> vector<20x32xf32>
    %25 = arith.addf %19, %24 : vector<20x32xf32>
    %c0_33 = arith.constant 0 : index
    %c3_34 = arith.constant 3 : index
    %c0_35 = arith.constant 0 : index
    %c0_36 = arith.constant 0 : index
    %26 = vector.load %arg1[%c0_33, %c3_34, %c0_35, %c0_36] : memref<1x4x32x16xbf16, #tpu.memory_space<vmem>>, vector<1x1x20x16xbf16>
    %27 = vector.shape_cast %26 : vector<1x1x20x16xbf16> to vector<20x16xbf16>
    %c4 = arith.constant 4 : index
    %c0_37 = arith.constant 0 : index
    %c0_38 = arith.constant 0 : index
    %28 = vector.load %arg2[%c4, %c0_37, %c0_38] : memref<9x16x32xbf16, #tpu.memory_space<vmem>>, vector<1x16x32xbf16>
    %29 = vector.shape_cast %28 : vector<1x16x32xbf16> to vector<16x32xbf16>
    %cst_39 = arith.constant dense<0.000000e+00> : vector<20x32xf32>
    %30 = tpu.matmul %27, %29, %cst_39 {dimension_numbers = #tpu.dot_dimension_numbers<[1], [0], [0], [1], [0, 0, 1, 1], [], []>} : vector<20x16xbf16>, vector<16x32xbf16>, vector<20x32xf32> -> vector<20x32xf32>
    %31 = arith.addf %25, %30 : vector<20x32xf32>
    %c0_40 = arith.constant 0 : index
    %c2_41 = arith.constant 2 : index
    %c1_42 = arith.constant 1 : index
    %c0_43 = arith.constant 0 : index
    %32 = vector.load %arg1[%c0_40, %c2_41, %c1_42, %c0_43] : memref<1x4x32x16xbf16, #tpu.memory_space<vmem>>, vector<1x1x20x16xbf16>
    %33 = vector.shape_cast %32 : vector<1x1x20x16xbf16> to vector<20x16xbf16>
    %c5 = arith.constant 5 : index
    %c0_44 = arith.constant 0 : index
    %c0_45 = arith.constant 0 : index
    %34 = vector.load %arg2[%c5, %c0_44, %c0_45] : memref<9x16x32xbf16, #tpu.memory_space<vmem>>, vector<1x16x32xbf16>
    %35 = vector.shape_cast %34 : vector<1x16x32xbf16> to vector<16x32xbf16>
    %cst_46 = arith.constant dense<0.000000e+00> : vector<20x32xf32>
    %36 = tpu.matmul %33, %35, %cst_46 {dimension_numbers = #tpu.dot_dimension_numbers<[1], [0], [0], [1], [0, 0, 1, 1], [], []>} : vector<20x16xbf16>, vector<16x32xbf16>, vector<20x32xf32> -> vector<20x32xf32>
    %37 = arith.addf %31, %36 : vector<20x32xf32>
    %c0_47 = arith.constant 0 : index
    %c0_48 = arith.constant 0 : index
    %c5_49 = arith.constant 5 : index
    %c0_50 = arith.constant 0 : index
    %38 = vector.load %arg1[%c0_47, %c0_48, %c5_49, %c0_50] : memref<1x4x32x16xbf16, #tpu.memory_space<vmem>>, vector<1x1x20x16xbf16>
    %39 = vector.shape_cast %38 : vector<1x1x20x16xbf16> to vector<20x16xbf16>
    %c6 = arith.constant 6 : index
    %c0_51 = arith.constant 0 : index
    %c0_52 = arith.constant 0 : index
    %40 = vector.load %arg2[%c6, %c0_51, %c0_52] : memref<9x16x32xbf16, #tpu.memory_space<vmem>>, vector<1x16x32xbf16>
    %41 = vector.shape_cast %40 : vector<1x16x32xbf16> to vector<16x32xbf16>
    %cst_53 = arith.constant dense<0.000000e+00> : vector<20x32xf32>
    %42 = tpu.matmul %39, %41, %cst_53 {dimension_numbers = #tpu.dot_dimension_numbers<[1], [0], [0], [1], [0, 0, 1, 1], [], []>} : vector<20x16xbf16>, vector<16x32xbf16>, vector<20x32xf32> -> vector<20x32xf32>
    %43 = arith.addf %37, %42 : vector<20x32xf32>
    %c0_54 = arith.constant 0 : index
    %c1_55 = arith.constant 1 : index
    %c5_56 = arith.constant 5 : index
    %c0_57 = arith.constant 0 : index
    %44 = vector.load %arg1[%c0_54, %c1_55, %c5_56, %c0_57] : memref<1x4x32x16xbf16, #tpu.memory_space<vmem>>, vector<1x1x20x16xbf16>
    %45 = vector.shape_cast %44 : vector<1x1x20x16xbf16> to vector<20x16xbf16>
    %c7 = arith.constant 7 : index
    %c0_58 = arith.constant 0 : index
    %c0_59 = arith.constant 0 : index
    %46 = vector.load %arg2[%c7, %c0_58, %c0_59] : memref<9x16x32xbf16, #tpu.memory_space<vmem>>, vector<1x16x32xbf16>
    %47 = vector.shape_cast %46 : vector<1x16x32xbf16> to vector<16x32xbf16>
    %cst_60 = arith.constant dense<0.000000e+00> : vector<20x32xf32>
    %48 = tpu.matmul %45, %47, %cst_60 {dimension_numbers = #tpu.dot_dimension_numbers<[1], [0], [0], [1], [0, 0, 1, 1], [], []>} : vector<20x16xbf16>, vector<16x32xbf16>, vector<20x32xf32> -> vector<20x32xf32>
    %49 = arith.addf %43, %48 : vector<20x32xf32>
    %c0_61 = arith.constant 0 : index
    %c0_62 = arith.constant 0 : index
    %c6_63 = arith.constant 6 : index
    %c0_64 = arith.constant 0 : index
    %50 = vector.load %arg1[%c0_61, %c0_62, %c6_63, %c0_64] : memref<1x4x32x16xbf16, #tpu.memory_space<vmem>>, vector<1x1x20x16xbf16>
    %51 = vector.shape_cast %50 : vector<1x1x20x16xbf16> to vector<20x16xbf16>
    %c8 = arith.constant 8 : index
    %c0_65 = arith.constant 0 : index
    %c0_66 = arith.constant 0 : index
    %52 = vector.load %arg2[%c8, %c0_65, %c0_66] : memref<9x16x32xbf16, #tpu.memory_space<vmem>>, vector<1x16x32xbf16>
    %53 = vector.shape_cast %52 : vector<1x16x32xbf16> to vector<16x32xbf16>
    %cst_67 = arith.constant dense<0.000000e+00> : vector<20x32xf32>
    %54 = tpu.matmul %51, %53, %cst_67 {dimension_numbers = #tpu.dot_dimension_numbers<[1], [0], [0], [1], [0, 0, 1, 1], [], []>} : vector<20x16xbf16>, vector<16x32xbf16>, vector<20x32xf32> -> vector<20x32xf32>
    %55 = arith.addf %49, %54 : vector<20x32xf32>
    %56 = vector.broadcast %0 : vector<1x32xf32> to vector<20x32xf32>
    %57 = arith.addf %55, %56 : vector<20x32xf32>
    %cst_68 = arith.constant 0.000000e+00 : f32
    %58 = vector.broadcast %cst_68 : f32 to vector<20x32xf32>
    %59 = arith.cmpf ogt, %57, %58 : vector<20x32xf32>
    %cst_69 = arith.constant 2.000000e-01 : f32
    %60 = vector.broadcast %cst_69 : f32 to vector<20x32xf32>
    %61 = arith.mulf %60, %57 : vector<20x32xf32>
    %62 = arith.select %59, %57, %61 : vector<20x32xi1>, vector<20x32xf32>
    %63 = vector.broadcast %1 : vector<1x32xf32> to vector<20x32xf32>
    %64 = arith.mulf %62, %63 : vector<20x32xf32>
    %65 = vector.broadcast %2 : vector<1x32xf32> to vector<20x32xf32>
    %66 = arith.addf %64, %65 : vector<20x32xf32>
    %67 = arith.truncf %66 : vector<20x32xf32> to vector<20x32xbf16>
    %c0_70 = arith.constant 0 : index
    %c0_71 = arith.constant 0 : index
    %c0_72 = arith.constant 0 : index
    %68 = vector.load %arg4[%c0_70, %c0_71, %c0_72] : memref<1x20x32xbf16, #tpu.memory_space<vmem>>, vector<1x20x32xbf16>
    %69 = vector.shape_cast %68 : vector<1x20x32xbf16> to vector<20x32xbf16>
    %70 = vector.shape_cast %67 : vector<20x32xbf16> to vector<1x20x32xbf16>
    tpu.vector_store %arg4[%c0_70, %c0_71, %c0_72], %70 {strides = array<i32>} : memref<1x20x32xbf16, #tpu.memory_space<vmem>>, vector<1x20x32xbf16>,
    return
  }
  func.func @transform_0(%arg0: i32) -> (i32, i32, i32, i32) {
    %c0_i32 = arith.constant 0 : i32
    %c0_i32_0 = arith.constant 0 : i32
    %c0_i32_1 = arith.constant 0 : i32
    %c0_i32_2 = arith.constant 0 : i32
    return %arg0, %c0_i32, %c0_i32_0, %c0_i32_1 : i32, i32, i32, i32
  }
  func.func @transform_1(%arg0: i32) -> (i32, i32, i32) {
    %c0_i32 = arith.constant 0 : i32
    %c0_i32_0 = arith.constant 0 : i32
    %c0_i32_1 = arith.constant 0 : i32
    %c0_i32_2 = arith.constant 0 : i32
    return %c0_i32, %c0_i32_0, %c0_i32_1 : i32, i32, i32
  }
  func.func @transform_2(%arg0: i32) -> (i32, i32) {
    %c0_i32 = arith.constant 0 : i32
    %c0_i32_0 = arith.constant 0 : i32
    %c0_i32_1 = arith.constant 0 : i32
    return %c0_i32, %c0_i32_0 : i32, i32
  }
  func.func @transform_3(%arg0: i32) -> (i32, i32, i32) {
    %c0_i32 = arith.constant 0 : i32
    %c0_i32_0 = arith.constant 0 : i32
    %c0_i32_1 = arith.constant 0 : i32
    return %arg0, %c0_i32, %c0_i32_0 : i32, i32, i32
  }
}

module attributes {stable_mosaic.version = 11 : i64} {
  func.func @kernel(%arg0: i32, %arg1: memref<1x4x16x32xbf16, #tpu.memory_space<vmem>>, %arg2: memref<9x32x64xbf16, #tpu.memory_space<vmem>>, %arg3: memref<3x64xf32, #tpu.memory_space<vmem>>, %arg4: memref<1x6x64xbf16, #tpu.memory_space<vmem>>) attributes {dimension_semantics = [#tpu.dimension_semantics<parallel>], iteration_bounds = array<i64: 2>, scalar_prefetch = 0 : i64, scratch_operands = 0 : i64, tpu.core_type = #tpu.core_type<tc>, window_params = [{transform_indices = @transform_0, window_bounds = array<i64: 1, 4, 16, 32>}, {pipeline_mode = #tpu.pipeline_mode<synchronous>, transform_indices = @transform_1, window_bounds = array<i64: 9, 32, 64>}, {pipeline_mode = #tpu.pipeline_mode<synchronous>, transform_indices = @transform_2, window_bounds = array<i64: 3, 64>}, {transform_indices = @transform_3, window_bounds = array<i64: 1, 6, 64>}]} {
    %c0 = arith.constant 0 : index
    %c0_0 = arith.constant 0 : index
    %0 = vector.load %arg3[%c0, %c0_0] : memref<3x64xf32, #tpu.memory_space<vmem>>, vector<1x64xf32>
    %c1 = arith.constant 1 : index
    %c0_1 = arith.constant 0 : index
    %1 = vector.load %arg3[%c1, %c0_1] : memref<3x64xf32, #tpu.memory_space<vmem>>, vector<1x64xf32>
    %c2 = arith.constant 2 : index
    %c0_2 = arith.constant 0 : index
    %2 = vector.load %arg3[%c2, %c0_2] : memref<3x64xf32, #tpu.memory_space<vmem>>, vector<1x64xf32>
    %c0_3 = arith.constant 0 : index
    %c0_4 = arith.constant 0 : index
    %c0_5 = arith.constant 0 : index
    %c0_6 = arith.constant 0 : index
    %3 = vector.load %arg1[%c0_3, %c0_4, %c0_5, %c0_6] : memref<1x4x16x32xbf16, #tpu.memory_space<vmem>>, vector<1x1x6x32xbf16>
    %4 = vector.shape_cast %3 : vector<1x1x6x32xbf16> to vector<6x32xbf16>
    %c0_7 = arith.constant 0 : index
    %c0_8 = arith.constant 0 : index
    %c0_9 = arith.constant 0 : index
    %5 = vector.load %arg2[%c0_7, %c0_8, %c0_9] : memref<9x32x64xbf16, #tpu.memory_space<vmem>>, vector<1x32x64xbf16>
    %6 = vector.shape_cast %5 : vector<1x32x64xbf16> to vector<32x64xbf16>
    %cst = arith.constant dense<0.000000e+00> : vector<6x64xf32>
    %7 = tpu.matmul %4, %6, %cst {dimension_numbers = #tpu.dot_dimension_numbers<[1], [0], [0], [1], [0, 0, 1, 1], [], []>} : vector<6x32xbf16>, vector<32x64xbf16>, vector<6x64xf32> -> vector<6x64xf32>
    %c0_10 = arith.constant 0 : index
    %c1_11 = arith.constant 1 : index
    %c0_12 = arith.constant 0 : index
    %c0_13 = arith.constant 0 : index
    %8 = vector.load %arg1[%c0_10, %c1_11, %c0_12, %c0_13] : memref<1x4x16x32xbf16, #tpu.memory_space<vmem>>, vector<1x1x6x32xbf16>
    %9 = vector.shape_cast %8 : vector<1x1x6x32xbf16> to vector<6x32xbf16>
    %c1_14 = arith.constant 1 : index
    %c0_15 = arith.constant 0 : index
    %c0_16 = arith.constant 0 : index
    %10 = vector.load %arg2[%c1_14, %c0_15, %c0_16] : memref<9x32x64xbf16, #tpu.memory_space<vmem>>, vector<1x32x64xbf16>
    %11 = vector.shape_cast %10 : vector<1x32x64xbf16> to vector<32x64xbf16>
    %cst_17 = arith.constant dense<0.000000e+00> : vector<6x64xf32>
    %12 = tpu.matmul %9, %11, %cst_17 {dimension_numbers = #tpu.dot_dimension_numbers<[1], [0], [0], [1], [0, 0, 1, 1], [], []>} : vector<6x32xbf16>, vector<32x64xbf16>, vector<6x64xf32> -> vector<6x64xf32>
    %13 = arith.addf %7, %12 : vector<6x64xf32>
    %c0_18 = arith.constant 0 : index
    %c0_19 = arith.constant 0 : index
    %c1_20 = arith.constant 1 : index
    %c0_21 = arith.constant 0 : index
    %14 = vector.load %arg1[%c0_18, %c0_19, %c1_20, %c0_21] : memref<1x4x16x32xbf16, #tpu.memory_space<vmem>>, vector<1x1x6x32xbf16>
    %15 = vector.shape_cast %14 : vector<1x1x6x32xbf16> to vector<6x32xbf16>
    %c2_22 = arith.constant 2 : index
    %c0_23 = arith.constant 0 : index
    %c0_24 = arith.constant 0 : index
    %16 = vector.load %arg2[%c2_22, %c0_23, %c0_24] : memref<9x32x64xbf16, #tpu.memory_space<vmem>>, vector<1x32x64xbf16>
    %17 = vector.shape_cast %16 : vector<1x32x64xbf16> to vector<32x64xbf16>
    %cst_25 = arith.constant dense<0.000000e+00> : vector<6x64xf32>
    %18 = tpu.matmul %15, %17, %cst_25 {dimension_numbers = #tpu.dot_dimension_numbers<[1], [0], [0], [1], [0, 0, 1, 1], [], []>} : vector<6x32xbf16>, vector<32x64xbf16>, vector<6x64xf32> -> vector<6x64xf32>
    %19 = arith.addf %13, %18 : vector<6x64xf32>
    %c0_26 = arith.constant 0 : index
    %c2_27 = arith.constant 2 : index
    %c0_28 = arith.constant 0 : index
    %c0_29 = arith.constant 0 : index
    %20 = vector.load %arg1[%c0_26, %c2_27, %c0_28, %c0_29] : memref<1x4x16x32xbf16, #tpu.memory_space<vmem>>, vector<1x1x6x32xbf16>
    %21 = vector.shape_cast %20 : vector<1x1x6x32xbf16> to vector<6x32xbf16>
    %c3 = arith.constant 3 : index
    %c0_30 = arith.constant 0 : index
    %c0_31 = arith.constant 0 : index
    %22 = vector.load %arg2[%c3, %c0_30, %c0_31] : memref<9x32x64xbf16, #tpu.memory_space<vmem>>, vector<1x32x64xbf16>
    %23 = vector.shape_cast %22 : vector<1x32x64xbf16> to vector<32x64xbf16>
    %cst_32 = arith.constant dense<0.000000e+00> : vector<6x64xf32>
    %24 = tpu.matmul %21, %23, %cst_32 {dimension_numbers = #tpu.dot_dimension_numbers<[1], [0], [0], [1], [0, 0, 1, 1], [], []>} : vector<6x32xbf16>, vector<32x64xbf16>, vector<6x64xf32> -> vector<6x64xf32>
    %25 = arith.addf %19, %24 : vector<6x64xf32>
    %c0_33 = arith.constant 0 : index
    %c3_34 = arith.constant 3 : index
    %c0_35 = arith.constant 0 : index
    %c0_36 = arith.constant 0 : index
    %26 = vector.load %arg1[%c0_33, %c3_34, %c0_35, %c0_36] : memref<1x4x16x32xbf16, #tpu.memory_space<vmem>>, vector<1x1x6x32xbf16>
    %27 = vector.shape_cast %26 : vector<1x1x6x32xbf16> to vector<6x32xbf16>
    %c4 = arith.constant 4 : index
    %c0_37 = arith.constant 0 : index
    %c0_38 = arith.constant 0 : index
    %28 = vector.load %arg2[%c4, %c0_37, %c0_38] : memref<9x32x64xbf16, #tpu.memory_space<vmem>>, vector<1x32x64xbf16>
    %29 = vector.shape_cast %28 : vector<1x32x64xbf16> to vector<32x64xbf16>
    %cst_39 = arith.constant dense<0.000000e+00> : vector<6x64xf32>
    %30 = tpu.matmul %27, %29, %cst_39 {dimension_numbers = #tpu.dot_dimension_numbers<[1], [0], [0], [1], [0, 0, 1, 1], [], []>} : vector<6x32xbf16>, vector<32x64xbf16>, vector<6x64xf32> -> vector<6x64xf32>
    %31 = arith.addf %25, %30 : vector<6x64xf32>
    %c0_40 = arith.constant 0 : index
    %c2_41 = arith.constant 2 : index
    %c1_42 = arith.constant 1 : index
    %c0_43 = arith.constant 0 : index
    %32 = vector.load %arg1[%c0_40, %c2_41, %c1_42, %c0_43] : memref<1x4x16x32xbf16, #tpu.memory_space<vmem>>, vector<1x1x6x32xbf16>
    %33 = vector.shape_cast %32 : vector<1x1x6x32xbf16> to vector<6x32xbf16>
    %c5 = arith.constant 5 : index
    %c0_44 = arith.constant 0 : index
    %c0_45 = arith.constant 0 : index
    %34 = vector.load %arg2[%c5, %c0_44, %c0_45] : memref<9x32x64xbf16, #tpu.memory_space<vmem>>, vector<1x32x64xbf16>
    %35 = vector.shape_cast %34 : vector<1x32x64xbf16> to vector<32x64xbf16>
    %cst_46 = arith.constant dense<0.000000e+00> : vector<6x64xf32>
    %36 = tpu.matmul %33, %35, %cst_46 {dimension_numbers = #tpu.dot_dimension_numbers<[1], [0], [0], [1], [0, 0, 1, 1], [], []>} : vector<6x32xbf16>, vector<32x64xbf16>, vector<6x64xf32> -> vector<6x64xf32>
    %37 = arith.addf %31, %36 : vector<6x64xf32>
    %c0_47 = arith.constant 0 : index
    %c0_48 = arith.constant 0 : index
    %c3_49 = arith.constant 3 : index
    %c0_50 = arith.constant 0 : index
    %38 = vector.load %arg1[%c0_47, %c0_48, %c3_49, %c0_50] : memref<1x4x16x32xbf16, #tpu.memory_space<vmem>>, vector<1x1x6x32xbf16>
    %39 = vector.shape_cast %38 : vector<1x1x6x32xbf16> to vector<6x32xbf16>
    %c6 = arith.constant 6 : index
    %c0_51 = arith.constant 0 : index
    %c0_52 = arith.constant 0 : index
    %40 = vector.load %arg2[%c6, %c0_51, %c0_52] : memref<9x32x64xbf16, #tpu.memory_space<vmem>>, vector<1x32x64xbf16>
    %41 = vector.shape_cast %40 : vector<1x32x64xbf16> to vector<32x64xbf16>
    %cst_53 = arith.constant dense<0.000000e+00> : vector<6x64xf32>
    %42 = tpu.matmul %39, %41, %cst_53 {dimension_numbers = #tpu.dot_dimension_numbers<[1], [0], [0], [1], [0, 0, 1, 1], [], []>} : vector<6x32xbf16>, vector<32x64xbf16>, vector<6x64xf32> -> vector<6x64xf32>
    %43 = arith.addf %37, %42 : vector<6x64xf32>
    %c0_54 = arith.constant 0 : index
    %c1_55 = arith.constant 1 : index
    %c3_56 = arith.constant 3 : index
    %c0_57 = arith.constant 0 : index
    %44 = vector.load %arg1[%c0_54, %c1_55, %c3_56, %c0_57] : memref<1x4x16x32xbf16, #tpu.memory_space<vmem>>, vector<1x1x6x32xbf16>
    %45 = vector.shape_cast %44 : vector<1x1x6x32xbf16> to vector<6x32xbf16>
    %c7 = arith.constant 7 : index
    %c0_58 = arith.constant 0 : index
    %c0_59 = arith.constant 0 : index
    %46 = vector.load %arg2[%c7, %c0_58, %c0_59] : memref<9x32x64xbf16, #tpu.memory_space<vmem>>, vector<1x32x64xbf16>
    %47 = vector.shape_cast %46 : vector<1x32x64xbf16> to vector<32x64xbf16>
    %cst_60 = arith.constant dense<0.000000e+00> : vector<6x64xf32>
    %48 = tpu.matmul %45, %47, %cst_60 {dimension_numbers = #tpu.dot_dimension_numbers<[1], [0], [0], [1], [0, 0, 1, 1], [], []>} : vector<6x32xbf16>, vector<32x64xbf16>, vector<6x64xf32> -> vector<6x64xf32>
    %49 = arith.addf %43, %48 : vector<6x64xf32>
    %c0_61 = arith.constant 0 : index
    %c0_62 = arith.constant 0 : index
    %c4_63 = arith.constant 4 : index
    %c0_64 = arith.constant 0 : index
    %50 = vector.load %arg1[%c0_61, %c0_62, %c4_63, %c0_64] : memref<1x4x16x32xbf16, #tpu.memory_space<vmem>>, vector<1x1x6x32xbf16>
    %51 = vector.shape_cast %50 : vector<1x1x6x32xbf16> to vector<6x32xbf16>
    %c8 = arith.constant 8 : index
    %c0_65 = arith.constant 0 : index
    %c0_66 = arith.constant 0 : index
    %52 = vector.load %arg2[%c8, %c0_65, %c0_66] : memref<9x32x64xbf16, #tpu.memory_space<vmem>>, vector<1x32x64xbf16>
    %53 = vector.shape_cast %52 : vector<1x32x64xbf16> to vector<32x64xbf16>
    %cst_67 = arith.constant dense<0.000000e+00> : vector<6x64xf32>
    %54 = tpu.matmul %51, %53, %cst_67 {dimension_numbers = #tpu.dot_dimension_numbers<[1], [0], [0], [1], [0, 0, 1, 1], [], []>} : vector<6x32xbf16>, vector<32x64xbf16>, vector<6x64xf32> -> vector<6x64xf32>
    %55 = arith.addf %49, %54 : vector<6x64xf32>
    %56 = vector.broadcast %0 : vector<1x64xf32> to vector<6x64xf32>
    %57 = arith.addf %55, %56 : vector<6x64xf32>
    %cst_68 = arith.constant 0.000000e+00 : f32
    %58 = vector.broadcast %cst_68 : f32 to vector<6x64xf32>
    %59 = arith.cmpf ogt, %57, %58 : vector<6x64xf32>
    %cst_69 = arith.constant 2.000000e-01 : f32
    %60 = vector.broadcast %cst_69 : f32 to vector<6x64xf32>
    %61 = arith.mulf %60, %57 : vector<6x64xf32>
    %62 = arith.select %59, %57, %61 : vector<6x64xi1>, vector<6x64xf32>
    %63 = vector.broadcast %1 : vector<1x64xf32> to vector<6x64xf32>
    %64 = arith.mulf %62, %63 : vector<6x64xf32>
    %65 = vector.broadcast %2 : vector<1x64xf32> to vector<6x64xf32>
    %66 = arith.addf %64, %65 : vector<6x64xf32>
    %67 = arith.truncf %66 : vector<6x64xf32> to vector<6x64xbf16>
    %c0_70 = arith.constant 0 : index
    %c0_71 = arith.constant 0 : index
    %c0_72 = arith.constant 0 : index
    %68 = vector.load %arg4[%c0_70, %c0_71, %c0_72] : memref<1x6x64xbf16, #tpu.memory_space<vmem>>, vector<1x6x64xbf16>
    %69 = vector.shape_cast %68 : vector<1x6x64xbf16> to vector<6x64xbf16>
    %70 = vector.shape_cast %67 : vector<6x64xbf16> to vector<1x6x64xbf16>
    tpu.vector_store %arg4[%c0_70, %c0_71, %c0_72], %70 {strides = array<i32>} : memref<1x6x64xbf16, #tpu.memory_space<vmem>>, vector<1x6x64xbf16>,
    return
  }
  func.func @transform_0(%arg0: i32) -> (i32, i32, i32, i32) {
    %c0_i32 = arith.constant 0 : i32
    %c0_i32_0 = arith.constant 0 : i32
    %c0_i32_1 = arith.constant 0 : i32
    %c0_i32_2 = arith.constant 0 : i32
    return %arg0, %c0_i32, %c0_i32_0, %c0_i32_1 : i32, i32, i32, i32
  }
  func.func @transform_1(%arg0: i32) -> (i32, i32, i32) {
    %c0_i32 = arith.constant 0 : i32
    %c0_i32_0 = arith.constant 0 : i32
    %c0_i32_1 = arith.constant 0 : i32
    %c0_i32_2 = arith.constant 0 : i32
    return %c0_i32, %c0_i32_0, %c0_i32_1 : i32, i32, i32
  }
  func.func @transform_2(%arg0: i32) -> (i32, i32) {
    %c0_i32 = arith.constant 0 : i32
    %c0_i32_0 = arith.constant 0 : i32
    %c0_i32_1 = arith.constant 0 : i32
    return %c0_i32, %c0_i32_0 : i32, i32
  }
  func.func @transform_3(%arg0: i32) -> (i32, i32, i32) {
    %c0_i32 = arith.constant 0 : i32
    %c0_i32_0 = arith.constant 0 : i32
    %c0_i32_1 = arith.constant 0 : i32
    return %arg0, %c0_i32, %c0_i32_0 : i32, i32, i32
  }
}

module attributes {stable_mosaic.version = 11 : i64} {
  func.func @kernel(%arg0: memref<2x4x8x64xbf16, #tpu.memory_space<vmem>>, %arg1: memref<9x64x128xbf16, #tpu.memory_space<vmem>>, %arg2: memref<3x128xf32, #tpu.memory_space<vmem>>, %arg3: memref<2x128xf32, #tpu.memory_space<vmem>>, %arg4: memref<1x1xf32, #tpu.memory_space<vmem>>, %arg5: memref<2x1xf32, #tpu.memory_space<vmem>>) attributes {dimension_semantics = [], scalar_prefetch = 0 : i64, scratch_operands = 0 : i64, tpu.core_type = #tpu.core_type<tc>} {
    %c0 = arith.constant 0 : index
    %c0_0 = arith.constant 0 : index
    %0 = vector.load %arg2[%c0, %c0_0] : memref<3x128xf32, #tpu.memory_space<vmem>>, vector<1x128xf32>
    %c1 = arith.constant 1 : index
    %c0_1 = arith.constant 0 : index
    %1 = vector.load %arg2[%c1, %c0_1] : memref<3x128xf32, #tpu.memory_space<vmem>>, vector<1x128xf32>
    %c2 = arith.constant 2 : index
    %c0_2 = arith.constant 0 : index
    %2 = vector.load %arg2[%c2, %c0_2] : memref<3x128xf32, #tpu.memory_space<vmem>>, vector<1x128xf32>
    %c0_3 = arith.constant 0 : index
    %c0_4 = arith.constant 0 : index
    %3 = vector.load %arg3[%c0_3, %c0_4] : memref<2x128xf32, #tpu.memory_space<vmem>>, vector<2x128xf32>
    %c0_5 = arith.constant 0 : index
    %c0_6 = arith.constant 0 : index
    %4 = vector.load %arg4[%c0_5, %c0_6] : memref<1x1xf32, #tpu.memory_space<vmem>>, vector<1x1xf32>
    %c0_7 = arith.constant 0 : index
    %c0_8 = arith.constant 0 : index
    %c0_9 = arith.constant 0 : index
    %c0_10 = arith.constant 0 : index
    %5 = vector.load %arg0[%c0_7, %c0_8, %c0_9, %c0_10] : memref<2x4x8x64xbf16, #tpu.memory_space<vmem>>, vector<1x4x8x64xbf16>
    %6 = vector.shape_cast %5 : vector<1x4x8x64xbf16> to vector<4x8x64xbf16>
    %cst = arith.constant 0.000000e+00 : f32
    %7 = vector.broadcast %cst : f32 to vector<2x128xf32>
    %8 = vector.extract_strided_slice %6 {offsets = [0, 0, 0], sizes = [1, 2, 64], strides = [1, 1, 1]} : vector<4x8x64xbf16> to vector<1x2x64xbf16>
    %9 = vector.shape_cast %8 : vector<1x2x64xbf16> to vector<2x64xbf16>
    %c0_11 = arith.constant 0 : index
    %c0_12 = arith.constant 0 : index
    %c0_13 = arith.constant 0 : index
    %10 = vector.load %arg1[%c0_11, %c0_12, %c0_13] : memref<9x64x128xbf16, #tpu.memory_space<vmem>>, vector<1x64x128xbf16>
    %11 = vector.shape_cast %10 : vector<1x64x128xbf16> to vector<64x128xbf16>
    %cst_14 = arith.constant dense<0.000000e+00> : vector<2x128xf32>
    %12 = tpu.matmul %9, %11, %cst_14 {dimension_numbers = #tpu.dot_dimension_numbers<[1], [0], [0], [1], [0, 0, 1, 1], [], []>} : vector<2x64xbf16>, vector<64x128xbf16>, vector<2x128xf32> -> vector<2x128xf32>
    %13 = arith.addf %7, %12 : vector<2x128xf32>
    %14 = vector.extract_strided_slice %6 {offsets = [1, 0, 0], sizes = [1, 2, 64], strides = [1, 1, 1]} : vector<4x8x64xbf16> to vector<1x2x64xbf16>
    %15 = vector.shape_cast %14 : vector<1x2x64xbf16> to vector<2x64xbf16>
    %c1_15 = arith.constant 1 : index
    %c0_16 = arith.constant 0 : index
    %c0_17 = arith.constant 0 : index
    %16 = vector.load %arg1[%c1_15, %c0_16, %c0_17] : memref<9x64x128xbf16, #tpu.memory_space<vmem>>, vector<1x64x128xbf16>
    %17 = vector.shape_cast %16 : vector<1x64x128xbf16> to vector<64x128xbf16>
    %cst_18 = arith.constant dense<0.000000e+00> : vector<2x128xf32>
    %18 = tpu.matmul %15, %17, %cst_18 {dimension_numbers = #tpu.dot_dimension_numbers<[1], [0], [0], [1], [0, 0, 1, 1], [], []>} : vector<2x64xbf16>, vector<64x128xbf16>, vector<2x128xf32> -> vector<2x128xf32>
    %19 = arith.addf %13, %18 : vector<2x128xf32>
    %20 = vector.extract_strided_slice %6 {offsets = [0, 1, 0], sizes = [1, 2, 64], strides = [1, 1, 1]} : vector<4x8x64xbf16> to vector<1x2x64xbf16>
    %21 = vector.shape_cast %20 : vector<1x2x64xbf16> to vector<2x64xbf16>
    %c2_19 = arith.constant 2 : index
    %c0_20 = arith.constant 0 : index
    %c0_21 = arith.constant 0 : index
    %22 = vector.load %arg1[%c2_19, %c0_20, %c0_21] : memref<9x64x128xbf16, #tpu.memory_space<vmem>>, vector<1x64x128xbf16>
    %23 = vector.shape_cast %22 : vector<1x64x128xbf16> to vector<64x128xbf16>
    %cst_22 = arith.constant dense<0.000000e+00> : vector<2x128xf32>
    %24 = tpu.matmul %21, %23, %cst_22 {dimension_numbers = #tpu.dot_dimension_numbers<[1], [0], [0], [1], [0, 0, 1, 1], [], []>} : vector<2x64xbf16>, vector<64x128xbf16>, vector<2x128xf32> -> vector<2x128xf32>
    %25 = arith.addf %19, %24 : vector<2x128xf32>
    %26 = vector.extract_strided_slice %6 {offsets = [2, 0, 0], sizes = [1, 2, 64], strides = [1, 1, 1]} : vector<4x8x64xbf16> to vector<1x2x64xbf16>
    %27 = vector.shape_cast %26 : vector<1x2x64xbf16> to vector<2x64xbf16>
    %c3 = arith.constant 3 : index
    %c0_23 = arith.constant 0 : index
    %c0_24 = arith.constant 0 : index
    %28 = vector.load %arg1[%c3, %c0_23, %c0_24] : memref<9x64x128xbf16, #tpu.memory_space<vmem>>, vector<1x64x128xbf16>
    %29 = vector.shape_cast %28 : vector<1x64x128xbf16> to vector<64x128xbf16>
    %cst_25 = arith.constant dense<0.000000e+00> : vector<2x128xf32>
    %30 = tpu.matmul %27, %29, %cst_25 {dimension_numbers = #tpu.dot_dimension_numbers<[1], [0], [0], [1], [0, 0, 1, 1], [], []>} : vector<2x64xbf16>, vector<64x128xbf16>, vector<2x128xf32> -> vector<2x128xf32>
    %31 = arith.addf %25, %30 : vector<2x128xf32>
    %32 = vector.extract_strided_slice %6 {offsets = [3, 0, 0], sizes = [1, 2, 64], strides = [1, 1, 1]} : vector<4x8x64xbf16> to vector<1x2x64xbf16>
    %33 = vector.shape_cast %32 : vector<1x2x64xbf16> to vector<2x64xbf16>
    %c4 = arith.constant 4 : index
    %c0_26 = arith.constant 0 : index
    %c0_27 = arith.constant 0 : index
    %34 = vector.load %arg1[%c4, %c0_26, %c0_27] : memref<9x64x128xbf16, #tpu.memory_space<vmem>>, vector<1x64x128xbf16>
    %35 = vector.shape_cast %34 : vector<1x64x128xbf16> to vector<64x128xbf16>
    %cst_28 = arith.constant dense<0.000000e+00> : vector<2x128xf32>
    %36 = tpu.matmul %33, %35, %cst_28 {dimension_numbers = #tpu.dot_dimension_numbers<[1], [0], [0], [1], [0, 0, 1, 1], [], []>} : vector<2x64xbf16>, vector<64x128xbf16>, vector<2x128xf32> -> vector<2x128xf32>
    %37 = arith.addf %31, %36 : vector<2x128xf32>
    %38 = vector.extract_strided_slice %6 {offsets = [2, 1, 0], sizes = [1, 2, 64], strides = [1, 1, 1]} : vector<4x8x64xbf16> to vector<1x2x64xbf16>
    %39 = vector.shape_cast %38 : vector<1x2x64xbf16> to vector<2x64xbf16>
    %c5 = arith.constant 5 : index
    %c0_29 = arith.constant 0 : index
    %c0_30 = arith.constant 0 : index
    %40 = vector.load %arg1[%c5, %c0_29, %c0_30] : memref<9x64x128xbf16, #tpu.memory_space<vmem>>, vector<1x64x128xbf16>
    %41 = vector.shape_cast %40 : vector<1x64x128xbf16> to vector<64x128xbf16>
    %cst_31 = arith.constant dense<0.000000e+00> : vector<2x128xf32>
    %42 = tpu.matmul %39, %41, %cst_31 {dimension_numbers = #tpu.dot_dimension_numbers<[1], [0], [0], [1], [0, 0, 1, 1], [], []>} : vector<2x64xbf16>, vector<64x128xbf16>, vector<2x128xf32> -> vector<2x128xf32>
    %43 = arith.addf %37, %42 : vector<2x128xf32>
    %44 = vector.extract_strided_slice %6 {offsets = [0, 2, 0], sizes = [1, 2, 64], strides = [1, 1, 1]} : vector<4x8x64xbf16> to vector<1x2x64xbf16>
    %45 = vector.shape_cast %44 : vector<1x2x64xbf16> to vector<2x64xbf16>
    %c6 = arith.constant 6 : index
    %c0_32 = arith.constant 0 : index
    %c0_33 = arith.constant 0 : index
    %46 = vector.load %arg1[%c6, %c0_32, %c0_33] : memref<9x64x128xbf16, #tpu.memory_space<vmem>>, vector<1x64x128xbf16>
    %47 = vector.shape_cast %46 : vector<1x64x128xbf16> to vector<64x128xbf16>
    %cst_34 = arith.constant dense<0.000000e+00> : vector<2x128xf32>
    %48 = tpu.matmul %45, %47, %cst_34 {dimension_numbers = #tpu.dot_dimension_numbers<[1], [0], [0], [1], [0, 0, 1, 1], [], []>} : vector<2x64xbf16>, vector<64x128xbf16>, vector<2x128xf32> -> vector<2x128xf32>
    %49 = arith.addf %43, %48 : vector<2x128xf32>
    %50 = vector.extract_strided_slice %6 {offsets = [1, 2, 0], sizes = [1, 2, 64], strides = [1, 1, 1]} : vector<4x8x64xbf16> to vector<1x2x64xbf16>
    %51 = vector.shape_cast %50 : vector<1x2x64xbf16> to vector<2x64xbf16>
    %c7 = arith.constant 7 : index
    %c0_35 = arith.constant 0 : index
    %c0_36 = arith.constant 0 : index
    %52 = vector.load %arg1[%c7, %c0_35, %c0_36] : memref<9x64x128xbf16, #tpu.memory_space<vmem>>, vector<1x64x128xbf16>
    %53 = vector.shape_cast %52 : vector<1x64x128xbf16> to vector<64x128xbf16>
    %cst_37 = arith.constant dense<0.000000e+00> : vector<2x128xf32>
    %54 = tpu.matmul %51, %53, %cst_37 {dimension_numbers = #tpu.dot_dimension_numbers<[1], [0], [0], [1], [0, 0, 1, 1], [], []>} : vector<2x64xbf16>, vector<64x128xbf16>, vector<2x128xf32> -> vector<2x128xf32>
    %55 = arith.addf %49, %54 : vector<2x128xf32>
    %56 = vector.extract_strided_slice %6 {offsets = [0, 3, 0], sizes = [1, 2, 64], strides = [1, 1, 1]} : vector<4x8x64xbf16> to vector<1x2x64xbf16>
    %57 = vector.shape_cast %56 : vector<1x2x64xbf16> to vector<2x64xbf16>
    %c8 = arith.constant 8 : index
    %c0_38 = arith.constant 0 : index
    %c0_39 = arith.constant 0 : index
    %58 = vector.load %arg1[%c8, %c0_38, %c0_39] : memref<9x64x128xbf16, #tpu.memory_space<vmem>>, vector<1x64x128xbf16>
    %59 = vector.shape_cast %58 : vector<1x64x128xbf16> to vector<64x128xbf16>
    %cst_40 = arith.constant dense<0.000000e+00> : vector<2x128xf32>
    %60 = tpu.matmul %57, %59, %cst_40 {dimension_numbers = #tpu.dot_dimension_numbers<[1], [0], [0], [1], [0, 0, 1, 1], [], []>} : vector<2x64xbf16>, vector<64x128xbf16>, vector<2x128xf32> -> vector<2x128xf32>
    %61 = arith.addf %55, %60 : vector<2x128xf32>
    %62 = vector.broadcast %0 : vector<1x128xf32> to vector<2x128xf32>
    %63 = arith.addf %61, %62 : vector<2x128xf32>
    %cst_41 = arith.constant 0.000000e+00 : f32
    %64 = vector.broadcast %cst_41 : f32 to vector<2x128xf32>
    %65 = arith.cmpf ogt, %63, %64 : vector<2x128xf32>
    %cst_42 = arith.constant 2.000000e-01 : f32
    %66 = vector.broadcast %cst_42 : f32 to vector<2x128xf32>
    %67 = arith.mulf %66, %63 : vector<2x128xf32>
    %68 = arith.select %65, %63, %67 : vector<2x128xi1>, vector<2x128xf32>
    %69 = vector.broadcast %1 : vector<1x128xf32> to vector<2x128xf32>
    %70 = arith.mulf %68, %69 : vector<2x128xf32>
    %71 = vector.broadcast %2 : vector<1x128xf32> to vector<2x128xf32>
    %72 = arith.addf %70, %71 : vector<2x128xf32>
    %73 = arith.mulf %72, %3 : vector<2x128xf32>
    %cst_43 = arith.constant dense<0.000000e+00> : vector<2xf32>
    %74 = vector.multi_reduction <add>, %73, %cst_43 [1] : vector<2x128xf32> to vector<2xf32>
    %75 = vector.shape_cast %74 : vector<2xf32> to vector<2x1xf32>
    %cst_44 = arith.constant dense<0.000000e+00> : vector<1xf32>
    %76 = vector.multi_reduction <add>, %75, %cst_44 [0] : vector<2x1xf32> to vector<1xf32>
    %77 = vector.shape_cast %76 : vector<1xf32> to vector<1x1xf32>
    %78 = arith.addf %77, %4 : vector<1x1xf32>
    %c0_45 = arith.constant 0 : index
    %c0_46 = arith.constant 0 : index
    %79 = vector.load %arg5[%c0_45, %c0_46] : memref<2x1xf32, #tpu.memory_space<vmem>>, vector<1x1xf32>
    tpu.vector_store %arg5[%c0_45, %c0_46], %78 {strides = array<i32>} : memref<2x1xf32, #tpu.memory_space<vmem>>, vector<1x1xf32>,
    %c1_47 = arith.constant 1 : index
    %c0_48 = arith.constant 0 : index
    %c0_49 = arith.constant 0 : index
    %c0_50 = arith.constant 0 : index
    %80 = vector.load %arg0[%c1_47, %c0_48, %c0_49, %c0_50] : memref<2x4x8x64xbf16, #tpu.memory_space<vmem>>, vector<1x4x8x64xbf16>
    %81 = vector.shape_cast %80 : vector<1x4x8x64xbf16> to vector<4x8x64xbf16>
    %cst_51 = arith.constant 0.000000e+00 : f32
    %82 = vector.broadcast %cst_51 : f32 to vector<2x128xf32>
    %83 = vector.extract_strided_slice %81 {offsets = [0, 0, 0], sizes = [1, 2, 64], strides = [1, 1, 1]} : vector<4x8x64xbf16> to vector<1x2x64xbf16>
    %84 = vector.shape_cast %83 : vector<1x2x64xbf16> to vector<2x64xbf16>
    %c0_52 = arith.constant 0 : index
    %c0_53 = arith.constant 0 : index
    %c0_54 = arith.constant 0 : index
    %85 = vector.load %arg1[%c0_52, %c0_53, %c0_54] : memref<9x64x128xbf16, #tpu.memory_space<vmem>>, vector<1x64x128xbf16>
    %86 = vector.shape_cast %85 : vector<1x64x128xbf16> to vector<64x128xbf16>
    %cst_55 = arith.constant dense<0.000000e+00> : vector<2x128xf32>
    %87 = tpu.matmul %84, %86, %cst_55 {dimension_numbers = #tpu.dot_dimension_numbers<[1], [0], [0], [1], [0, 0, 1, 1], [], []>} : vector<2x64xbf16>, vector<64x128xbf16>, vector<2x128xf32> -> vector<2x128xf32>
    %88 = arith.addf %82, %87 : vector<2x128xf32>
    %89 = vector.extract_strided_slice %81 {offsets = [1, 0, 0], sizes = [1, 2, 64], strides = [1, 1, 1]} : vector<4x8x64xbf16> to vector<1x2x64xbf16>
    %90 = vector.shape_cast %89 : vector<1x2x64xbf16> to vector<2x64xbf16>
    %c1_56 = arith.constant 1 : index
    %c0_57 = arith.constant 0 : index
    %c0_58 = arith.constant 0 : index
    %91 = vector.load %arg1[%c1_56, %c0_57, %c0_58] : memref<9x64x128xbf16, #tpu.memory_space<vmem>>, vector<1x64x128xbf16>
    %92 = vector.shape_cast %91 : vector<1x64x128xbf16> to vector<64x128xbf16>
    %cst_59 = arith.constant dense<0.000000e+00> : vector<2x128xf32>
    %93 = tpu.matmul %90, %92, %cst_59 {dimension_numbers = #tpu.dot_dimension_numbers<[1], [0], [0], [1], [0, 0, 1, 1], [], []>} : vector<2x64xbf16>, vector<64x128xbf16>, vector<2x128xf32> -> vector<2x128xf32>
    %94 = arith.addf %88, %93 : vector<2x128xf32>
    %95 = vector.extract_strided_slice %81 {offsets = [0, 1, 0], sizes = [1, 2, 64], strides = [1, 1, 1]} : vector<4x8x64xbf16> to vector<1x2x64xbf16>
    %96 = vector.shape_cast %95 : vector<1x2x64xbf16> to vector<2x64xbf16>
    %c2_60 = arith.constant 2 : index
    %c0_61 = arith.constant 0 : index
    %c0_62 = arith.constant 0 : index
    %97 = vector.load %arg1[%c2_60, %c0_61, %c0_62] : memref<9x64x128xbf16, #tpu.memory_space<vmem>>, vector<1x64x128xbf16>
    %98 = vector.shape_cast %97 : vector<1x64x128xbf16> to vector<64x128xbf16>
    %cst_63 = arith.constant dense<0.000000e+00> : vector<2x128xf32>
    %99 = tpu.matmul %96, %98, %cst_63 {dimension_numbers = #tpu.dot_dimension_numbers<[1], [0], [0], [1], [0, 0, 1, 1], [], []>} : vector<2x64xbf16>, vector<64x128xbf16>, vector<2x128xf32> -> vector<2x128xf32>
    %100 = arith.addf %94, %99 : vector<2x128xf32>
    %101 = vector.extract_strided_slice %81 {offsets = [2, 0, 0], sizes = [1, 2, 64], strides = [1, 1, 1]} : vector<4x8x64xbf16> to vector<1x2x64xbf16>
    %102 = vector.shape_cast %101 : vector<1x2x64xbf16> to vector<2x64xbf16>
    %c3_64 = arith.constant 3 : index
    %c0_65 = arith.constant 0 : index
    %c0_66 = arith.constant 0 : index
    %103 = vector.load %arg1[%c3_64, %c0_65, %c0_66] : memref<9x64x128xbf16, #tpu.memory_space<vmem>>, vector<1x64x128xbf16>
    %104 = vector.shape_cast %103 : vector<1x64x128xbf16> to vector<64x128xbf16>
    %cst_67 = arith.constant dense<0.000000e+00> : vector<2x128xf32>
    %105 = tpu.matmul %102, %104, %cst_67 {dimension_numbers = #tpu.dot_dimension_numbers<[1], [0], [0], [1], [0, 0, 1, 1], [], []>} : vector<2x64xbf16>, vector<64x128xbf16>, vector<2x128xf32> -> vector<2x128xf32>
    %106 = arith.addf %100, %105 : vector<2x128xf32>
    %107 = vector.extract_strided_slice %81 {offsets = [3, 0, 0], sizes = [1, 2, 64], strides = [1, 1, 1]} : vector<4x8x64xbf16> to vector<1x2x64xbf16>
    %108 = vector.shape_cast %107 : vector<1x2x64xbf16> to vector<2x64xbf16>
    %c4_68 = arith.constant 4 : index
    %c0_69 = arith.constant 0 : index
    %c0_70 = arith.constant 0 : index
    %109 = vector.load %arg1[%c4_68, %c0_69, %c0_70] : memref<9x64x128xbf16, #tpu.memory_space<vmem>>, vector<1x64x128xbf16>
    %110 = vector.shape_cast %109 : vector<1x64x128xbf16> to vector<64x128xbf16>
    %cst_71 = arith.constant dense<0.000000e+00> : vector<2x128xf32>
    %111 = tpu.matmul %108, %110, %cst_71 {dimension_numbers = #tpu.dot_dimension_numbers<[1], [0], [0], [1], [0, 0, 1, 1], [], []>} : vector<2x64xbf16>, vector<64x128xbf16>, vector<2x128xf32> -> vector<2x128xf32>
    %112 = arith.addf %106, %111 : vector<2x128xf32>
    %113 = vector.extract_strided_slice %81 {offsets = [2, 1, 0], sizes = [1, 2, 64], strides = [1, 1, 1]} : vector<4x8x64xbf16> to vector<1x2x64xbf16>
    %114 = vector.shape_cast %113 : vector<1x2x64xbf16> to vector<2x64xbf16>
    %c5_72 = arith.constant 5 : index
    %c0_73 = arith.constant 0 : index
    %c0_74 = arith.constant 0 : index
    %115 = vector.load %arg1[%c5_72, %c0_73, %c0_74] : memref<9x64x128xbf16, #tpu.memory_space<vmem>>, vector<1x64x128xbf16>
    %116 = vector.shape_cast %115 : vector<1x64x128xbf16> to vector<64x128xbf16>
    %cst_75 = arith.constant dense<0.000000e+00> : vector<2x128xf32>
    %117 = tpu.matmul %114, %116, %cst_75 {dimension_numbers = #tpu.dot_dimension_numbers<[1], [0], [0], [1], [0, 0, 1, 1], [], []>} : vector<2x64xbf16>, vector<64x128xbf16>, vector<2x128xf32> -> vector<2x128xf32>
    %118 = arith.addf %112, %117 : vector<2x128xf32>
    %119 = vector.extract_strided_slice %81 {offsets = [0, 2, 0], sizes = [1, 2, 64], strides = [1, 1, 1]} : vector<4x8x64xbf16> to vector<1x2x64xbf16>
    %120 = vector.shape_cast %119 : vector<1x2x64xbf16> to vector<2x64xbf16>
    %c6_76 = arith.constant 6 : index
    %c0_77 = arith.constant 0 : index
    %c0_78 = arith.constant 0 : index
    %121 = vector.load %arg1[%c6_76, %c0_77, %c0_78] : memref<9x64x128xbf16, #tpu.memory_space<vmem>>, vector<1x64x128xbf16>
    %122 = vector.shape_cast %121 : vector<1x64x128xbf16> to vector<64x128xbf16>
    %cst_79 = arith.constant dense<0.000000e+00> : vector<2x128xf32>
    %123 = tpu.matmul %120, %122, %cst_79 {dimension_numbers = #tpu.dot_dimension_numbers<[1], [0], [0], [1], [0, 0, 1, 1], [], []>} : vector<2x64xbf16>, vector<64x128xbf16>, vector<2x128xf32> -> vector<2x128xf32>
    %124 = arith.addf %118, %123 : vector<2x128xf32>
    %125 = vector.extract_strided_slice %81 {offsets = [1, 2, 0], sizes = [1, 2, 64], strides = [1, 1, 1]} : vector<4x8x64xbf16> to vector<1x2x64xbf16>
    %126 = vector.shape_cast %125 : vector<1x2x64xbf16> to vector<2x64xbf16>
    %c7_80 = arith.constant 7 : index
    %c0_81 = arith.constant 0 : index
    %c0_82 = arith.constant 0 : index
    %127 = vector.load %arg1[%c7_80, %c0_81, %c0_82] : memref<9x64x128xbf16, #tpu.memory_space<vmem>>, vector<1x64x128xbf16>
    %128 = vector.shape_cast %127 : vector<1x64x128xbf16> to vector<64x128xbf16>
    %cst_83 = arith.constant dense<0.000000e+00> : vector<2x128xf32>
    %129 = tpu.matmul %126, %128, %cst_83 {dimension_numbers = #tpu.dot_dimension_numbers<[1], [0], [0], [1], [0, 0, 1, 1], [], []>} : vector<2x64xbf16>, vector<64x128xbf16>, vector<2x128xf32> -> vector<2x128xf32>
    %130 = arith.addf %124, %129 : vector<2x128xf32>
    %131 = vector.extract_strided_slice %81 {offsets = [0, 3, 0], sizes = [1, 2, 64], strides = [1, 1, 1]} : vector<4x8x64xbf16> to vector<1x2x64xbf16>
    %132 = vector.shape_cast %131 : vector<1x2x64xbf16> to vector<2x64xbf16>
    %c8_84 = arith.constant 8 : index
    %c0_85 = arith.constant 0 : index
    %c0_86 = arith.constant 0 : index
    %133 = vector.load %arg1[%c8_84, %c0_85, %c0_86] : memref<9x64x128xbf16, #tpu.memory_space<vmem>>, vector<1x64x128xbf16>
    %134 = vector.shape_cast %133 : vector<1x64x128xbf16> to vector<64x128xbf16>
    %cst_87 = arith.constant dense<0.000000e+00> : vector<2x128xf32>
    %135 = tpu.matmul %132, %134, %cst_87 {dimension_numbers = #tpu.dot_dimension_numbers<[1], [0], [0], [1], [0, 0, 1, 1], [], []>} : vector<2x64xbf16>, vector<64x128xbf16>, vector<2x128xf32> -> vector<2x128xf32>
    %136 = arith.addf %130, %135 : vector<2x128xf32>
    %137 = vector.broadcast %0 : vector<1x128xf32> to vector<2x128xf32>
    %138 = arith.addf %136, %137 : vector<2x128xf32>
    %cst_88 = arith.constant 0.000000e+00 : f32
    %139 = vector.broadcast %cst_88 : f32 to vector<2x128xf32>
    %140 = arith.cmpf ogt, %138, %139 : vector<2x128xf32>
    %cst_89 = arith.constant 2.000000e-01 : f32
    %141 = vector.broadcast %cst_89 : f32 to vector<2x128xf32>
    %142 = arith.mulf %141, %138 : vector<2x128xf32>
    %143 = arith.select %140, %138, %142 : vector<2x128xi1>, vector<2x128xf32>
    %144 = vector.broadcast %1 : vector<1x128xf32> to vector<2x128xf32>
    %145 = arith.mulf %143, %144 : vector<2x128xf32>
    %146 = vector.broadcast %2 : vector<1x128xf32> to vector<2x128xf32>
    %147 = arith.addf %145, %146 : vector<2x128xf32>
    %148 = arith.mulf %147, %3 : vector<2x128xf32>
    %cst_90 = arith.constant dense<0.000000e+00> : vector<2xf32>
    %149 = vector.multi_reduction <add>, %148, %cst_90 [1] : vector<2x128xf32> to vector<2xf32>
    %150 = vector.shape_cast %149 : vector<2xf32> to vector<2x1xf32>
    %cst_91 = arith.constant dense<0.000000e+00> : vector<1xf32>
    %151 = vector.multi_reduction <add>, %150, %cst_91 [0] : vector<2x1xf32> to vector<1xf32>
    %152 = vector.shape_cast %151 : vector<1xf32> to vector<1x1xf32>
    %153 = arith.addf %152, %4 : vector<1x1xf32>
    %c1_92 = arith.constant 1 : index
    %c0_93 = arith.constant 0 : index
    %154 = vector.load %arg5[%c1_92, %c0_93] : memref<2x1xf32, #tpu.memory_space<vmem>>, vector<1x1xf32>
    tpu.vector_store %arg5[%c1_92, %c0_93], %153 {strides = array<i32>} : memref<2x1xf32, #tpu.memory_space<vmem>>, vector<1x1xf32>,
    return
  }
}

</mosaic_0001>

<bundles_post_ra>
// kernel: discriminator_forward.4
= control target key start
LH: loop header
LB: loop body
LE: loop exit
PB: predicated region body
PF: predicated region fallthrough
CT: control target
= control target key end

     0   :  { %s2185_s12 = smov 0   ;;  %s2626_s0 = inlined_call_operand.vmem [shape: bf16[2,4,88,4], index: 0, kind: input, shape index: {}]   ;;  %s2627_s1 = inlined_call_operand.vmem [shape: bf16[9,4,16], index: 1, kind: input, shape index: {}]   ;;  %s2628_s2 = inlined_call_operand.vmem [shape: f32[3,16], index: 2, kind: input, shape index: {}]   ;;  %s2629_s3 = inlined_call_operand.vmem [shape: bf16[2,72,16], index: 3, kind: output, shape index: {}]  }
   0x1 LB: > { %s1677_s13 = sadd.s32 4294967295, %s2161_s12   ;;  %p1681_p0 = scmp.ge.s32.totalorder %s2161_s12, 1  ;;  %s2161_s12 = sphi %s2185_s12, %s13_s12  }
   0x2   : > { %p137_p1 = scmp.lt.s32.totalorder %s2161_s12, 3 }
   0x4   : > { %p138_p2 = pnand %p1681_p0, %p137_p1 }
   0x5   : > { %v1693_v0 = vld [vmem:[%s2627_s1 + $0x2] sm:$0x3] (!%p138_p2)  ;;  %vm236_vm0 = vcmask (!%p138_p2), 1041408   ;;  %p161_p3 = scmp.lt.s32.totalorder (!%p138_p2), %s1677_s13, 1  ;;  %v2163_v1 = vmov (!%p138_p2), 0.0   ;;  %vm2164_vm1 = vmmov (!%p138_p2), 0  }
   0x6   : > { %141 = sbr.rel (%p138_p2) target bundleno = 420 (0x1a4), region = 32  ;;  %1902 = vmatprep.subr.bf16.mxu0 (!%p138_p2), %v2163_v1  ;;  %2100 = vmatprep.subr.bf16.mxu1 (!%p138_p2), %v2163_v1  ;;  %v238_v2 = vsel (!%p138_p2), %vm236_vm0, %v1693_v0, 0  ;;  %v1714_v3 = vld [vmem:[%s2627_s1 + $0x4] sm:$0x3] (!%p138_p2)  ;;  %v184_v4 = vld [vmem:[%s2627_s1] sm:$0x3] (!%p138_p2) }
   0x7   : > { %1903 = vmatpush3.bf16.msra.mxu0 (!%p138_p2), %v238_v2  ;;  %2101 = vmatpush3.bf16.msra.mxu1 (!%p138_p2), %v238_v2  ;;  %vm220_vm2 = vcmask (!%p138_p2), 31744   ;;  %v518_v6 = vsel (!%p138_p2), %vm236_vm0, %v1714_v3, 0  ;;  %v351_v8 = vsel (!%p138_p2), %vm236_vm0, %v184_v4, 0  ;;  %v1734_v15 = vld [vmem:[%s2627_s1 + $0x6] sm:$0x3] (!%p138_p2)  ;;  %vm1400_vm4 = vcmask (!%p138_p2), 1046528  }
   0x8   : > { %1904 = vmatprep.mubr.msk.bf16.mxu0 (!%p138_p2), %vm2164_vm1, %v2163_v1  ;;  %1916 = vmatprep.mubr.msk.bf16.mxu1 (!%p138_p2), %vm2164_vm1, %v2163_v1  ;;  %v652_v20 = vsel (!%p138_p2), %vm236_vm0, %v1734_v15, 0  ;;  %vm462_vm3 = vsmask.f32 (!%p138_p2), 7424  ;;  %v1754_v25 = vld [vmem:[%s2627_s1 + $0x8] sm:$0x3] (!%p138_p2)  ;;  %vm1612_vm7 = vcmask (!%p138_p2), 125952  }
   0x9   : > { %1946 = vmatprep.subr.bf16.mxu0 (!%p138_p2), %v2163_v1  ;;  %1924 = vmatprep.subr.bf16.mxu1 (!%p138_p2), %v2163_v1  ;;  %v786_v31 = vsel (!%p138_p2), %vm236_vm0, %v1754_v25, 0 }
   0xd   : > { %s2631_s13 = smov (!%p161_p3, %s1677_s13), 1 }
   0xe   : > { %s2102_s16 = smul.u32 176, %s2631_s13 }
   0xf   : > { %s2103_s15 = smul.u32 36, %s2631_s13 }
  0x10   : > { %s2217_s23 = scalar_lea.vmem %s2626_s0, %s2102_s16 }
  0x11   : > { %v2114_v5 = vld [vmem:[%s2217_s23 + $0x2c] sm:$0xff]   ;;  %v2115_v7 = vld [vmem:[%s2217_s23 + $0x44] sm:$0xff]   ;;  %v2116_v9 = vld [vmem:[%s2217_s23 + $0x34] sm:$0xff]   ;;  %s2577_s19 = scalar_lea.vmem %s2629_s3, %s2103_s15 }
  0x12   : > { %1905 = vmatmul.mubr.msk.bf16.vlgmr.msra.gmra.mrb[0].mxu0 %vm220_vm2, %v2114_v5  ;;  %1917 = vmatmul.mubr.msk.bf16.vlgmr.msra.gmra.mrb[0].mxu1 %vm220_vm2, %v2115_v7  ;;  %v2117_v10 = vld [vmem:[%s2217_s23 + $0x4c] ss:$0 sps:$4 sm:$0xff]   ;;  %v2121_v11 = vld [vmem:[%s2217_s23] sm:$0xff]   ;;  %v2248_v21 = vld [vmem:[%s2217_s23 + $0x10] sm:$0xff]  }
  0x13   : > { %1947 = vmatpush3.bf16.msra.mxu0 %v518_v6  ;;  %1925 = vmatpush3.bf16.msra.mxu1 %v351_v8  ;;  %v2122_v12 = vld [vmem:[%s2217_s23 + $0x8] sm:$0xff]   ;;  %v466_v13 = vshll.u32 %v2121_v11, 16  ;;  %v2118_v14 = vld [vmem:[%s2217_s23 + $0x3c] sm:$0xff]   ;;  %v464_v17 = vshrl.u32 %v2121_v11, 16  ;;  %v479_v27 = vshll.u32 %v2248_v21, 16  ;;  %v483_v32 = vshrl.u32 %v2248_v21, 16 }
  0x14   : > { %1908 = vmatprep.mubr.msk.bf16.mxu0 %vm2164_vm1, %v2163_v1  ;;  %1920 = vmatprep.mubr.msk.bf16.mxu1 %vm2164_vm1, %v2163_v1  ;;  %v2119_v16 = vld [vmem:[%s2217_s23] sm:$0xff]   ;;  %v471_v19 = vshll.u32 %v2122_v12, 16  ;;  %v2255_v24 = vld [vmem:[%s2217_s23 + $0x18] sm:$0xff]   ;;  %v2120_v26 = vld [vmem:[%s2217_s23 + $0x8] sm:$0xff]   ;;  %v475_v29 = vshrl.u32 %v2122_v12, 16 }
  0x15   : > { %1968 = vmatprep.subr.bf16.mxu1 %v2163_v1  ;;  %1990 = vmatprep.subr.bf16.mxu0 %v2163_v1  ;;  %v468_v18 = vrot.slane %v466_v13, 1  ;;  %v487_v30 = vshll.u32 %v2255_v24, 16  ;;  %v481_v33 = vrot.slane %v479_v27, 1  ;;  %v491_v34 = vshrl.u32 %v2255_v24, 16  ;;  %v2139_v35 = vld [vmem:[%s2217_s23 + $0x58] sm:$0xff]   ;;  %v2140_v36 = vld [vmem:[%s2217_s23 + $0x60] sm:$0xff]  }
  0x16   : > { %v473_v23 = vrot.slane %v471_v19, 1  ;;  %v2141_v39 = vld [vmem:[%s2217_s23 + $0x68] sm:$0xff]   ;;  %v907_v40 = vshrl.u32 %v2139_v35, 16  ;;  %v909_v41 = vshll.u32 %v2139_v35, 16  ;;  %v914_v42 = vshll.u32 %v2140_v36, 16  ;;  %v2123_v45 = vld [vmem:[%s2217_s23 + $0x10] sm:$0xff]  }
  0x17   : > { %v469_v22 = vor.u32 %v468_v18, %v464_v17  ;;  %v2274_v38 = vrot.slane %v487_v30, 1  ;;  %v918_v43 = vshrl.u32 %v2140_v36, 16  ;;  %v1044_v44 = vld [vmem:[%s2217_s23 + $0x4] sm:$0xf]  ;;  %v922_v46 = vshll.u32 %v2141_v39, 16  ;;  %v2288_v48 = vld [vmem:[%s2217_s23 + $0xc] sm:$0xff]  }
  0x18   : > { %v477_v37 = vor.u32 %v475_v29, %v473_v23  ;;  %v2285_v47 = vld [vmem:[%s2217_s23 + $0x8] sm:$0xf]  ;;  %v2291_v49 = vld [vmem:[%s2217_s23 + $0x20] sm:$0x1f]   ;;  %v911_v50 = vrot.slane %v909_v41, 1  ;;  %v916_v51 = vrot.slane %v914_v42, 1 }
  0x19   : > { %v474_v28 = vsel %vm462_vm3, %v469_v22, %v473_v23  ;;  %v1787_v52 = vcombine.low %v1044_v44, %v2285_v47  ;;  %v924_v54 = vrot.slane %v922_v46, 1  ;;  %v1089_v55 = vshll.u32 %v2288_v48, 16  ;;  %v2144_v56 = vld [vmem:[%s2217_s23 + $0x70] sm:$0xff]   ;;  %v2309_v7 = vld [vmem:[%s2217_s23 + $0x78] sm:$0x1f]  }
  0x1a   : > { %1909 = vmatmul.mubr.msk.bf16.gmra.mrb[4].mxu0 %vm220_vm2, %v2116_v9  ;;  %1921 = vmatmul.mubr.msk.bf16.gmra.mrb[4].mxu1 %vm220_vm2, %v2117_v10  ;;  %v482_v53 = vsel %vm462_vm3, %v477_v37, %v481_v33  ;;  %v926_v57 = vshrl.u32 %v2141_v39, 16  ;;  %v912_v58 = vor.u32 %v911_v50, %v907_v40  ;;  %v920_v59 = vor.u32 %v918_v43, %v916_v51  ;;  %v2298_v2 = vld [vmem:[%s2217_s23 + $0x14] sm:$0xff]   ;;  %v2327_v21 = vld [vmem:[%s2217_s23 + $0x24] sm:$0x1f]  }
  0x1b   : > { %1912 = vmatprep.mubr.msk.bf16.mxu0 %vm2164_vm1, %v2163_v1  ;;  %1926 = vmatprep.mubr.msk.bf16.mxu1 %vm2164_vm1, %v2163_v1  ;;  %v1082_v60 = vshrl.u32 %v1787_v52, 16  ;;  %v1084_v61 = vshll.u32 %v1787_v52, 16  ;;  %v1091_v62 = vrot.slane %v1089_v55, 1  ;;  %v930_v0 = vshll.u32 %v2144_v56, 16  ;;  %v2149_v22 = vld [vmem:[%s2217_s23 + $0x30] sm:$0xff]   ;;  %v2125_v29 = vld [vmem:[%s2217_s23 + $0x18] sm:$0xff]  }
  0x1c   : > { %v928_v63 = vor.u32 %v926_v57, %v924_v54  ;;  %v1093_v3 = vshrl.u32 %v2288_v48, 16  ;;  %v2303_v4 = vsel %vm462_vm3, %v912_v58, %v916_v51  ;;  %v2306_v5 = vsel %vm462_vm3, %v920_v59, %v924_v54  ;;  %v2151_v43 = vld [vmem:[%s2217_s23 + $0x40] sm:$0xff]   ;;  %v2153_v51 = vld [vmem:[%s2217_s23 + $0x48] sm:$0xff]   ;;  %v2370_v58 = vld [vmem:[%s2217_s23 + $0x50] sm:$0x1f]  }
  0x1d   : > { %v1086_v6 = vrot.slane %v1084_v61, 1  ;;  %v934_v8 = vshrl.u32 %v2144_v56, 16  ;;  %v485_v9 = vor.u32 %v483_v32, %v481_v33  ;;  %v932_v10 = vrot.slane %v930_v0, 1  ;;  %v2127_v61 = vld [vmem:[%s2217_s23 + $0x20] ss:$0 sps:$4 sm:$0xff]  }
  0x1e   : > { %v1095_v11 = vor.u32 %v1093_v3, %v1091_v62  ;;  %v1097_v12 = vshll.u32 %v2298_v2, 16  ;;  %v495_v13 = vshll.u32 %v2291_v49, 16  ;;  %v938_v15 = vshll.u32 %v2309_v7, 16 }
  0x1f   : > { %v1101_v17 = vshrl.u32 %v2298_v2, 16  ;;  %v2324_v18 = vsel %vm462_vm3, %v928_v63, %v932_v10  ;;  %v490_v30 = vsel %vm462_vm3, %v485_v9, %v2274_v38  ;;  %v1113_v33 = vshll.u32 %v2327_v21, 16 }
  0x20   : > { %v1099_v19 = vrot.slane %v1097_v12, 1  ;;  %v2333_v25 = vrot.slane %v938_v15, 1  ;;  %v1257_v37 = vshrl.u32 %v2149_v22, 16  ;;  %v493_v39 = vor.u32 %v491_v34, %v2274_v38 }
  0x21   : > { %v2352_v40 = vrot.slane %v1113_v33, 1  ;;  %v1259_v41 = vshll.u32 %v2149_v22, 16  ;;  %v497_v44 = vrot.slane %v495_v13, 1  ;;  %v1272_v38 = vshll.u32 %v2151_v43, 16  ;;  %v2138_v33 = vld [vmem:[%s2217_s23 + $0xa4] ss:$0 sps:$4 sm:$0xff]  }
  0x22   : > { %1913 = vmatmul.mubr.msk.bf16.gmra.mrb[8].mxu0 %vm220_vm2, %v2118_v14  ;;  %1927 = vmatmul.mubr.msk.bf16.vlgmr.msra.gmra.mrb[8].mxu1 %vm220_vm2, %v2119_v16  ;;  %v1087_v14 = vor.u32 %v1086_v6, %v1082_v60  ;;  %v2320_v16 = vld [vmem:[%s2217_s23 + $0x1c] sm:$0xff]   ;;  %v1103_v32 = vor.u32 %v1101_v17, %v1099_v19  ;;  %v1280_v57 = vshll.u32 %v2153_v51, 16  ;;  %v1284_v60 = vshrl.u32 %v2153_v51, 16  ;;  %v1786_v17 = vld [vmem:[%s2627_s1 + $0xc] sm:$0x3] }
  0x23   : > { %1948 = vmatprep.mubr.msk.bf16.mxu0 %vm2164_vm1, %v2163_v1  ;;  %1969 = vmatpush3.bf16.msra.mxu1 %v652_v20  ;;  %v936_v20 = vor.u32 %v934_v8, %v932_v10  ;;  %v1109_v27 = vshrl.u32 %v2320_v16, 16  ;;  %v1261_v24 = vrot.slane %v1259_v41, 1  ;;  %v1274_v56 = vrot.slane %v1272_v38, 1 }
  0x24   : > { %1930 = vmatprep.mubr.msk.bf16.mxu1 %vm2164_vm1, %v2163_v1  ;;  %2012 = vmatprep.subr.bf16.mxu1 %v2163_v1  ;;  %v2331_v23 = vsel %vm462_vm3, %v1087_v14, %v1091_v62  ;;  %v498_v59 = vsel %vm462_vm3, %v493_v39, %v497_v44  ;;  %v1282_v3 = vrot.slane %v1280_v57, 1  ;;  %v1288_v6 = vshll.u32 %v2370_v58, 16  ;;  %v2129_v14 = vld [vmem:[%s2217_s23 + $0x58] sm:$0xff]   ;;  %v1818_v39 = vld [vmem:[%s2627_s1 + $0x10] sm:$0x3] }
  0x25   : > { %v2347_v35 = vsel %vm462_vm3, %v936_v20, %v2333_v25  ;;  %v1262_v54 = vor.u32 %v1261_v24, %v1257_v37  ;;  %v499_v10 = vshrl.u32 %v2291_v49, 16  ;;  %v1775_v49 = vld [vmem:[%s2627_s1 + $0xa] sm:$0x3]  ;;  %v2130_v20 = vld [vmem:[%s2217_s23 + $0x60] sm:$0xff]   ;;  %v1136_v22 = vsel %vm236_vm0, %v1786_v17, 0 }
  0x26   : > { %v1286_v9 = vor.u32 %v1284_v60, %v1282_v3  ;;  %v961_v15 = vsel %vm236_vm0, %v1775_v49, 0  ;;  %v1426_v41 = vsel %vm236_vm0, %v1818_v39, 0 }
  0x27   : > { %v501_v13 = vor.u32 %v499_v10, %v497_v44  ;;  %v1408_v44 = vrot.slane %v2327_v21, 1 }
  0x2a   : > { %1949 = vmatmul.mubr.msk.bf16.vlgmr.msra.gmra.mrb[12].mxu0 %vm220_vm2, %v474_v28  ;;  %1931 = vmatmul.mubr.msk.bf16.gmra.mrb[12].mxu1 %vm220_vm2, %v2120_v26  ;;  %v1105_v26 = vshll.u32 %v2320_v16, 16  ;;  %v2150_v28 = vld [vmem:[%s2217_s23 + $0x38] sm:$0xff]  }
  0x2b   : > { %1991 = vmatpush3.bf16.msra.mxu0 %v786_v31  ;;  %1934 = vmatprep.mubr.msk.bf16.mxu1 %vm2164_vm1, %v2163_v1  ;;  %v2342_v31 = vsel %vm462_vm3, %v1095_v11, %v1099_v19  ;;  %v1264_v42 = vshll.u32 %v2150_v28, 16  ;;  %v1268_v50 = vshrl.u32 %v2150_v28, 16  ;;  %v2386_v11 = vrot.slane %v1288_v6, 1  ;;  %v2131_v19 = vld [vmem:[%s2217_s23 + $0x84] sm:$0xff]   ;;  %v2135_v28 = vld [vmem:[%s2217_s23 + $0x94] sm:$0xff]  }
  0x2c   : > { %1952 = vmatprep.mubr.msk.bf16.mxu0 %vm2164_vm1, %v2163_v1  ;;  %2034 = vmatprep.subr.bf16.mxu0 %v2163_v1  ;;  %v1107_v36 = vrot.slane %v1105_v26, 1  ;;  %v2133_v26 = vld [vmem:[%s2217_s23 + $0x8c] sm:$0xff]  }
  0x2d   : > { %v1266_v34 = vrot.slane %v1264_v42, 1  ;;  %v2395_v12 = vsel %vm462_vm3, %v1286_v9, %v2386_v11 }
  0x2e   : > { %v1111_v46 = vor.u32 %v1109_v27, %v1107_v36  ;;  %v2132_v27 = vld [vmem:[%s2217_s23 + $0x68] sm:$0xff]  }
  0x2f   : > { %v1270_v55 = vor.u32 %v1268_v50, %v1266_v34  ;;  %v2375_v62 = vsel %vm462_vm3, %v1262_v54, %v1266_v34 }
  0x30   : > { %v2367_v52 = vsel %vm462_vm3, %v1111_v46, %v2352_v40 }
  0x31   : > { %v2378_v63 = vsel %vm462_vm3, %v1270_v55, %v1274_v56 }
  0x32   : > { %1953 = vmatmul.mubr.msk.bf16.gmra.mrb[16].mxu0 %vm220_vm2, %v482_v53  ;;  %1935 = vmatmul.mubr.msk.bf16.gmra.mrb[16].mxu1 %vm220_vm2, %v2123_v45  ;;  %v2357_v45 = vsel %vm462_vm3, %v1103_v32, %v1107_v36  ;;  %v1276_v53 = vshrl.u32 %v2151_v43, 16  ;;  %v2136_v32 = vld [vmem:[%s2217_s23 + $0x78] ss:$0 sps:$4 sm:$0xff]   ;;  %v1807_v36 = vld [vmem:[%s2627_s1 + $0xe] sm:$0x3]  ;;  %v1292_v43 = vshrl.u32 %v2370_v58, 16 }
  0x33   : > { %1956 = vmatprep.mubr.msk.bf16.mxu0 %vm2164_vm1, %v2163_v1  ;;  %1938 = vmatprep.mubr.msk.bf16.mxu1 %vm2164_vm1, %v2163_v1  ;;  %v1311_v37 = vsel %vm236_vm0, %v1807_v36, 0 }
  0x34   : > { %v1278_v0 = vor.u32 %v1276_v53, %v1274_v56 }
  0x36   : > { %v2382_v8 = vsel %vm462_vm3, %v1278_v0, %v1282_v3 }
  0x3a   : > { %1957 = vmatmul.mubr.msk.bf16.gmra.mrb[20].mxu0 %vm220_vm2, %v490_v30  ;;  %1939 = vmatmul.mubr.msk.bf16.gmra.mrb[20].mxu1 %vm220_vm2, %v2125_v29  ;;  %v2134_v29 = vld [vmem:[%s2217_s23 + $0x70] sm:$0xff]   ;;  %v2137_v30 = vld [vmem:[%s2217_s23 + $0x9c] sm:$0xff]  }
  0x3b   : > { %1960 = vmatprep.mubr.msk.bf16.mxu0 %vm2164_vm1, %v2163_v1  ;;  %1942 = vmatprep.mubr.msk.bf16.mxu1 %vm2164_vm1, %v2163_v1 }
  0x42   : > { %1961 = vmatmul.mubr.msk.bf16.gmra.mrb[24].mxu0 %vm220_vm2, %v498_v59  ;;  %1943 = vmatmul.mubr.msk.bf16.gmra.mrb[24].mxu1 %vm220_vm2, %v2127_v61 }
  0x43   : > { %1964 = vmatprep.mubr.msk.bf16.mxu0 %vm2164_vm1, %v2163_v1  ;;  %1970 = vmatprep.mubr.msk.bf16.mxu1 %vm2164_vm1, %v2163_v1 }
  0x4a   : > { %1965 = vmatmul.mubr.msk.bf16.gmra.mrb[28].mxu0 %vm220_vm2, %v501_v13  ;;  %1971 = vmatmul.mubr.msk.bf16.vlgmr.msra.gmra.mrb[28].mxu1 %vm220_vm2, %v2129_v14 }
  0x4b   : > { %1992 = vmatprep.mubr.msk.bf16.mxu0 %vm2164_vm1, %v2163_v1  ;;  %2013 = vmatpush3.bf16.msra.mxu1 %v961_v15 }
  0x4c   : > { %1974 = vmatprep.mubr.msk.bf16.mxu1 %vm2164_vm1, %v2163_v1  ;;  %2056 = vmatprep.subr.bf16.mxu1 %v2163_v1 }
  0x52   : > { %1993 = vmatmul.mubr.msk.bf16.vlgmr.msra.gmra.mrb[32].mxu0 %vm220_vm2, %v2131_v19  ;;  %1975 = vmatmul.mubr.msk.bf16.gmra.mrb[32].mxu1 %vm220_vm2, %v2130_v20 }
  0x53   : > { %2035 = vmatpush3.bf16.msra.mxu0 %v1136_v22  ;;  %1978 = vmatprep.mubr.msk.bf16.mxu1 %vm2164_vm1, %v2163_v1 }
  0x54   : > { %1996 = vmatprep.mubr.msk.bf16.mxu0 %vm2164_vm1, %v2163_v1  ;;  %2078 = vmatprep.subr.bf16.mxu0 %v2163_v1 }
  0x5a   : > { %1997 = vmatmul.mubr.msk.bf16.gmra.mrb[36].mxu0 %vm220_vm2, %v2133_v26  ;;  %1979 = vmatmul.mubr.msk.bf16.gmra.mrb[36].mxu1 %vm220_vm2, %v2132_v27 }
  0x5b   : > { %2000 = vmatprep.mubr.msk.bf16.mxu0 %vm2164_vm1, %v2163_v1  ;;  %1982 = vmatprep.mubr.msk.bf16.mxu1 %vm2164_vm1, %v2163_v1 }
  0x62   : > { %2001 = vmatmul.mubr.msk.bf16.gmra.mrb[40].mxu0 %vm220_vm2, %v2135_v28  ;;  %1983 = vmatmul.mubr.msk.bf16.gmra.mrb[40].mxu1 %vm220_vm2, %v2134_v29 }
  0x63   : > { %2004 = vmatprep.mubr.msk.bf16.mxu0 %vm2164_vm1, %v2163_v1  ;;  %1986 = vmatprep.mubr.msk.bf16.mxu1 %vm2164_vm1, %v2163_v1 }
  0x6a   : > { %2005 = vmatmul.mubr.msk.bf16.gmra.mrb[44].mxu0 %vm220_vm2, %v2137_v30  ;;  %1987 = vmatmul.mubr.msk.bf16.gmra.mrb[44].mxu1 %vm220_vm2, %v2136_v32 }
  0x6b   : > { %2008 = vmatprep.mubr.msk.bf16.mxu0 %vm2164_vm1, %v2163_v1  ;;  %2014 = vmatprep.mubr.msk.bf16.mxu1 %vm2164_vm1, %v2163_v1 }
  0x72   : > { %2009 = vmatmul.mubr.msk.bf16.gmra.mrb[48].mxu0 %vm220_vm2, %v2138_v33  ;;  %2015 = vmatmul.mubr.msk.bf16.vlgmr.msra.gmra.mrb[48].mxu1 %vm220_vm2, %v2303_v4  ;;  %v942_v4 = vshrl.u32 %v2309_v7, 16 }
  0x73   : > { %2036 = vmatprep.mubr.msk.bf16.mxu0 %vm2164_vm1, %v2163_v1  ;;  %2057 = vmatpush3.bf16.msra.mxu1 %v1311_v37 }
  0x74   : > { %2018 = vmatprep.mubr.msk.bf16.mxu1 %vm2164_vm1, %v2163_v1 }
  0x7a   : > { %2037 = vmatmul.mubr.msk.bf16.vlgmr.msra.gmra.mrb[52].mxu0 %vm220_vm2, %v2331_v23  ;;  %2019 = vmatmul.mubr.msk.bf16.gmra.mrb[52].mxu1 %vm220_vm2, %v2306_v5  ;;  %v944_v5 = vor.u32 %v942_v4, %v2333_v25  ;;  %v1394_v23 = vld [vmem:[%s2217_s23 + $0x4] sm:$0xe] }
  0x7b   : > { %2079 = vmatpush3.bf16.msra.mxu0 %v1426_v41  ;;  %2022 = vmatprep.mubr.msk.bf16.mxu1 %vm2164_vm1, %v2163_v1 }
  0x7c   : > { %2040 = vmatprep.mubr.msk.bf16.mxu0 %vm2164_vm1, %v2163_v1 }
  0x82   : > { %2041 = vmatmul.mubr.msk.bf16.gmra.mrb[56].mxu0 %vm220_vm2, %v2342_v31  ;;  %2023 = vmatmul.mubr.msk.bf16.gmra.mrb[56].mxu1 %vm220_vm2, %v2324_v18  ;;  %v1117_v18 = vshrl.u32 %v2327_v21, 16  ;;  %v1819_v31 = vcombine.low %v1394_v23, %v2285_v47  ;;  %v1404_v47 = vrot.slane %v2298_v2, 1 }
  0x83   : > { %2044 = vmatprep.mubr.msk.bf16.mxu0 %vm2164_vm1, %v2163_v1  ;;  %2026 = vmatprep.mubr.msk.bf16.mxu1 %vm2164_vm1, %v2163_v1 }
  0x84   : > { %v1119_v7 = vor.u32 %v1117_v18, %v2352_v40  ;;  %v1401_v25 = vrot.slane %v1819_v31, 1  ;;  %v1406_v40 = vrot.slane %v2320_v16, 1  ;;  %v1294_v16 = vor.u32 %v1292_v43, %v2386_v11 }
  0x86   : > { %v1407_v2 = vsel %vm1400_vm4, %v1404_v47, %v1406_v40 }
  0x8a   : > { %2045 = vmatmul.mubr.msk.bf16.gmra.mrb[60].mxu0 %vm220_vm2, %v2357_v45  ;;  %2027 = vmatmul.mubr.msk.bf16.gmra.mrb[60].mxu1 %vm220_vm2, %v2347_v35  ;;  %v1402_v35 = vrot.slane %v2288_v48, 1  ;;  %v1409_v45 = vsel %vm1400_vm4, %v1406_v40, %v1408_v44 }
  0x8b   : > { %2048 = vmatprep.mubr.msk.bf16.mxu0 %vm2164_vm1, %v2163_v1  ;;  %2030 = vmatprep.mubr.msk.bf16.mxu1 %vm2164_vm1, %v2163_v1 }
  0x8c   : > { %v1403_v42 = vsel %vm1400_vm4, %v1401_v25, %v1402_v35  ;;  %v1405_v48 = vsel %vm1400_vm4, %v1402_v35, %v1404_v47 }
  0x92   : > { %2049 = vmatmul.mubr.msk.bf16.gmra.mrb[64].mxu0 %vm220_vm2, %v2367_v52  ;;  %2031 = vmatmul.mubr.msk.bf16.gmra.mrb[64].mxu1 %vm220_vm2, %v944_v5 }
  0x93   : > { %2052 = vmatprep.mubr.msk.bf16.mxu0 %vm2164_vm1, %v2163_v1  ;;  %2058 = vmatprep.mubr.msk.bf16.mxu1 %vm2164_vm1, %v2163_v1 }
  0x9a   : > { %2053 = vmatmul.mubr.msk.bf16.gmra.mrb[68].mxu0 %vm220_vm2, %v1119_v7  ;;  %2059 = vmatmul.mubr.msk.bf16.vlgmr.msra.gmra.mrb[68].mxu1 %vm220_vm2, %v2375_v62 }
  0x9b   : > { %2080 = vmatprep.mubr.msk.bf16.mxu0 %vm2164_vm1, %v2163_v1  ;;  %2062 = vmatprep.mubr.msk.bf16.mxu1 %vm2164_vm1, %v2163_v1 }
  0xa2   : > { %2081 = vmatmul.mubr.msk.bf16.vlgmr.msra.gmra.mrb[72].mxu0 %vm220_vm2, %v1403_v42  ;;  %2063 = vmatmul.mubr.msk.bf16.gmra.mrb[72].mxu1 %vm220_vm2, %v2378_v63 }
  0xa3   : > { %2084 = vmatprep.mubr.msk.bf16.mxu0 %vm2164_vm1, %v2163_v1  ;;  %2066 = vmatprep.mubr.msk.bf16.mxu1 %vm2164_vm1, %v2163_v1 }
  0xaa   : > { %2085 = vmatmul.mubr.msk.bf16.gmra.mrb[76].mxu0 %vm220_vm2, %v1405_v48  ;;  %2067 = vmatmul.mubr.msk.bf16.gmra.mrb[76].mxu1 %vm220_vm2, %v2382_v8 }
  0xab   : > { %2088 = vmatprep.mubr.msk.bf16.mxu0 %vm2164_vm1, %v2163_v1  ;;  %2070 = vmatprep.mubr.msk.bf16.mxu1 %vm2164_vm1, %v2163_v1 }
  0xb2   : > { %2089 = vmatmul.mubr.msk.bf16.gmra.mrb[80].mxu0 %vm220_vm2, %v1407_v2  ;;  %2071 = vmatmul.mubr.msk.bf16.gmra.mrb[80].mxu1 %vm220_vm2, %v2395_v12 }
  0xb3   : > { %2092 = vmatprep.mubr.msk.bf16.mxu0 %vm2164_vm1, %v2163_v1  ;;  %2074 = vmatprep.mubr.msk.bf16.mxu1 %vm2164_vm1, %v2163_v1 }
  0xba   : > { %2093 = vmatmul.mubr.msk.bf16.gmra.mrb[84].mxu0 %vm220_vm2, %v1409_v45  ;;  %2075 = vmatmul.mubr.msk.bf16.gmra.mrb[84].mxu1 %vm220_vm2, %v1294_v16 }
  0xbb   : > { %2096 = vmatprep.mubr.msk.bf16.mxu0 %vm2164_vm1, %v2163_v1 }
  0xc2   : > { %2097 = vmatmul.mubr.msk.bf16.gmra.mrb[88].mxu0 %vm220_vm2, %v1408_v44 }
  0xe5   : > { %v274_v46 = vpop.f32.mrb[0].mxu0  ;;  %v298_v24 = vpop.f32.mrb[0].mxu1 }
  0xe6   : > { %v1906_v50 = vpop.f32.mrb[1].mxu0  ;;  %v1918_v34 = vpop.f32.mrb[1].mxu1 }
  0xe7   : > { %v277_v21 = vpop.f32.mrb[2].mxu0  ;;  %v301_v51 = vpop.f32.mrb[2].mxu1 }
  0xe8   : > { %v1907_v38 = vpop.f32.mrb[3].mxu0  ;;  %v1919_v52 = vpop.f32.mrb[3].mxu1 }
  0xed   : > { %v282_v53 = vpop.f32.mrb[4].mxu0  ;;  %v306_v55 = vpop.f32.mrb[4].mxu1 }
  0xee   : > { %v1910_v54 = vpop.f32.mrb[5].mxu0  ;;  %v1922_v57 = vpop.f32.mrb[5].mxu1 }
  0xef   : > { %v285_v56 = vpop.f32.mrb[6].mxu0  ;;  %v309_v59 = vpop.f32.mrb[6].mxu1 }
  0xf0   : > { %v1911_v58 = vpop.f32.mrb[7].mxu0  ;;  %v1923_v60 = vpop.f32.mrb[7].mxu1 }
  0xf5   : > { %v290_v61 = vpop.f32.mrb[8].mxu0  ;;  %v387_v1 = vpop.f32.mrb[8].mxu1 }
  0xf6   : > { %v1914_v62 = vpop.f32.mrb[9].mxu0  ;;  %v388_v63 = vadd.f32 %v387_v1, %v274_v46  ;;  %v1928_v0 = vpop.f32.mrb[9].mxu1 }
  0xf7   : > { %v293_v3 = vpop.f32.mrb[10].mxu0  ;;  %v390_v6 = vpop.f32.mrb[10].mxu1 }
  0xf8   : > { %v1915_v8 = vpop.f32.mrb[11].mxu0  ;;  %v391_v9 = vadd.f32 %v390_v6, %v277_v21  ;;  %v1929_v10 = vpop.f32.mrb[11].mxu1 }
  0xfd   : > { %v554_v11 = vpop.f32.mrb[12].mxu0  ;;  %v395_v12 = vpop.f32.mrb[12].mxu1 }
  0xfe   : > { %v592_v13 = vadd.f32 %v554_v11, %v388_v63  ;;  %v1950_v49 = vpop.f32.mrb[13].mxu0  ;;  %v396_v14 = vadd.f32 %v395_v12, %v282_v53  ;;  %v1932_v15 = vpop.f32.mrb[13].mxu1 }
  0xff   : > { %v557_v17 = vpop.f32.mrb[14].mxu0  ;;  %v398_v19 = vpop.f32.mrb[14].mxu1 }
 0x100   : > { %v593_v20 = vadd.f32 %v557_v17, %v391_v9  ;;  %v1951_v22 = vpop.f32.mrb[15].mxu0  ;;  %v399_v26 = vadd.f32 %v398_v19, %v285_v56  ;;  %v1933_v27 = vpop.f32.mrb[15].mxu1 }
 0x105   : > { %v562_v28 = vpop.f32.mrb[16].mxu0  ;;  %v403_v29 = vpop.f32.mrb[16].mxu1 }
 0x106   : > { %v594_v30 = vadd.f32 %v562_v28, %v396_v14  ;;  %v1954_v32 = vpop.f32.mrb[17].mxu0  ;;  %v404_v33 = vadd.f32 %v403_v29, %v290_v61  ;;  %v1936_v36 = vpop.f32.mrb[17].mxu1 }
 0x107   : > { %v565_v37 = vpop.f32.mrb[18].mxu0  ;;  %v406_v39 = vpop.f32.mrb[18].mxu1 }
 0x108   : > { %v595_v41 = vadd.f32 %v565_v37, %v399_v26  ;;  %v1955_v4 = vpop.f32.mrb[19].mxu0  ;;  %v407_v5 = vadd.f32 %v406_v39, %v293_v3  ;;  %v1937_v18 = vpop.f32.mrb[19].mxu1 }
 0x10d   : > { %v570_v23 = vpop.f32.mrb[20].mxu0  ;;  %v411_v7 = vpop.f32.mrb[20].mxu1 }
 0x10e   : > { %v596_v31 = vadd.f32 %v570_v23, %v404_v33  ;;  %v1958_v25 = vpop.f32.mrb[21].mxu0  ;;  %v412_v35 = vadd.f32 %v411_v7, %v298_v24  ;;  %v1940_v42 = vpop.f32.mrb[21].mxu1 }
 0x10f   : > { %v573_v47 = vpop.f32.mrb[22].mxu0  ;;  %v414_v48 = vpop.f32.mrb[22].mxu1 }
 0x110   : > { %v597_v40 = vadd.f32 %v573_v47, %v407_v5  ;;  %v1959_v2 = vpop.f32.mrb[23].mxu0  ;;  %v415_v43 = vadd.f32 %v414_v48, %v301_v51  ;;  %v1941_v44 = vpop.f32.mrb[23].mxu1 }
 0x115   : > { %v578_v16 = vpop.f32.mrb[24].mxu0  ;;  %v419_v45 = vpop.f32.mrb[24].mxu1 }
 0x116   : > { %v598_v46 = vadd.f32 %v578_v16, %v412_v35  ;;  %v1962_v50 = vpop.f32.mrb[25].mxu0  ;;  %v420_v21 = vadd.f32 %v419_v45, %v306_v55  ;;  %v1944_v38 = vpop.f32.mrb[25].mxu1 }
 0x117   : > { %v581_v34 = vpop.f32.mrb[26].mxu0  ;;  %v422_v54 = vpop.f32.mrb[26].mxu1 }
 0x118   : > { %v599_v52 = vadd.f32 %v581_v34, %v415_v43  ;;  %v1963_v53 = vpop.f32.mrb[27].mxu0  ;;  %v1945_v56 = vpop.f32.mrb[27].mxu1 }
 0x11d   : > { %v586_v57 = vpop.f32.mrb[28].mxu0  ;;  %v688_v58 = vpop.f32.mrb[28].mxu1 }
 0x11e   : > { %v600_v24 = vadd.f32 %v586_v57, %v420_v21  ;;  %v1966_v59 = vpop.f32.mrb[29].mxu0  ;;  %v726_v60 = vadd.f32 %v688_v58, %v592_v13  ;;  %v1972_v61 = vpop.f32.mrb[29].mxu1 }
 0x11f   : > { %v589_v1 = vpop.f32.mrb[30].mxu0  ;;  %v691_v51 = vpop.f32.mrb[30].mxu1 }
 0x120   : > { %v1967_v62 = vpop.f32.mrb[31].mxu0  ;;  %v727_v63 = vadd.f32 %v691_v51, %v593_v20  ;;  %v1973_v0 = vpop.f32.mrb[31].mxu1 }
 0x125   : > { %v822_v3 = vpop.f32.mrb[32].mxu0  ;;  %v696_v6 = vpop.f32.mrb[32].mxu1 }
 0x126   : > { %v860_v55 = vadd.f32 %v822_v3, %v726_v60  ;;  %v1994_v8 = vpop.f32.mrb[33].mxu0  ;;  %v728_v9 = vadd.f32 %v696_v6, %v594_v30  ;;  %v1976_v10 = vpop.f32.mrb[33].mxu1 }
 0x127   : > { %v825_v11 = vpop.f32.mrb[34].mxu0  ;;  %v699_v12 = vpop.f32.mrb[34].mxu1 }
 0x128   : > { %v861_v49 = vadd.f32 %v825_v11, %v727_v63  ;;  %v1995_v14 = vpop.f32.mrb[35].mxu0  ;;  %v729_v15 = vadd.f32 %v699_v12, %v595_v41  ;;  %v1977_v17 = vpop.f32.mrb[35].mxu1 }
 0x12d   : > { %v830_v19 = vpop.f32.mrb[36].mxu0  ;;  %v704_v13 = vpop.f32.mrb[36].mxu1 }
 0x12e   : > { %v862_v22 = vadd.f32 %v830_v19, %v728_v9  ;;  %v1998_v26 = vpop.f32.mrb[37].mxu0  ;;  %v730_v27 = vadd.f32 %v704_v13, %v596_v31  ;;  %v1980_v28 = vpop.f32.mrb[37].mxu1 }
 0x12f   : > { %v833_v20 = vpop.f32.mrb[38].mxu0  ;;  %v707_v29 = vpop.f32.mrb[38].mxu1 }
 0x130   : > { %v863_v32 = vadd.f32 %v833_v20, %v729_v15  ;;  %v1999_v33 = vpop.f32.mrb[39].mxu0  ;;  %v731_v36 = vadd.f32 %v707_v29, %v597_v40  ;;  %v1981_v37 = vpop.f32.mrb[39].mxu1 }
 0x135   : > { %v838_v30 = vpop.f32.mrb[40].mxu0  ;;  %v712_v39 = vpop.f32.mrb[40].mxu1 }
 0x136   : > { %v864_v4 = vadd.f32 %v838_v30, %v730_v27  ;;  %v2002_v5 = vpop.f32.mrb[41].mxu0  ;;  %v732_v18 = vadd.f32 %v712_v39, %v598_v46  ;;  %v1984_v23 = vpop.f32.mrb[41].mxu1 }
 0x137   : > { %v841_v41 = vpop.f32.mrb[42].mxu0  ;;  %v715_v7 = vpop.f32.mrb[42].mxu1 }
 0x138   : > { %v865_v25 = vadd.f32 %v841_v41, %v731_v36  ;;  %v2003_v35 = vpop.f32.mrb[43].mxu0  ;;  %v733_v42 = vadd.f32 %v715_v7, %v599_v52  ;;  %v1985_v47 = vpop.f32.mrb[43].mxu1 }
 0x13d   : > { %v846_v31 = vpop.f32.mrb[44].mxu0  ;;  %v720_v48 = vpop.f32.mrb[44].mxu1 }
 0x13e   : > { %v866_v2 = vadd.f32 %v846_v31, %v732_v18  ;;  %v2006_v43 = vpop.f32.mrb[45].mxu0  ;;  %v734_v44 = vadd.f32 %v720_v48, %v600_v24  ;;  %v1988_v40 = vpop.f32.mrb[45].mxu1 }
 0x13f   : > { %v849_v16 = vpop.f32.mrb[46].mxu0  ;;  %v723_v21 = vpop.f32.mrb[46].mxu1 }
 0x140   : > { %v867_v45 = vadd.f32 %v849_v16, %v733_v42  ;;  %v2007_v50 = vpop.f32.mrb[47].mxu0  ;;  %v1989_v34 = vpop.f32.mrb[47].mxu1 }
 0x145   : > { %v854_v38 = vpop.f32.mrb[48].mxu0  ;;  %v997_v53 = vpop.f32.mrb[48].mxu1 }
 0x146   : > { %v868_v46 = vadd.f32 %v854_v38, %v734_v44  ;;  %v2010_v54 = vpop.f32.mrb[49].mxu0  ;;  %v1035_v56 = vadd.f32 %v997_v53, %v860_v55  ;;  %v2016_v57 = vpop.f32.mrb[49].mxu1 }
 0x147   : > { %v857_v58 = vpop.f32.mrb[50].mxu0  ;;  %v1000_v52 = vpop.f32.mrb[50].mxu1 }
 0x148   : > { %v2011_v59 = vpop.f32.mrb[51].mxu0  ;;  %v1036_v60 = vadd.f32 %v1000_v52, %v861_v49  ;;  %v2017_v61 = vpop.f32.mrb[51].mxu1 }
 0x14d   : > { %v1172_v1 = vpop.f32.mrb[52].mxu0  ;;  %v1005_v51 = vpop.f32.mrb[52].mxu1 }
 0x14e   : > { %v1210_v24 = vadd.f32 %v1172_v1, %v1035_v56  ;;  %v2038_v62 = vpop.f32.mrb[53].mxu0  ;;  %v1037_v63 = vadd.f32 %v1005_v51, %v862_v22  ;;  %v2020_v0 = vpop.f32.mrb[53].mxu1 }
 0x14f   : > { %v1175_v3 = vpop.f32.mrb[54].mxu0  ;;  %v1008_v6 = vpop.f32.mrb[54].mxu1 }
 0x150   : > { %v1211_v8 = vadd.f32 %v1175_v3, %v1036_v60  ;;  %v2039_v9 = vpop.f32.mrb[55].mxu0  ;;  %v1038_v10 = vadd.f32 %v1008_v6, %v863_v32  ;;  %v2021_v11 = vpop.f32.mrb[55].mxu1 }
 0x151   : > { %v2568_v11 = vld [vmem:[%s2628_s2 + $0x2] ss:$0 sm:$0xff] }
 0x155   : > { %v1180_v12 = vpop.f32.mrb[56].mxu0  ;;  %v1013_v55 = vpop.f32.mrb[56].mxu1 }
 0x156   : > { %v1212_v14 = vadd.f32 %v1180_v12, %v1037_v63  ;;  %v2042_v15 = vpop.f32.mrb[57].mxu0  ;;  %v1039_v17 = vadd.f32 %v1013_v55, %v864_v4  ;;  %v2024_v19 = vpop.f32.mrb[57].mxu1 }
 0x157   : > { %v1183_v49 = vpop.f32.mrb[58].mxu0  ;;  %v1016_v13 = vpop.f32.mrb[58].mxu1 }
 0x158   : > { %v1213_v26 = vadd.f32 %v1183_v49, %v1038_v10  ;;  %v2043_v27 = vpop.f32.mrb[59].mxu0  ;;  %v1040_v28 = vadd.f32 %v1016_v13, %v865_v25  ;;  %v2025_v20 = vpop.f32.mrb[59].mxu1 }
 0x15d   : > { %v1188_v22 = vpop.f32.mrb[60].mxu0  ;;  %v1021_v29 = vpop.f32.mrb[60].mxu1 }
 0x15e   : > { %v2542_v33 = vadd.f32 %v1188_v22, %v1039_v17  ;;  %v2046_v36 = vpop.f32.mrb[61].mxu0  ;;  %v1041_v37 = vadd.f32 %v1021_v29, %v866_v2  ;;  %v2028_v32 = vpop.f32.mrb[61].mxu1 }
 0x15f   : > { %v1191_v30 = vpop.f32.mrb[62].mxu0  ;;  %v1024_v39 = vpop.f32.mrb[62].mxu1 }
 0x160   : > { %v2544_v5 = vadd.f32 %v1191_v30, %v1040_v28  ;;  %v2047_v18 = vpop.f32.mrb[63].mxu0  ;;  %v1042_v4 = vadd.f32 %v1024_v39, %v867_v45  ;;  %v2029_v23 = vpop.f32.mrb[63].mxu1 }
 0x165   : > { %v1196_v41 = vpop.f32.mrb[64].mxu0  ;;  %v1029_v7 = vpop.f32.mrb[64].mxu1 }
 0x166   : > { %v2546_v35 = vadd.f32 %v1196_v41, %v1041_v37  ;;  %v2050_v25 = vpop.f32.mrb[65].mxu0  ;;  %v1043_v42 = vadd.f32 %v1029_v7, %v868_v46  ;;  %v2032_v31 = vpop.f32.mrb[65].mxu1  ;;  %v2555_v46 = vld [vmem:[%s2628_s2] ss:$0 sm:$0xff] }
 0x167   : > { %v1199_v47 = vpop.f32.mrb[66].mxu0  ;;  %v1032_v2 = vpop.f32.mrb[66].mxu1 }
 0x168   : > { %v2548_v48 = vadd.f32 %v1199_v47, %v1042_v4  ;;  %v2051_v43 = vpop.f32.mrb[67].mxu0  ;;  %v2033_v44 = vpop.f32.mrb[67].mxu1 }
 0x16d   : > { %v1204_v16 = vpop.f32.mrb[68].mxu0  ;;  %v1347_v50 = vpop.f32.mrb[68].mxu1 }
 0x16e   : > { %v2550_v40 = vadd.f32 %v1204_v16, %v1043_v42  ;;  %v2054_v21 = vpop.f32.mrb[69].mxu0  ;;  %v1385_v45 = vadd.f32 %v1347_v50, %v1210_v24  ;;  %v2060_v34 = vpop.f32.mrb[69].mxu1 }
 0x16f   : > { %v1207_v38 = vpop.f32.mrb[70].mxu0  ;;  %v1350_v53 = vpop.f32.mrb[70].mxu1 }
 0x170   : > { %v2055_v54 = vpop.f32.mrb[71].mxu0  ;;  %v1386_v56 = vadd.f32 %v1350_v53, %v1211_v8  ;;  %v2061_v57 = vpop.f32.mrb[71].mxu1  ;;  %v2561_v8 = vld [vmem:[%s2628_s2 + $0x1] ss:$0 sm:$0xff] }
 0x175   : > { %v1462_v58 = vpop.f32.mrb[72].mxu0  ;;  %v1355_v52 = vpop.f32.mrb[72].mxu1 }
 0x176   : > { %v1500_v59 = vadd.f32 %v1462_v58, %v1385_v45  ;;  %v2082_v60 = vpop.f32.mrb[73].mxu0  ;;  %v1387_v61 = vadd.f32 %v1355_v52, %v1212_v14  ;;  %v2064_v1 = vpop.f32.mrb[73].mxu1 }
 0x177   : > { %v1465_v51 = vpop.f32.mrb[74].mxu0  ;;  %v1358_v62 = vpop.f32.mrb[74].mxu1 }
 0x178   : > { %v1513_v24 = vadd.f32 %v2555_v46, %v1500_v59  ;;  %v1501_v63 = vadd.f32 %v1465_v51, %v1386_v56  ;;  %v2083_v0 = vpop.f32.mrb[75].mxu0  ;;  %v1388_v3 = vadd.f32 %v1358_v62, %v1213_v26  ;;  %v2065_v6 = vpop.f32.mrb[75].mxu1 }
 0x17a   : > { %vm1522_vm5 = vcmp.gt.f32.partialorder %v1513_v24, 0.0  ;;  %v1531_v9 = vmul.f32 0.2, %v1513_v24  ;;  %v1514_v10 = vadd.f32 %v2555_v46, %v1501_v63 }
 0x17c   : > { %v1540_v12 = vsel %vm1522_vm5, %v1513_v24, %v1531_v9  ;;  %vm1523_vm6 = vcmp.gt.f32.partialorder %v1514_v10, 0.0  ;;  %v1532_v55 = vmul.f32 0.2, %v1514_v10 }
 0x17d   : > { %v1553_v14 = vmul.f32 %v2561_v8, %v1540_v12  ;;  %v1470_v15 = vpop.f32.mrb[76].mxu0  ;;  %v1363_v19 = vpop.f32.mrb[76].mxu1 }
 0x17e   : > { %v1541_v17 = vsel %vm1523_vm6, %v1514_v10, %v1532_v55  ;;  %v1502_v49 = vadd.f32 %v1470_v15, %v1387_v61  ;;  %v2086_v13 = vpop.f32.mrb[77].mxu0  ;;  %v1389_v28 = vadd.f32 %v1363_v19, %v2542_v33  ;;  %v2068_v20 = vpop.f32.mrb[77].mxu1 }
 0x17f   : > { %v1566_v26 = vadd.f32 %v2568_v11, %v1553_v14  ;;  %v1554_v27 = vmul.f32 %v2561_v8, %v1541_v17  ;;  %v1473_v22 = vpop.f32.mrb[78].mxu0  ;;  %v1366_v36 = vpop.f32.mrb[78].mxu1 }
 0x180   : > { %v1515_v29 = vadd.f32 %v2555_v46, %v1502_v49  ;;  %v1503_v37 = vadd.f32 %v1473_v22, %v1388_v3  ;;  %v2087_v32 = vpop.f32.mrb[79].mxu0  ;;  %v1390_v33 = vadd.f32 %v1366_v36, %v2544_v5  ;;  %v2069_v18 = vpop.f32.mrb[79].mxu1 }
 0x181   : > { %v1839_v30 = vpack.c.bf16 %v1566_v26, %v1566_v26  ;;  %v1567_v39 = vadd.f32 %v2568_v11, %v1554_v27 }
 0x182   : > { %vm1524_vm8 = vcmp.gt.f32.partialorder %v1515_v29, 0.0  ;;  %v1533_v4 = vmul.f32 0.2, %v1515_v29  ;;  %v1516_v23 = vadd.f32 %v2555_v46, %v1503_v37 }
 0x183   : > { %1613 = vst.msk [vmem:[%s2577_s19] sm:$0xf] %vm1612_vm7, %v1839_v30  ;;  %v1840_v41 = vpack.c.bf16 %v1567_v39, %v1567_v39 }
 0x184   : > { %v1542_v7 = vsel %vm1524_vm8, %v1515_v29, %v1533_v4  ;;  %vm1525_vm9 = vcmp.gt.f32.partialorder %v1516_v23, 0.0  ;;  %v1534_v25 = vmul.f32 0.2, %v1516_v23 }
 0x185   : > { %1614 = vst.msk [vmem:[%s2577_s19 + $0x4] sm:$0xf] %vm1612_vm7, %v1840_v41  ;;  %v1555_v42 = vmul.f32 %v2561_v8, %v1542_v7  ;;  %v1478_v47 = vpop.f32.mrb[80].mxu0  ;;  %v1371_v43 = vpop.f32.mrb[80].mxu1 }
 0x186   : > { %v1543_v31 = vsel %vm1525_vm9, %v1516_v23, %v1534_v25  ;;  %v1504_v2 = vadd.f32 %v1478_v47, %v1389_v28  ;;  %v2090_v5 = vpop.f32.mrb[81].mxu0  ;;  %v1391_v50 = vadd.f32 %v1371_v43, %v2546_v35  ;;  %v2072_v21 = vpop.f32.mrb[81].mxu1 }
 0x187   : > { %v1568_v44 = vadd.f32 %v2568_v11, %v1555_v42  ;;  %v1556_v16 = vmul.f32 %v2561_v8, %v1543_v31  ;;  %v1481_v45 = vpop.f32.mrb[82].mxu0  ;;  %v1374_v38 = vpop.f32.mrb[82].mxu1 }
 0x188   : > { %v1517_v34 = vadd.f32 %v2555_v46, %v1504_v2  ;;  %v1505_v53 = vadd.f32 %v1481_v45, %v1390_v33  ;;  %v2091_v54 = vpop.f32.mrb[83].mxu0  ;;  %v1392_v58 = vadd.f32 %v1374_v38, %v2548_v48  ;;  %v2073_v52 = vpop.f32.mrb[83].mxu1 }
 0x189   : > { %v1841_v56 = vpack.c.bf16 %v1568_v44, %v1568_v44  ;;  %v1569_v57 = vadd.f32 %v2568_v11, %v1556_v16 }
 0x18a   : > { %vm1526_vm10 = vcmp.gt.f32.partialorder %v1517_v34, 0.0  ;;  %v1535_v59 = vmul.f32 0.2, %v1517_v34  ;;  %v1518_v60 = vadd.f32 %v2555_v46, %v1505_v53 }
 0x18b   : > { %1615 = vst.msk [vmem:[%s2577_s19 + $0x8] sm:$0xf] %vm1612_vm7, %v1841_v56  ;;  %v1842_v35 = vpack.c.bf16 %v1569_v57, %v1569_v57 }
 0x18c   : > { %v1544_v61 = vsel %vm1526_vm10, %v1517_v34, %v1535_v59  ;;  %vm1527_vm11 = vcmp.gt.f32.partialorder %v1518_v60, 0.0  ;;  %v1536_v1 = vmul.f32 0.2, %v1518_v60 }
 0x18d   : > { %1616 = vst.msk [vmem:[%s2577_s19 + $0xc] sm:$0xf] %vm1612_vm7, %v1842_v35  ;;  %v1557_v51 = vmul.f32 %v2561_v8, %v1544_v61  ;;  %v1486_v24 = vpop.f32.mrb[84].mxu0  ;;  %v1379_v63 = vpop.f32.mrb[84].mxu1 }
 0x18e   : > { %v1545_v62 = vsel %vm1527_vm11, %v1518_v60, %v1536_v1  ;;  %v1506_v0 = vadd.f32 %v1486_v24, %v1391_v50  ;;  %v2094_v48 = vpop.f32.mrb[85].mxu0  ;;  %v1393_v9 = vadd.f32 %v1379_v63, %v2550_v40  ;;  %v2076_v12 = vpop.f32.mrb[85].mxu1 }
 0x18f   : > { %v1570_v3 = vadd.f32 %v2568_v11, %v1557_v51  ;;  %v1558_v6 = vmul.f32 %v2561_v8, %v1545_v62  ;;  %v1489_v10 = vpop.f32.mrb[86].mxu0  ;;  %v1382_v17 = vpop.f32.mrb[86].mxu1 }
 0x190   : > { %v1519_v55 = vadd.f32 %v2555_v46, %v1506_v0  ;;  %v1507_v14 = vadd.f32 %v1489_v10, %v1392_v58  ;;  %v2095_v15 = vpop.f32.mrb[87].mxu0  ;;  %v2077_v13 = vpop.f32.mrb[87].mxu1 }
 0x191   : > { %v1843_v19 = vpack.c.bf16 %v1570_v3, %v1570_v3  ;;  %v1571_v49 = vadd.f32 %v2568_v11, %v1558_v6 }
 0x192   : > { %vm1528_vm12 = vcmp.gt.f32.partialorder %v1519_v55, 0.0  ;;  %v1537_v26 = vmul.f32 0.2, %v1519_v55  ;;  %v1520_v27 = vadd.f32 %v2555_v46, %v1507_v14 }
 0x193   : > { %1617 = vst.msk [vmem:[%s2577_s19 + $0x10] sm:$0xf] %vm1612_vm7, %v1843_v19  ;;  %v1844_v28 = vpack.c.bf16 %v1571_v49, %v1571_v49 }
 0x194   : > { %v1546_v40 = vsel %vm1528_vm12, %v1519_v55, %v1537_v26  ;;  %vm1529_vm13 = vcmp.gt.f32.partialorder %v1520_v27, 0.0  ;;  %v1538_v20 = vmul.f32 0.2, %v1520_v27 }
 0x195   : > { %1618 = vst.msk [vmem:[%s2577_s19 + $0x14] sm:$0xf] %vm1612_vm7, %v1844_v28  ;;  %v1559_v22 = vmul.f32 %v2561_v8, %v1546_v40  ;;  %v1494_v29 = vpop.f32.mrb[88].mxu0 }
 0x196   : > { %v1547_v36 = vsel %vm1529_vm13, %v1520_v27, %v1538_v20  ;;  %v1508_v37 = vadd.f32 %v1494_v29, %v1393_v9  ;;  %v2098_v32 = vpop.f32.mrb[89].mxu0 }
 0x197   : > { %v1572_v30 = vadd.f32 %v2568_v11, %v1559_v22  ;;  %v1560_v39 = vmul.f32 %v2561_v8, %v1547_v36  ;;  %v1497_v33 = vpop.f32.mrb[90].mxu0 }
 0x198   : > { %v1521_v18 = vadd.f32 %v2555_v46, %v1508_v37  ;;  %v2099_v4 = vpop.f32.mrb[91].mxu0 }
 0x199   : > { %v1845_v23 = vpack.c.bf16 %v1572_v30, %v1572_v30  ;;  %v1573_v41 = vadd.f32 %v2568_v11, %v1560_v39 }
 0x19a   : > { %vm1530_vm14 = vcmp.gt.f32.partialorder %v1521_v18, 0.0  ;;  %v1539_v7 = vmul.f32 0.2, %v1521_v18 }
 0x19b   : > { %1619 = vst.msk [vmem:[%s2577_s19 + $0x18] sm:$0xf] %vm1612_vm7, %v1845_v23  ;;  %v1846_v25 = vpack.c.bf16 %v1573_v41, %v1573_v41 }
 0x19c   : > { %v1548_v42 = vsel %vm1530_vm14, %v1521_v18, %v1539_v7 }
 0x19d   : > { %1620 = vst.msk [vmem:[%s2577_s19 + $0x1c] sm:$0xf] %vm1612_vm7, %v1846_v25  ;;  %v1561_v47 = vmul.f32 %v2561_v8, %v1548_v42 }
 0x19f   : > { %v1574_v31 = vadd.f32 %v2568_v11, %v1561_v47 }
 0x1a1   : > { %v1847_v43 = vpack.c.bf16 %v1574_v31, %v1574_v31 }
 0x1a3   : > { %1621 = vst.msk [vmem:[%s2577_s19 + $0x20] sm:$0xf] %vm1612_vm7, %v1847_v43 }
 0x1a4 PF: > { %s13_s12 = sadd.s32 1, %s2161_s12  }
 0x1a5   : > { %p10_p4 = scmp.ge.s32.totalorder %s13_s12, 4  }
 0x1a7   :  { %12 = sbr.rel (!%p10_p4) target bundleno = 1 (0x1), region = 73 }

// kernel: discriminator_forward.5
= control target key start
LH: loop header
LB: loop body
LE: loop exit
PB: predicated region body
PF: predicated region fallthrough
CT: control target
= control target key end

     0   :  { %s1255_s12 = smov 0   ;;  %s1352_s0 = inlined_call_operand.vmem [shape: bf16[2,4,32,16], index: 0, kind: input, shape index: {}]   ;;  %s1353_s1 = inlined_call_operand.vmem [shape: bf16[9,16,32], index: 1, kind: input, shape index: {}]   ;;  %s1354_s2 = inlined_call_operand.vmem [shape: f32[3,32], index: 2, kind: input, shape index: {}]   ;;  %s1355_s3 = inlined_call_operand.vmem [shape: bf16[2,20,32], index: 3, kind: output, shape index: {}]  }
   0x1 LB: > { %s1021_s13 = sadd.s32 4294967295, %s1233_s12   ;;  %p1025_p0 = scmp.ge.s32.totalorder %s1233_s12, 1  ;;  %s1233_s12 = sphi %s1255_s12, %s13_s12  }
   0x2   : > { %p137_p1 = scmp.lt.s32.totalorder %s1233_s12, 3 }
   0x4   : > { %p138_p2 = pnand %p1025_p0, %p137_p1 }
   0x5   : > { %v1203_v0 = vld [vmem:[%s1353_s1 + $0x8] sm:$0xff] (!%p138_p2)   ;;  %p161_p3 = scmp.lt.s32.totalorder (!%p138_p2), %s1021_s13, 1  ;;  %v1204_v1 = vld [vmem:[%s1353_s1] sm:$0xff] (!%p138_p2)   ;;  %v1207_v2 = vld [vmem:[%s1353_s1 + $0x10] sm:$0xff] (!%p138_p2)   ;;  %vm201_vm0 = vcmask (!%p138_p2), 130048   ;;  %vm851_vm3 = vcmask (!%p138_p2), 1044480  }
   0x6   : > { %141 = sbr.rel (%p138_p2) target bundleno = 279 (0x117), region = 32  ;;  %1140 = vmatprep.subr.bf16.mxu0 (!%p138_p2), %v1203_v0  ;;  %1146 = vmatprep.subr.bf16.mxu1 (!%p138_p2), %v1204_v1  ;;  %v1210_v3 = vld [vmem:[%s1353_s1 + $0x18] sm:$0xff] (!%p138_p2)   ;;  %v1212_v5 = vld [vmem:[%s1353_s1 + $0x20] sm:$0xff] (!%p138_p2)   ;;  %v1215_v14 = vld [vmem:[%s1353_s1 + $0x28] sm:$0xff] (!%p138_p2)   ;;  %vm331_vm1 = vsmask.f32 (!%p138_p2), 7424 }
   0x7   : > { %1141 = vmatpush3.bf16.msra.mxu0 (!%p138_p2), %v1203_v0  ;;  %1147 = vmatpush3.bf16.msra.mxu1 (!%p138_p2), %v1204_v1  ;;  %v1217_v21 = vld [vmem:[%s1353_s1 + $0x30] sm:$0xff] (!%p138_p2)   ;;  %v1220_v30 = vld [vmem:[%s1353_s1 + $0x38] sm:$0xff] (!%p138_p2)   ;;  %vm666_vm2 = vsmask.f32 (!%p138_p2), 5376  ;;  %v1223_v41 = vld [vmem:[%s1353_s1 + $0x40] sm:$0xff] (!%p138_p2)   ;;  %vm964_vm7 = vcmask (!%p138_p2), 254976  }
   0x8   : > { %1152 = vmatprep.subr.bf16.mxu0 (!%p138_p2), %v1207_v2  ;;  %1158 = vmatprep.subr.bf16.mxu1 (!%p138_p2), %v1210_v3  ;;  %vm961_vm8 = vcmask (!%p138_p2), 257024  }
   0xd   : > { %s1357_s13 = smov (!%p161_p3, %s1021_s13), 1 }
   0xe   : > { %s1109_s22 = sshll.u32 %s1357_s13, 6  ;;  %s1194_s15 = smul.u32 12, %s1357_s13 }
   0xf   : > { %s1281_s25 = scalar_lea.vmem %s1352_s0, %s1109_s22 }
  0x10   : > { %v1205_v4 = vld [vmem:[%s1281_s25 + $0x10] sm:$0xff]   ;;  %v1206_v6 = vld [vmem:[%s1281_s25] sm:$0xff]   ;;  %v1208_v7 = vld [vmem:[%s1281_s25 + $0x18] ss:$0 sps:$4 sm:$0x33]   ;;  %s170_s20 = scalar_lea.vmem %s1355_s3, %s1194_s15 }
  0x11   : > { %1142 = vmatprep.mubr.msk.bf16.mxu0 %vm201_vm0, %v1205_v4  ;;  %v1213_v8 = vld [vmem:[%s1281_s25 + $0x20] sm:$0xff]   ;;  %1148 = vmatprep.mubr.msk.bf16.mxu1 %vm201_vm0, %v1206_v6  ;;  %v332_v9 = vshrl.u32 %v1206_v6, 16  ;;  %v334_v10 = vshll.u32 %v1206_v6, 16  ;;  %v1209_v11 = vld [vmem:[%s1281_s25 + $0x8] ss:$0 sps:$4 sm:$0x33]  }
  0x12   : > { %1143 = vmatmul.mubr.msk.bf16.vlgmr.msra.gmra.mrb[0].mxu0 %vm201_vm0, %v1208_v7  ;;  %v1211_v12 = vld [vmem:[%s1281_s25 + $0x8] ss:$0 sps:$4 sm:$0x77]   ;;  %1149 = vmatmul.mubr.msk.bf16.vlgmr.msra.gmra.mrb[0].mxu1 %vm201_vm0, %v1209_v11  ;;  %v1216_v20 = vld [vmem:[%s1281_s25 + $0x30] sm:$0xff]   ;;  %v572_v22 = vshrl.u32 %v1213_v8, 16  ;;  %v574_v26 = vshll.u32 %v1213_v8, 16 }
  0x13   : > { %v336_v13 = vrot.slane %v334_v10, 1  ;;  %1153 = vmatpush3.bf16.msra.mxu0 %v1207_v2  ;;  %v339_v15 = vshll.u32 %v1211_v12, 16  ;;  %v343_v16 = vshrl.u32 %v1211_v12, 16  ;;  %1159 = vmatpush3.bf16.msra.mxu1 %v1210_v3  ;;  %v1214_v19 = vld [vmem:[%s1281_s25 + $0x28] ss:$0 sps:$4 sm:$0x33]  }
  0x14   : > { %1164 = vmatprep.subr.bf16.mxu0 %v1212_v5  ;;  %1160 = vmatprep.mubr.msk.bf16.mxu1 %vm201_vm0, %v1213_v8  ;;  %v1219_v25 = vld [vmem:[%s1281_s25 + $0x28] ss:$0 sps:$4 sm:$0x77]   ;;  %v576_v27 = vrot.slane %v574_v26, 1  ;;  %v649_v31 = vld [vmem:[%s1281_s25] sm:$0xc] }
  0x15   : > { %v337_v17 = vor.u32 %v336_v13, %v332_v9  ;;  %v341_v18 = vrot.slane %v339_v15, 1  ;;  %1170 = vmatprep.subr.bf16.mxu1 %v1215_v14  ;;  %v579_v28 = vshll.u32 %v1219_v25, 16  ;;  %v583_v29 = vshrl.u32 %v1219_v25, 16  ;;  %v650_v32 = vld [vmem:[%s1281_s25 + $0x4] sm:$0xf] }
  0x16   : > { %v1218_v33 = vld [vmem:[%s1281_s25 + $0x38] ss:$0 sps:$4 sm:$0x33]   ;;  %v577_v34 = vor.u32 %v576_v27, %v572_v22  ;;  %v1079_v36 = vcombine.low %v649_v31, %v650_v32  ;;  %v1222_v37 = vld [vmem:[%s1281_s25 + $0x8] sm:$0x1f]  }
  0x17   : > { %v342_v23 = vsel %vm331_vm1, %v337_v17, %v341_v18  ;;  %v345_v24 = vor.u32 %v343_v16, %v341_v18  ;;  %v581_v35 = vrot.slane %v579_v28, 1  ;;  %v676_v42 = vshrl.u32 %v1222_v37, 16  ;;  %v1224_v44 = vld [vmem:[%s1281_s25 + $0x10] sm:$0xfc]   ;;  %v1225_v48 = vld [vmem:[%s1281_s25 + $0x18] sm:$0x1f]  }
  0x18   : > { %1154 = vmatprep.mubr.msk.bf16.mxu0 %vm201_vm0, %v342_v23  ;;  %v668_v39 = vshrl.u32 %v1079_v36, 16  ;;  %v671_v40 = vshll.u32 %v1079_v36, 16  ;;  %v679_v43 = vshll.u32 %v1222_v37, 16  ;;  %v844_v49 = vld [vmem:[%s1281_s25] sm:$0x8]  ;;  %v765_v52 = vshrl.u32 %v1224_v44, 16 }
  0x19   : > { %v582_v38 = vsel %vm331_vm1, %v577_v34, %v581_v35  ;;  %v585_v45 = vor.u32 %v583_v29, %v581_v35  ;;  %v678_v50 = vrot.slane %v676_v42, 2  ;;  %v768_v53 = vshll.u32 %v1224_v44, 16 }
  0x1a   : > { %1155 = vmatmul.mubr.msk.bf16.vlgmr.msra.gmra.mrb[4].mxu0 %vm201_vm0, %v345_v24  ;;  %1161 = vmatmul.mubr.msk.bf16.vlgmr.msra.gmra.mrb[4].mxu1 %vm201_vm0, %v1214_v19  ;;  %v670_v46 = vrot.slane %v668_v39, 2  ;;  %v673_v47 = vrot.slane %v671_v40, 3  ;;  %v681_v51 = vrot.slane %v679_v43, 3  ;;  %v773_v55 = vshrl.u32 %v1225_v48, 16 }
  0x1b   : > { %1165 = vmatpush3.bf16.msra.mxu0 %v1212_v5  ;;  %1166 = vmatprep.mubr.msk.bf16.mxu0 %vm201_vm0, %v1216_v20  ;;  %v776_v56 = vshll.u32 %v1225_v48, 16  ;;  %v1097_v57 = vcombine.low %v844_v49, %v650_v32  ;;  %v767_v59 = vrot.slane %v765_v52, 2  ;;  %v770_v60 = vrot.slane %v768_v53, 3 }
  0x1c   : > { %1176 = vmatprep.subr.bf16.mxu0 %v1217_v21  ;;  %1171 = vmatpush3.bf16.msra.mxu1 %v1215_v14  ;;  %v674_v54 = vor.u32 %v673_v47, %v670_v46  ;;  %v682_v58 = vor.u32 %v681_v51, %v678_v50  ;;  %v775_v61 = vrot.slane %v773_v55, 2  ;;  %v853_v0 = vrot.slane %v1222_v37, 3 }
  0x1d   : > { %1182 = vmatprep.subr.bf16.mxu1 %v1220_v30  ;;  %1172 = vmatprep.mubr.msk.bf16.mxu1 %vm201_vm0, %v582_v38  ;;  %v778_v62 = vrot.slane %v776_v56, 3  ;;  %v852_v63 = vrot.slane %v1097_v57, 3  ;;  %v771_v2 = vor.u32 %v770_v60, %v767_v59  ;;  %v1101_v59 = vld [vmem:[%s1354_s2] ss:$0 sm:$0xff] }
  0x1e   : > { %v683_v1 = vsel %vm666_vm2, %v674_v54, %v682_v58 }
  0x1f   : > { %v779_v3 = vor.u32 %v778_v62, %v775_v61  ;;  %v854_v5 = vsel %vm851_vm3, %v852_v63, %v853_v0 }
  0x21   : > { %v780_v4 = vsel %vm666_vm2, %v771_v2, %v779_v3 }
  0x22   : > { %1167 = vmatmul.mubr.msk.bf16.vlgmr.msra.gmra.mrb[8].mxu0 %vm201_vm0, %v1218_v33  ;;  %1173 = vmatmul.mubr.msk.bf16.vlgmr.msra.gmra.mrb[8].mxu1 %vm201_vm0, %v585_v45 }
  0x23   : > { %1177 = vmatpush3.bf16.msra.mxu0 %v1217_v21  ;;  %1183 = vmatpush3.bf16.msra.mxu1 %v1220_v30 }
  0x24   : > { %1188 = vmatprep.subr.bf16.mxu0 %v1223_v41  ;;  %1178 = vmatprep.mubr.msk.bf16.mxu0 %vm201_vm0, %v683_v1 }
  0x25   : > { %1184 = vmatprep.mubr.msk.bf16.mxu1 %vm201_vm0, %v780_v4 }
  0x2a   : > { %1179 = vmatmul.mubr.msk.bf16.vlgmr.msra.gmra.mrb[12].mxu0 %vm201_vm0, %v682_v58  ;;  %1185 = vmatmul.mubr.msk.bf16.vlgmr.msra.gmra.mrb[12].mxu1 %vm201_vm0, %v779_v3 }
  0x2b   : > { %1189 = vmatpush3.bf16.msra.mxu0 %v1223_v41  ;;  %1190 = vmatprep.mubr.msk.bf16.mxu0 %vm201_vm0, %v854_v5  ;;  %v1102_v5 = vld [vmem:[%s1354_s2 + $0x1] ss:$0 sm:$0xff] }
  0x32   : > { %1191 = vmatmul.mubr.msk.bf16.vlgmr.msra.gmra.mrb[16].mxu0 %vm201_vm0, %v853_v0 }
  0xe5   : > { %v1144_v6 = vpop.f32.mrb[0].mxu0  ;;  %v1150_v8 = vpop.f32.mrb[0].mxu1 }
  0xe6   : > { %v242_v7 = vpop.f32.mrb[1].mxu0  ;;  %v319_v10 = vadd.f32 %v1150_v8, %v1144_v6  ;;  %v310_v11 = vpop.f32.mrb[1].mxu1 }
  0xe7   : > { %v1145_v9 = vpop.f32.mrb[2].mxu0  ;;  %v311_v13 = vadd.f32 %v310_v11, %v242_v7  ;;  %v1151_v14 = vpop.f32.mrb[2].mxu1 }
  0xe8   : > { %v245_v12 = vpop.f32.mrb[3].mxu0  ;;  %v313_v15 = vpop.f32.mrb[3].mxu1  ;;  %v1103_v9 = vld [vmem:[%s1354_s2 + $0x2] ss:$0 sm:$0xff] }
  0xe9   : > { %v314_v16 = vadd.f32 %v313_v15, %v245_v12 }
  0xed   : > { %v1156_v17 = vpop.f32.mrb[4].mxu0  ;;  %v1162_v22 = vpop.f32.mrb[4].mxu1 }
  0xee   : > { %v408_v18 = vadd.f32 %v1156_v17, %v319_v10  ;;  %v392_v19 = vpop.f32.mrb[5].mxu0  ;;  %v470_v25 = vpop.f32.mrb[5].mxu1 }
  0xef   : > { %v406_v20 = vadd.f32 %v392_v19, %v311_v13  ;;  %v1157_v21 = vpop.f32.mrb[6].mxu0  ;;  %v1163_v28 = vpop.f32.mrb[6].mxu1 }
  0xf0   : > { %v486_v23 = vadd.f32 %v1162_v22, %v408_v18  ;;  %v395_v24 = vpop.f32.mrb[7].mxu0  ;;  %v473_v29 = vpop.f32.mrb[7].mxu1 }
  0xf1   : > { %v407_v26 = vadd.f32 %v395_v24, %v314_v16  ;;  %v484_v27 = vadd.f32 %v470_v25, %v406_v20 }
  0xf3   : > { %v485_v30 = vadd.f32 %v473_v29, %v407_v26 }
  0xf5   : > { %v1168_v31 = vpop.f32.mrb[8].mxu0  ;;  %v1174_v36 = vpop.f32.mrb[8].mxu1 }
  0xf6   : > { %v564_v32 = vadd.f32 %v1168_v31, %v486_v23  ;;  %v548_v33 = vpop.f32.mrb[9].mxu0  ;;  %v632_v39 = vpop.f32.mrb[9].mxu1 }
  0xf7   : > { %v562_v34 = vadd.f32 %v548_v33, %v484_v27  ;;  %v1169_v35 = vpop.f32.mrb[10].mxu0  ;;  %v1175_v42 = vpop.f32.mrb[10].mxu1 }
  0xf8   : > { %v648_v37 = vadd.f32 %v1174_v36, %v564_v32  ;;  %v551_v38 = vpop.f32.mrb[11].mxu0  ;;  %v635_v43 = vpop.f32.mrb[11].mxu1 }
  0xf9   : > { %v563_v40 = vadd.f32 %v551_v38, %v485_v30  ;;  %v646_v41 = vadd.f32 %v632_v39, %v562_v34 }
  0xfb   : > { %v647_v44 = vadd.f32 %v635_v43, %v563_v40 }
  0xfd   : > { %v1180_v45 = vpop.f32.mrb[12].mxu0  ;;  %v1186_v50 = vpop.f32.mrb[12].mxu1 }
  0xfe   : > { %v746_v46 = vadd.f32 %v1180_v45, %v648_v37  ;;  %v730_v47 = vpop.f32.mrb[13].mxu0  ;;  %v827_v53 = vpop.f32.mrb[13].mxu1 }
  0xff   : > { %v744_v48 = vadd.f32 %v730_v47, %v646_v41  ;;  %v1181_v49 = vpop.f32.mrb[14].mxu0  ;;  %v1187_v56 = vpop.f32.mrb[14].mxu1 }
 0x100   : > { %v843_v51 = vadd.f32 %v1186_v50, %v746_v46  ;;  %v733_v52 = vpop.f32.mrb[15].mxu0  ;;  %v830_v57 = vpop.f32.mrb[15].mxu1 }
 0x101   : > { %v745_v54 = vadd.f32 %v733_v52, %v647_v44  ;;  %v841_v55 = vadd.f32 %v827_v53, %v744_v48 }
 0x103   : > { %v842_v58 = vadd.f32 %v830_v57, %v745_v54 }
 0x105   : > { %v1192_v60 = vpop.f32.mrb[16].mxu0 }
 0x106   : > { %v917_v61 = vadd.f32 %v1192_v60, %v843_v51  ;;  %v901_v62 = vpop.f32.mrb[17].mxu0 }
 0x107   : > { %v915_v63 = vadd.f32 %v901_v62, %v841_v55  ;;  %v1193_v0 = vpop.f32.mrb[18].mxu0 }
 0x108   : > { %v924_v1 = vadd.f32 %v1101_v59, %v917_v61  ;;  %v904_v2 = vpop.f32.mrb[19].mxu0 }
 0x109   : > { %v922_v3 = vadd.f32 %v1101_v59, %v915_v63  ;;  %v916_v4 = vadd.f32 %v904_v2, %v842_v58 }
 0x10a   : > { %vm927_vm4 = vcmp.gt.f32.partialorder %v924_v1, 0.0  ;;  %v930_v6 = vmul.f32 0.2, %v924_v1 }
 0x10b   : > { %vm925_vm5 = vcmp.gt.f32.partialorder %v922_v3, 0.0  ;;  %v928_v7 = vmul.f32 0.2, %v922_v3  ;;  %v923_v8 = vadd.f32 %v1101_v59, %v916_v4 }
 0x10c   : > { %v933_v10 = vsel %vm927_vm4, %v924_v1, %v930_v6 }
 0x10d   : > { %v940_v11 = vmul.f32 %v1102_v5, %v933_v10  ;;  %v931_v12 = vsel %vm925_vm5, %v922_v3, %v928_v7  ;;  %vm926_vm6 = vcmp.gt.f32.partialorder %v923_v8, 0.0  ;;  %v929_v13 = vmul.f32 0.2, %v923_v8 }
 0x10e   : > { %v938_v14 = vmul.f32 %v1102_v5, %v931_v12 }
 0x10f   : > { %v947_v15 = vadd.f32 %v1103_v9, %v940_v11  ;;  %v932_v16 = vsel %vm926_vm6, %v923_v8, %v929_v13 }
 0x110   : > { %v945_v17 = vadd.f32 %v1103_v9, %v938_v14  ;;  %v939_v18 = vmul.f32 %v1102_v5, %v932_v16 }
 0x111   : > { %v1112_v19 = vpack.c.bf16 %v947_v15, %v947_v15 }
 0x112   : > { %v1110_v20 = vpack.c.bf16 %v945_v17, %v945_v17  ;;  %v946_v21 = vadd.f32 %v1103_v9, %v939_v18 }
 0x113   : > { %965 = vst.msk [vmem:[%s170_s20 + $0x8] sm:$0x3] %vm964_vm7, %v1112_v19 }
 0x114   : > { %962 = vst.msk [vmem:[%s170_s20] sm:$0xf] %vm961_vm8, %v1110_v20  ;;  %v1111_v22 = vpack.c.bf16 %v946_v21, %v946_v21 }
 0x116   : > { %963 = vst.msk [vmem:[%s170_s20 + $0x4] sm:$0xf] %vm961_vm8, %v1111_v22 }
 0x117 PF: > { %s13_s12 = sadd.s32 1, %s1233_s12  }
 0x118   : > { %p10_p4 = scmp.ge.s32.totalorder %s13_s12, 4  }
 0x11a   :  { %12 = sbr.rel (!%p10_p4) target bundleno = 1 (0x1), region = 73 }

// kernel: discriminator_forward.6
= control target key start
LH: loop header
LB: loop body
LE: loop exit
PB: predicated region body
PF: predicated region fallthrough
CT: control target
= control target key end

     0   :  { %s1104_s12 = smov 0   ;;  %s1245_s0 = inlined_call_operand.vmem [shape: bf16[2,4,16,32], index: 0, kind: input, shape index: {}]   ;;  %s1246_s1 = inlined_call_operand.vmem [shape: bf16[9,32,64], index: 1, kind: input, shape index: {}]   ;;  %s1247_s2 = inlined_call_operand.vmem [shape: f32[3,64], index: 2, kind: input, shape index: {}]   ;;  %s1248_s3 = inlined_call_operand.vmem [shape: bf16[2,6,64], index: 3, kind: output, shape index: {}]  }
   0x1 LB: > { %s858_s13 = sadd.s32 4294967295, %s1080_s12   ;;  %p862_p0 = scmp.ge.s32.totalorder %s1080_s12, 1  ;;  %s1080_s12 = sphi %s1104_s12, %s13_s12  }
   0x2   : > { %p137_p1 = scmp.lt.s32.totalorder %s1080_s12, 3 }
   0x4   : > { %p138_p2 = pnand %p862_p0, %p137_p1 }
   0x5   : > { %v1051_v0 = vld [vmem:[%s1246_s1 + $0x10] sm:$0xff] (!%p138_p2)   ;;  %v1082_v1 = vmov (!%p138_p2), 0.0   ;;  %v1052_v2 = vld [vmem:[%s1246_s1] sm:$0xff] (!%p138_p2)   ;;  %v1053_v3 = vld [vmem:[%s1246_s1 + $0x18] sm:$0xff] (!%p138_p2)   ;;  %vm1083_vm0 = vmmov (!%p138_p2), 0   ;;  %p160_p3 = scmp.lt.s32.totalorder (!%p138_p2), %s858_s13, 1 }
   0x6   : > { %141 = sbr.rel (%p138_p2) target bundleno = 275 (0x113), region = 32  ;;  %969 = vmatprep.subr.bf16.mxu0 (!%p138_p2), %v1082_v1  ;;  %977 = vmatprep.subr.bf16.mxu1 (!%p138_p2), %v1082_v1  ;;  %v1054_v4 = vld [vmem:[%s1246_s1 + $0x8] sm:$0xff] (!%p138_p2)   ;;  %vm197_vm1 = vcmask (!%p138_p2), 261120   ;;  %v1055_v5 = vld [vmem:[%s1246_s1 + $0x20] sm:$0xff] (!%p138_p2)   ;;  %v1056_v6 = vld [vmem:[%s1246_s1 + $0x30] sm:$0xff] (!%p138_p2)   ;;  %vm803_vm3 = vcmask (!%p138_p2), 518144  }
   0x7   : > { %970 = vmatpush3.bf16.msra.mxu0 (!%p138_p2), %v1051_v0  ;;  %973 = vmatprep.mubr.msk.bf16.mxu0 (!%p138_p2), %vm1083_vm0, %v1082_v1  ;;  %v1057_v10 = vld [vmem:[%s1246_s1 + $0x28] sm:$0xff] (!%p138_p2)   ;;  %v1058_v11 = vld [vmem:[%s1246_s1 + $0x38] sm:$0xff] (!%p138_p2)   ;;  %v1060_v15 = vld [vmem:[%s1246_s1 + $0x40] sm:$0xff] (!%p138_p2)  }
   0x8   : > { %978 = vmatpush3.bf16.msra.mxu1 (!%p138_p2), %v1052_v2  ;;  %971 = vmatprep.subr.bf16.mxu0 (!%p138_p2), %v1082_v1  ;;  %v1061_v17 = vld [vmem:[%s1246_s1 + $0x50] sm:$0xff] (!%p138_p2)   ;;  %v1062_v20 = vld [vmem:[%s1246_s1 + $0x48] sm:$0xff] (!%p138_p2)   ;;  %v1063_v24 = vld [vmem:[%s1246_s1 + $0x58] sm:$0xff] (!%p138_p2)  }
   0x9   : > { %979 = vmatprep.subr.bf16.mxu1 (!%p138_p2), %v1082_v1  ;;  %981 = vmatprep.mubr.msk.bf16.mxu1 (!%p138_p2), %vm1083_vm0, %v1082_v1  ;;  %v1064_v30 = vld [vmem:[%s1246_s1 + $0x60] sm:$0xff] (!%p138_p2)   ;;  %v1066_v34 = vld [vmem:[%s1246_s1 + $0x70] sm:$0xff] (!%p138_p2)   ;;  %v1067_v39 = vld [vmem:[%s1246_s1 + $0x68] sm:$0xff] (!%p138_p2)  }
   0xa   : > { %v1068_v42 = vld [vmem:[%s1246_s1 + $0x78] sm:$0xff] (!%p138_p2)   ;;  %v1070_v44 = vld [vmem:[%s1246_s1 + $0x80] sm:$0xff] (!%p138_p2)   ;;  %v1072_v48 = vld [vmem:[%s1246_s1 + $0x88] sm:$0xff] (!%p138_p2)  }
   0xb   : > { %972 = vmatpush3.bf16.msra.mxu0 (!%p138_p2), %v1053_v3 }
   0xc   : > { %980 = vmatpush3.bf16.msra.mxu1 (!%p138_p2), %v1054_v4  ;;  %985 = vmatprep.subr.bf16.mxu0 (!%p138_p2), %v1082_v1 }
   0xd   : > { %s1250_s13 = smov (!%p160_p3, %s858_s13), 1  ;;  %993 = vmatprep.subr.bf16.mxu1 %v1082_v1 }
   0xe   : > { %s941_s22 = sshll.u32 %s1250_s13, 5  ;;  %s865_s8 = sshll.u32 %s1250_s13, 2 }
   0xf   : > { %s1141_s27 = scalar_lea.vmem %s1245_s0, %s941_s22  ;;  %s168_s11 = scalar_lea.vmem %s1248_s3, %s865_s8 }
  0x10   : > { %v866_v7 = vld [vmem:[%s1141_s27 + $0x8] sm:$0x7]  ;;  %v173_v8 = vld [vmem:[%s1141_s27] sm:$0x7]  ;;  %v885_v16 = vld [vmem:[%s1141_s27 + $0x10] sm:$0x7] }
  0x11   : > { %974 = vmatmul.mubr.msk.bf16.vlgmr.msra.gmra.mrb[0].mxu0 %vm197_vm1, %v866_v7  ;;  %v1059_v9 = vld [vmem:[%s1141_s27] ss:$0 sps:$4 sm:$0xff]   ;;  %982 = vmatmul.mubr.msk.bf16.vlgmr.msra.gmra.mrb[0].mxu1 %vm197_vm1, %v173_v8  ;;  %v1065_v19 = vld [vmem:[%s1141_s27 + $0x10] ss:$0 sps:$4 sm:$0xff]   ;;  %v566_v23 = vld [vmem:[%s1141_s27] sm:$0xe] }
  0x12   : > { %986 = vmatpush3.bf16.msra.mxu0 %v1055_v5  ;;  %994 = vmatpush3.bf16.msra.mxu1 %v1056_v6  ;;  %v306_v12 = vshrl.u32 %v1059_v9, 16  ;;  %v308_v13 = vshll.u32 %v1059_v9, 16  ;;  %v504_v21 = vshrl.u32 %v1065_v19, 16  ;;  %v506_v22 = vshll.u32 %v1065_v19, 16  ;;  %v567_v26 = vld [vmem:[%s1141_s27 + $0x4] sm:$0x1] }
  0x13   : > { %987 = vmatprep.subr.bf16.mxu0 %v1082_v1  ;;  %995 = vmatprep.subr.bf16.mxu1 %v1082_v1  ;;  %v914_v27 = vcombine.low %v566_v23, %v567_v26  ;;  %v1071_v28 = vld [vmem:[%s1141_s27 + $0x8] sm:$0x1e]   ;;  %v893_v29 = vld [vmem:[%s1141_s27 + $0x18] sm:$0x7]  ;;  %v718_v46 = vld [vmem:[%s1141_s27] sm:$0xc] }
  0x14   : > { %989 = vmatprep.mubr.msk.bf16.mxu0 %vm1083_vm0, %v1082_v1  ;;  %v310_v14 = vrot.slane %v308_v13, 1  ;;  %997 = vmatprep.mubr.msk.bf16.mxu1 %vm1083_vm0, %v1082_v1  ;;  %v508_v25 = vrot.slane %v506_v22, 1  ;;  %v655_v35 = vshrl.u32 %v1071_v28, 16  ;;  %v658_v36 = vshll.u32 %v1071_v28, 16 }
  0x15   : > { %v579_v32 = vshrl.u32 %v914_v27, 16  ;;  %v582_v33 = vshll.u32 %v914_v27, 16  ;;  %v932_v47 = vcombine.low %v718_v46, %v567_v26 }
  0x16   : > { %988 = vmatpush3.bf16.msra.mxu0 %v1057_v10  ;;  %996 = vmatpush3.bf16.msra.mxu1 %v1058_v11  ;;  %v311_v18 = vor.u32 %v310_v14, %v306_v12  ;;  %v509_v31 = vor.u32 %v508_v25, %v504_v21  ;;  %v657_v40 = vrot.slane %v655_v35, 1  ;;  %v660_v41 = vrot.slane %v658_v36, 2  ;;  %v936_v25 = vld [vmem:[%s1247_s2] ss:$0 sm:$0xff] }
  0x17   : > { %1001 = vmatprep.subr.bf16.mxu0 %v1082_v1  ;;  %1009 = vmatprep.subr.bf16.mxu1 %v1082_v1  ;;  %v581_v37 = vrot.slane %v579_v32, 1  ;;  %v584_v38 = vrot.slane %v582_v33, 2  ;;  %v727_v49 = vrot.slane %v932_v47, 2  ;;  %v937_v32 = vld [vmem:[%s1247_s2 + $0x1] ss:$0 sm:$0xff] }
  0x18   : > { %v661_v45 = vor.u32 %v660_v41, %v657_v40 }
  0x19   : > { %990 = vmatmul.mubr.msk.bf16.vlgmr.msra.gmra.mrb[4].mxu0 %vm197_vm1, %v311_v18  ;;  %998 = vmatmul.mubr.msk.bf16.vlgmr.msra.gmra.mrb[4].mxu1 %vm197_vm1, %v885_v16  ;;  %v585_v43 = vor.u32 %v584_v38, %v581_v37 }
  0x1a   : > { %1002 = vmatpush3.bf16.msra.mxu0 %v1060_v15  ;;  %1010 = vmatpush3.bf16.msra.mxu1 %v1061_v17 }
  0x1b   : > { %1003 = vmatprep.subr.bf16.mxu0 %v1082_v1  ;;  %1011 = vmatprep.subr.bf16.mxu1 %v1082_v1 }
  0x1c   : > { %1005 = vmatprep.mubr.msk.bf16.mxu0 %vm1083_vm0, %v1082_v1  ;;  %1013 = vmatprep.mubr.msk.bf16.mxu1 %vm1083_vm0, %v1082_v1 }
  0x1e   : > { %1004 = vmatpush3.bf16.msra.mxu0 %v1062_v20  ;;  %1012 = vmatpush3.bf16.msra.mxu1 %v1063_v24 }
  0x1f   : > { %1017 = vmatprep.subr.bf16.mxu0 %v1082_v1  ;;  %1025 = vmatprep.subr.bf16.mxu1 %v1082_v1 }
  0x21   : > { %1006 = vmatmul.mubr.msk.bf16.vlgmr.msra.gmra.mrb[8].mxu0 %vm197_vm1, %v893_v29  ;;  %1014 = vmatmul.mubr.msk.bf16.vlgmr.msra.gmra.mrb[8].mxu1 %vm197_vm1, %v509_v31 }
  0x22   : > { %1018 = vmatpush3.bf16.msra.mxu0 %v1064_v30  ;;  %1026 = vmatpush3.bf16.msra.mxu1 %v1066_v34  ;;  %v938_v34 = vld [vmem:[%s1247_s2 + $0x2] ss:$0 sm:$0xff] }
  0x23   : > { %1019 = vmatprep.subr.bf16.mxu0 %v1082_v1  ;;  %1027 = vmatprep.subr.bf16.mxu1 %v1082_v1 }
  0x24   : > { %1021 = vmatprep.mubr.msk.bf16.mxu0 %vm1083_vm0, %v1082_v1  ;;  %1029 = vmatprep.mubr.msk.bf16.mxu1 %vm1083_vm0, %v1082_v1 }
  0x26   : > { %1020 = vmatpush3.bf16.msra.mxu0 %v1067_v39  ;;  %1028 = vmatpush3.bf16.msra.mxu1 %v1068_v42 }
  0x27   : > { %1033 = vmatprep.subr.bf16.mxu0 %v1082_v1 }
  0x29   : > { %1022 = vmatmul.mubr.msk.bf16.vlgmr.msra.gmra.mrb[12].mxu0 %vm197_vm1, %v585_v43  ;;  %1030 = vmatmul.mubr.msk.bf16.vlgmr.msra.gmra.mrb[12].mxu1 %vm197_vm1, %v661_v45 }
  0x2a   : > { %1034 = vmatpush3.bf16.msra.mxu0 %v1070_v44  ;;  %1037 = vmatprep.mubr.msk.bf16.mxu0 %vm1083_vm0, %v1082_v1 }
  0x2b   : > { %1035 = vmatprep.subr.bf16.mxu0 %v1082_v1 }
  0x2e   : > { %1036 = vmatpush3.bf16.msra.mxu0 %v1072_v48 }
  0x31   : > { %1038 = vmatmul.mubr.msk.bf16.vlgmr.msra.gmra.mrb[16].mxu0 %vm197_vm1, %v727_v49 }
  0xe4   : > { %v235_v50 = vpop.f32.mrb[0].mxu0  ;;  %v290_v52 = vpop.f32.mrb[0].mxu1 }
  0xe5   : > { %v975_v51 = vpop.f32.mrb[1].mxu0  ;;  %v291_v53 = vadd.f32 %v290_v52, %v235_v50  ;;  %v983_v55 = vpop.f32.mrb[1].mxu1 }
  0xe6   : > { %v238_v54 = vpop.f32.mrb[2].mxu0  ;;  %v293_v57 = vpop.f32.mrb[2].mxu1 }
  0xe7   : > { %v976_v56 = vpop.f32.mrb[3].mxu0  ;;  %v984_v58 = vpop.f32.mrb[3].mxu1 }
  0xec   : > { %v361_v59 = vpop.f32.mrb[4].mxu0  ;;  %v424_v62 = vpop.f32.mrb[4].mxu1 }
  0xed   : > { %v367_v60 = vadd.f32 %v361_v59, %v291_v53  ;;  %v991_v61 = vpop.f32.mrb[5].mxu0  ;;  %v999_v0 = vpop.f32.mrb[5].mxu1 }
  0xee   : > { %v364_v63 = vpop.f32.mrb[6].mxu0  ;;  %v427_v3 = vpop.f32.mrb[6].mxu1 }
  0xef   : > { %v430_v1 = vadd.f32 %v424_v62, %v367_v60  ;;  %v992_v2 = vpop.f32.mrb[7].mxu0  ;;  %v1000_v4 = vpop.f32.mrb[7].mxu1 }
  0xf4   : > { %v487_v5 = vpop.f32.mrb[8].mxu0  ;;  %v559_v8 = vpop.f32.mrb[8].mxu1 }
  0xf5   : > { %v493_v6 = vadd.f32 %v487_v5, %v430_v1  ;;  %v1007_v7 = vpop.f32.mrb[9].mxu0  ;;  %v1015_v10 = vpop.f32.mrb[9].mxu1 }
  0xf6   : > { %v490_v9 = vpop.f32.mrb[10].mxu0  ;;  %v562_v13 = vpop.f32.mrb[10].mxu1 }
  0xf7   : > { %v565_v11 = vadd.f32 %v559_v8, %v493_v6  ;;  %v1008_v12 = vpop.f32.mrb[11].mxu0  ;;  %v1016_v14 = vpop.f32.mrb[11].mxu1 }
  0xfc   : > { %v635_v15 = vpop.f32.mrb[12].mxu0  ;;  %v711_v18 = vpop.f32.mrb[12].mxu1 }
  0xfd   : > { %v641_v16 = vadd.f32 %v635_v15, %v565_v11  ;;  %v1023_v17 = vpop.f32.mrb[13].mxu0  ;;  %v1031_v20 = vpop.f32.mrb[13].mxu1 }
  0xfe   : > { %v638_v19 = vpop.f32.mrb[14].mxu0  ;;  %v714_v23 = vpop.f32.mrb[14].mxu1 }
  0xff   : > { %v717_v21 = vadd.f32 %v711_v18, %v641_v16  ;;  %v1024_v22 = vpop.f32.mrb[15].mxu0  ;;  %v1032_v24 = vpop.f32.mrb[15].mxu1 }
 0x104   : > { %v777_v26 = vpop.f32.mrb[16].mxu0 }
 0x105   : > { %v783_v27 = vadd.f32 %v777_v26, %v717_v21  ;;  %v1039_v28 = vpop.f32.mrb[17].mxu0 }
 0x106   : > { %v780_v29 = vpop.f32.mrb[18].mxu0 }
 0x107   : > { %v788_v30 = vadd.f32 %v936_v25, %v783_v27  ;;  %v1040_v31 = vpop.f32.mrb[19].mxu0 }
 0x109   : > { %vm789_vm2 = vcmp.gt.f32.partialorder %v788_v30, 0.0  ;;  %v790_v33 = vmul.f32 0.2, %v788_v30 }
 0x10b   : > { %v791_v35 = vsel %vm789_vm2, %v788_v30, %v790_v33 }
 0x10c   : > { %v796_v36 = vmul.f32 %v937_v32, %v791_v35 }
 0x10e   : > { %v801_v37 = vadd.f32 %v938_v34, %v796_v36 }
 0x110   : > { %v802_v38 = vpack.c.bf16 %v801_v37, %v801_v37 }
 0x112   : > { %804 = vst.msk [vmem:[%s168_s11] sm:$0x7] %vm803_vm3, %v802_v38 }
 0x113 PF: > { %s13_s12 = sadd.s32 1, %s1080_s12  }
 0x114   : > { %p10_p4 = scmp.ge.s32.totalorder %s13_s12, 4  }
 0x116   :  { %12 = sbr.rel (!%p10_p4) target bundleno = 1 (0x1), region = 73 }

// kernel: discriminator_forward.7
= control target key start
LH: loop header
LB: loop body
LE: loop exit
PB: predicated region body
PF: predicated region fallthrough
CT: control target
= control target key end

     0   :  { %v2139_v0 = vmov 0.0   ;;  %vm2140_vm0 = vmmov 0   ;;  %vm73_vm1 = vcmask 523264   ;;  %vm770_vm3 = vcmask 1041408   ;;  %s2602_s1 = inlined_call_operand.vmem [shape: bf16[9,64,128], index: 1, kind: input, shape index: {}]   ;;  %s2603_s0 = inlined_call_operand.vmem [shape: bf16[2,4,8,64], index: 0, kind: input, shape index: {}]   ;;  %s2604_s4 = inlined_call_operand.<no memory space> [shape: f32[1,1], index: 4, kind: input, shape index: {}]   ;;  %s2605_s2 = inlined_call_operand.vmem [shape: f32[3,128], index: 2, kind: input, shape index: {}]   ;;  %s2606_s3 = inlined_call_operand.vmem [shape: f32[2,128], index: 3, kind: input, shape index: {}]   ;;  %s2607_s5 = inlined_call_operand.vmem [shape: f32[2,1], index: 5, kind: output, shape index: {}]  }
   0x1   :  { %1843 = vmatprep.subr.bf16.mxu0 %v2139_v0  ;;  %1855 = vmatprep.subr.bf16.mxu1 %v2139_v0  ;;  %v2061_v1 = vld [vmem:[%s2602_s1 + $0x20] sm:$0xff]   ;;  %v2063_v3 = vld [vmem:[%s2602_s1 + $0x28] sm:$0xff]   ;;  %v2065_v5 = vld [vmem:[%s2602_s1 + $0x30] sm:$0xff]   ;;  %vm782_vm5 = vcmask 0  }
   0x2   :  { %v2062_v2 = vld [vmem:[%s2602_s1] sm:$0xff]   ;;  %1851 = vmatprep.mubr.msk.bf16.mxu0 %vm2140_vm0, %v2139_v0  ;;  %1863 = vmatprep.mubr.msk.bf16.mxu1 %vm2140_vm0, %v2139_v0  ;;  %v2064_v4 = vld [vmem:[%s2602_s1 + $0x8] sm:$0xff]   ;;  %v2066_v6 = vld [vmem:[%s2602_s1 + $0x10] sm:$0xff]  }
   0x3   :  { %1844 = vmatpush3.bf16.msra.mxu0 %v2061_v1  ;;  %1856 = vmatpush3.bf16.msra.mxu1 %v2062_v2  ;;  %v2067_v7 = vld [vmem:[%s2602_s1 + $0x38] sm:$0xff]   ;;  %v2210_v9 = vld [vmem:[%s2603_s0 + $0x4] sm:$0xf]  ;;  %v28_v10 = vld [vmem:[%s2603_s0] sm:$0xf] }
   0x4   :  { %1845 = vmatprep.subr.bf16.mxu0 %v2139_v0  ;;  %1857 = vmatprep.subr.bf16.mxu1 %v2139_v0  ;;  %v2068_v8 = vld [vmem:[%s2602_s1 + $0x18] sm:$0xff]   ;;  %v2071_v11 = vld [vmem:[%s2602_s1 + $0x40] sm:$0xff]   ;;  %v2225_v13 = vcombine.low %v28_v10, %v28_v10  ;;  %v2073_v14 = vld [vmem:[%s2602_s1 + $0x48] sm:$0xff]   ;;  %v1615_v45 = vcombine.low %v2210_v9, %v2210_v9 }
   0x5   :  { %v2072_v12 = vld [vmem:[%s2602_s1 + $0x60] sm:$0xff]   ;;  %v2074_v15 = vld [vmem:[%s2602_s1 + $0x68] sm:$0xff]   ;;  %v2075_v17 = vld [vmem:[%s2602_s1 + $0x50] sm:$0xff]  }
   0x6   :  { %v199_v16 = vshll.u32 %v2225_v13, 16  ;;  %v2076_v18 = vld [vmem:[%s2602_s1 + $0x70] sm:$0xff]   ;;  %v197_v19 = vshrl.u32 %v2225_v13, 16  ;;  %v2077_v21 = vld [vmem:[%s2602_s1 + $0x58] sm:$0xff]   ;;  %v30_v24 = vld [vmem:[%s2603_s0 + $0x8] sm:$0xf] }
   0x7   :  { %1846 = vmatpush3.bf16.msra.mxu0 %v2063_v3  ;;  %1858 = vmatpush3.bf16.msra.mxu1 %v2064_v4  ;;  %v2078_v22 = vld [vmem:[%s2602_s1 + $0x78] sm:$0xff]   ;;  %v2080_v25 = vld [vmem:[%s2602_s1 + $0x80] sm:$0xff]   ;;  %v1588_v27 = vcombine.low %v30_v24, %v30_v24  ;;  %v2082_v28 = vld [vmem:[%s2602_s1 + $0x88] sm:$0xff]   ;;  %v521_v48 = vrot.slane %v2225_v13, 1  ;;  %v602_v49 = vrot.slane %v1615_v45, 1 }
   0x8   :  { %1847 = vmatprep.subr.bf16.mxu0 %v2139_v0  ;;  %1859 = vmatprep.subr.bf16.mxu1 %v2139_v0  ;;  %v201_v20 = vrot.slane %v199_v16, 1  ;;  %v2081_v26 = vld [vmem:[%s2602_s1 + $0xa0] sm:$0xff]   ;;  %v2083_v29 = vld [vmem:[%s2602_s1 + $0xa8] sm:$0xff]   ;;  %v2084_v31 = vld [vmem:[%s2602_s1 + $0x90] sm:$0xff]   ;;  %v680_v56 = vrot.slane %v197_v19, 1  ;;  %v681_v57 = vrot.slane %v199_v16, 2 }
   0x9   :  { %v440_v30 = vshll.u32 %v1588_v27, 16  ;;  %v2085_v32 = vld [vmem:[%s2602_s1 + $0xb0] sm:$0xff]   ;;  %v438_v33 = vshrl.u32 %v1588_v27, 16  ;;  %v2086_v35 = vld [vmem:[%s2602_s1 + $0x98] sm:$0xff]   ;;  %v31_v37 = vld [vmem:[%s2603_s0 + $0xc] sm:$0xf] }
   0xa   :  { %v202_v23 = vor.u32 %v201_v20, %v197_v19  ;;  %v2087_v36 = vld [vmem:[%s2602_s1 + $0xb8] sm:$0xff]   ;;  %v2088_v39 = vld [vmem:[%s2602_s1 + $0xc0] sm:$0xff]   ;;  %v2090_v41 = vld [vmem:[%s2602_s1 + $0xc8] sm:$0xff]   ;;  %v682_v60 = vor.u32 %v681_v57, %v680_v56 }
   0xb   :  { %1848 = vmatpush3.bf16.msra.mxu0 %v2065_v5  ;;  %1860 = vmatpush3.bf16.msra.mxu1 %v2066_v6  ;;  %v442_v34 = vrot.slane %v440_v30, 1  ;;  %v2089_v40 = vld [vmem:[%s2602_s1 + $0xe0] sm:$0xff]   ;;  %v2091_v42 = vld [vmem:[%s2602_s1 + $0xe8] sm:$0xff]   ;;  %v2092_v43 = vld [vmem:[%s2602_s1 + $0xd0] sm:$0xff]  }
   0xc   :  { %1849 = vmatprep.subr.bf16.mxu0 %v2139_v0  ;;  %1861 = vmatprep.subr.bf16.mxu1 %v2139_v0  ;;  %v2093_v44 = vld [vmem:[%s2602_s1 + $0xf0] sm:$0xff]   ;;  %v2094_v46 = vld [vmem:[%s2602_s1 + $0xd8] sm:$0xff]   ;;  %v2096_v50 = vld [vmem:[%s2602_s1 + $0x100] sm:$0xff]  }
   0xd   :  { %v443_v38 = vor.u32 %v442_v34, %v438_v33  ;;  %v2095_v47 = vld [vmem:[%s2602_s1 + $0xf8] sm:$0xff]   ;;  %v2097_v51 = vld [vmem:[%s2602_s1 + $0x20] sm:$0xff]   ;;  %v2098_v52 = vld [vmem:[%s2602_s1 + $0x108] sm:$0xff]  }
   0xe   :  { %v2099_v53 = vld [vmem:[%s2602_s1 + $0x28] sm:$0xff]   ;;  %v2100_v54 = vld [vmem:[%s2602_s1 + $0x110] sm:$0xff]   ;;  %v2102_v58 = vld [vmem:[%s2602_s1 + $0x118] sm:$0xff]  }
   0xf   :  { %1850 = vmatpush3.bf16.msra.mxu0 %v2067_v7  ;;  %1862 = vmatpush3.bf16.msra.mxu1 %v2068_v8  ;;  %v2101_v55 = vld [vmem:[%s2602_s1 + $0x30] sm:$0xff]   ;;  %v2103_v59 = vld [vmem:[%s2602_s1 + $0x38] sm:$0xff]   ;;  %v2105_v61 = vld [vmem:[%s2602_s1] sm:$0xff]  }
  0x10   :  { %1867 = vmatprep.subr.bf16.mxu0 %v2139_v0  ;;  %1879 = vmatprep.subr.bf16.mxu1 %v2139_v0  ;;  %v2395_v62 = vld [vmem:[%s2603_s0 + $0x14] sm:$0xf]  ;;  %v2106_v63 = vld [vmem:[%s2602_s1 + $0x40] sm:$0xff]   ;;  %v1637_v1 = vld [vmem:[%s2603_s0 + $0x10] sm:$0xf] }
  0x11   :  { %v2107_v2 = vld [vmem:[%s2602_s1 + $0x8] sm:$0xff]   ;;  %v2411_v3 = vcombine.low %v1637_v1, %v1637_v1  ;;  %v2109_v5 = vld [vmem:[%s2602_s1 + $0x10] sm:$0xff]   ;;  %v2111_v8 = vld [vmem:[%s2602_s1 + $0x18] sm:$0xff]  }
  0x12   :  { %1852 = vmatmul.mubr.msk.bf16.vlgmr.msra.gmra.mrb[0].mxu0 %vm73_vm1, %v2210_v9  ;;  %1864 = vmatmul.mubr.msk.bf16.vlgmr.msra.gmra.mrb[0].mxu1 %vm73_vm1, %v28_v10  ;;  %v2108_v4 = vld [vmem:[%s2602_s1 + $0x48] sm:$0xff]   ;;  %v2110_v7 = vld [vmem:[%s2602_s1 + $0x50] sm:$0xff]   ;;  %v2114_v13 = vld [vmem:[%s2602_s1 + $0x60] sm:$0xff]  }
  0x13   :  { %1868 = vmatpush3.bf16.msra.mxu0 %v2071_v11  ;;  %1880 = vmatpush3.bf16.msra.mxu1 %v2072_v12  ;;  %v953_v6 = vshll.u32 %v2411_v3, 16  ;;  %v951_v9 = vshrl.u32 %v2411_v3, 16  ;;  %v2112_v11 = vld [vmem:[%s2602_s1 + $0x58] sm:$0xff]   ;;  %v2117_v16 = vld [vmem:[%s2602_s1 + $0x88] sm:$0xff]   ;;  %v2128_v30 = vld [vmem:[%s2602_s1 + $0xd0] sm:$0xff]  }
  0x14   :  { %1869 = vmatprep.subr.bf16.mxu0 %v2139_v0  ;;  %1881 = vmatprep.subr.bf16.mxu1 %v2139_v0  ;;  %v2120_v19 = vld [vmem:[%s2602_s1 + $0x78] sm:$0xff]   ;;  %v2126_v27 = vld [vmem:[%s2602_s1 + $0xc8] sm:$0xff]  }
  0x15   :  { %1875 = vmatprep.mubr.msk.bf16.mxu0 %vm2140_vm0, %v2139_v0  ;;  %1887 = vmatprep.mubr.msk.bf16.mxu1 %vm2140_vm0, %v2139_v0  ;;  %v955_v10 = vrot.slane %v953_v6, 1  ;;  %v2121_v20 = vld [vmem:[%s2602_s1 + $0x98] sm:$0xff]   ;;  %v1429_v45 = vrot.slane %v953_v6, 2 }
  0x16   :  { %v2129_v33 = vld [vmem:[%s2602_s1 + $0xb8] sm:$0xff]  }
  0x17   :  { %1870 = vmatpush3.bf16.msra.mxu0 %v2073_v14  ;;  %1882 = vmatpush3.bf16.msra.mxu1 %v2074_v15  ;;  %v956_v12 = vor.u32 %v955_v10, %v951_v9  ;;  %v2115_v14 = vld [vmem:[%s2602_s1 + $0x80] sm:$0xff]   ;;  %v2116_v15 = vld [vmem:[%s2602_s1 + $0x68] sm:$0xff]   ;;  %v2130_v34 = vld [vmem:[%s2602_s1 + $0xd8] sm:$0xff]  }
  0x18   :  { %1871 = vmatprep.subr.bf16.mxu0 %v2139_v0  ;;  %1883 = vmatprep.subr.bf16.mxu1 %v2139_v0 }
  0x1b   :  { %1872 = vmatpush3.bf16.msra.mxu0 %v2075_v17  ;;  %1884 = vmatpush3.bf16.msra.mxu1 %v2076_v18  ;;  %v2118_v17 = vld [vmem:[%s2602_s1 + $0x70] sm:$0xff]  }
  0x1c   :  { %1873 = vmatprep.subr.bf16.mxu0 %v2139_v0  ;;  %1885 = vmatprep.subr.bf16.mxu1 %v2139_v0  ;;  %v2119_v18 = vld [vmem:[%s2602_s1 + $0x90] sm:$0xff]  }
  0x1f   :  { %1874 = vmatpush3.bf16.msra.mxu0 %v2077_v21  ;;  %1886 = vmatpush3.bf16.msra.mxu1 %v2078_v22  ;;  %v1639_v21 = vld [vmem:[%s2603_s0 + $0x18] sm:$0xf]  ;;  %v2123_v22 = vld [vmem:[%s2602_s1 + $0xa0] sm:$0xff]  }
  0x20   :  { %1891 = vmatprep.subr.bf16.mxu0 %v2139_v0  ;;  %1903 = vmatprep.subr.bf16.mxu1 %v2139_v0 }
  0x22   :  { %1876 = vmatmul.mubr.msk.bf16.vlgmr.msra.gmra.mrb[4].mxu0 %vm73_vm1, %v202_v23  ;;  %1888 = vmatmul.mubr.msk.bf16.vlgmr.msra.gmra.mrb[4].mxu1 %vm73_vm1, %v30_v24  ;;  %v1640_v23 = vld [vmem:[%s2603_s0 + $0x1c] sm:$0xf]  ;;  %v2124_v24 = vld [vmem:[%s2602_s1 + $0xc0] sm:$0xff]  }
  0x23   :  { %1892 = vmatpush3.bf16.msra.mxu0 %v2080_v25  ;;  %1904 = vmatpush3.bf16.msra.mxu1 %v2081_v26  ;;  %v1707_v25 = vcombine.low %v1639_v21, %v1639_v21  ;;  %v2125_v26 = vld [vmem:[%s2602_s1 + $0xa8] sm:$0xff]  }
  0x24   :  { %1893 = vmatprep.subr.bf16.mxu0 %v2139_v0  ;;  %1905 = vmatprep.subr.bf16.mxu1 %v2139_v0 }
  0x25   :  { %1899 = vmatprep.mubr.msk.bf16.mxu0 %vm2140_vm0, %v2139_v0  ;;  %1911 = vmatprep.mubr.msk.bf16.mxu1 %vm2140_vm0, %v2139_v0 }
  0x27   :  { %1894 = vmatpush3.bf16.msra.mxu0 %v2082_v28  ;;  %1906 = vmatpush3.bf16.msra.mxu1 %v2083_v29  ;;  %v1191_v28 = vshll.u32 %v1707_v25, 16  ;;  %v2127_v29 = vld [vmem:[%s2602_s1 + $0xb0] sm:$0xff]  }
  0x28   :  { %1895 = vmatprep.subr.bf16.mxu0 %v2139_v0  ;;  %1907 = vmatprep.subr.bf16.mxu1 %v2139_v0 }
  0x2b   :  { %1896 = vmatpush3.bf16.msra.mxu0 %v2084_v31  ;;  %1908 = vmatpush3.bf16.msra.mxu1 %v2085_v32  ;;  %v1189_v31 = vshrl.u32 %v1707_v25, 16  ;;  %v1193_v32 = vrot.slane %v1191_v28, 1 }
  0x2c   :  { %1897 = vmatprep.subr.bf16.mxu0 %v2139_v0  ;;  %1909 = vmatprep.subr.bf16.mxu1 %v2139_v0 }
  0x2f   :  { %1898 = vmatpush3.bf16.msra.mxu0 %v2086_v35  ;;  %1910 = vmatpush3.bf16.msra.mxu1 %v2087_v36  ;;  %v1194_v35 = vor.u32 %v1193_v32, %v1189_v31  ;;  %v1271_v36 = vrot.slane %v2411_v3, 1 }
  0x30   :  { %1915 = vmatprep.subr.bf16.mxu0 %v2139_v0  ;;  %1927 = vmatprep.subr.bf16.mxu1 %v2139_v0 }
  0x32   :  { %1900 = vmatmul.mubr.msk.bf16.vlgmr.msra.gmra.mrb[8].mxu0 %vm73_vm1, %v31_v37  ;;  %1912 = vmatmul.mubr.msk.bf16.vlgmr.msra.gmra.mrb[8].mxu1 %vm73_vm1, %v443_v38  ;;  %v2131_v37 = vld [vmem:[%s2602_s1 + $0xe0] sm:$0xff]  }
  0x33   :  { %1916 = vmatpush3.bf16.msra.mxu0 %v2088_v39  ;;  %1928 = vmatpush3.bf16.msra.mxu1 %v2089_v40  ;;  %v2132_v38 = vld [vmem:[%s2602_s1 + $0x100] sm:$0xff]   ;;  %v2133_v39 = vld [vmem:[%s2602_s1 + $0xe8] sm:$0xff]  }
  0x34   :  { %1917 = vmatprep.subr.bf16.mxu0 %v2139_v0  ;;  %1929 = vmatprep.subr.bf16.mxu1 %v2139_v0  ;;  %v2134_v40 = vld [vmem:[%s2602_s1 + $0x108] sm:$0xff]  }
  0x35   :  { %1923 = vmatprep.mubr.msk.bf16.mxu0 %vm2140_vm0, %v2139_v0  ;;  %1935 = vmatprep.mubr.msk.bf16.mxu1 %vm2140_vm0, %v2139_v0 }
  0x37   :  { %1918 = vmatpush3.bf16.msra.mxu0 %v2090_v41  ;;  %1930 = vmatpush3.bf16.msra.mxu1 %v2091_v42  ;;  %v2135_v41 = vld [vmem:[%s2602_s1 + $0xf0] sm:$0xff]  }
  0x38   :  { %1919 = vmatprep.subr.bf16.mxu0 %v2139_v0  ;;  %1931 = vmatprep.subr.bf16.mxu1 %v2139_v0  ;;  %v2136_v42 = vld [vmem:[%s2602_s1 + $0x110] sm:$0xff]  }
  0x3b   :  { %1920 = vmatpush3.bf16.msra.mxu0 %v2092_v43  ;;  %1932 = vmatpush3.bf16.msra.mxu1 %v2093_v44  ;;  %v1734_v43 = vcombine.low %v2395_v62, %v2395_v62  ;;  %v1428_v44 = vrot.slane %v951_v9, 1 }
  0x3c   :  { %1921 = vmatprep.subr.bf16.mxu0 %v2139_v0  ;;  %1933 = vmatprep.subr.bf16.mxu1 %v2139_v0 }
  0x3f   :  { %1922 = vmatpush3.bf16.msra.mxu0 %v2094_v46  ;;  %1934 = vmatpush3.bf16.msra.mxu1 %v2095_v47  ;;  %v2137_v46 = vld [vmem:[%s2602_s1 + $0xf8] sm:$0xff]  }
  0x40   :  { %1939 = vmatprep.subr.bf16.mxu0 %v2139_v0  ;;  %1951 = vmatprep.subr.bf16.mxu1 %v2139_v0  ;;  %v2138_v47 = vld [vmem:[%s2602_s1 + $0x118] sm:$0xff]  }
  0x42   :  { %1924 = vmatmul.mubr.msk.bf16.vlgmr.msra.gmra.mrb[12].mxu0 %vm73_vm1, %v521_v48  ;;  %1936 = vmatmul.mubr.msk.bf16.vlgmr.msra.gmra.mrb[12].mxu1 %vm73_vm1, %v602_v49  ;;  %v1351_v48 = vrot.slane %v1734_v43, 1  ;;  %v1430_v49 = vor.u32 %v1429_v45, %v1428_v44 }
  0x43   :  { %1940 = vmatpush3.bf16.msra.mxu0 %v2096_v50  ;;  %1952 = vmatpush3.bf16.msra.mxu1 %v2097_v51 }
  0x44   :  { %1941 = vmatprep.subr.bf16.mxu0 %v2139_v0  ;;  %1953 = vmatprep.subr.bf16.mxu1 %v2139_v0 }
  0x45   :  { %1947 = vmatprep.mubr.msk.bf16.mxu0 %vm2140_vm0, %v2139_v0  ;;  %1959 = vmatprep.mubr.msk.bf16.mxu1 %vm2140_vm0, %v2139_v0 }
  0x47   :  { %1942 = vmatpush3.bf16.msra.mxu0 %v2098_v52  ;;  %1954 = vmatpush3.bf16.msra.mxu1 %v2099_v53 }
  0x48   :  { %1943 = vmatprep.subr.bf16.mxu0 %v2139_v0  ;;  %1955 = vmatprep.subr.bf16.mxu1 %v2139_v0 }
  0x4b   :  { %1944 = vmatpush3.bf16.msra.mxu0 %v2100_v54  ;;  %1956 = vmatpush3.bf16.msra.mxu1 %v2101_v55 }
  0x4c   :  { %1945 = vmatprep.subr.bf16.mxu0 %v2139_v0  ;;  %1957 = vmatprep.subr.bf16.mxu1 %v2139_v0 }
  0x4f   :  { %1946 = vmatpush3.bf16.msra.mxu0 %v2102_v58  ;;  %1958 = vmatpush3.bf16.msra.mxu1 %v2103_v59 }
  0x50   :  { %1963 = vmatprep.subr.bf16.mxu0 %v2139_v0  ;;  %1975 = vmatprep.subr.bf16.mxu1 %v2139_v0 }
  0x52   :  { %1948 = vmatmul.mubr.msk.bf16.vlgmr.msra.gmra.mrb[16].mxu0 %vm73_vm1, %v682_v60  ;;  %1960 = vmatmul.mubr.msk.bf16.vlgmr.msra.gmra.mrb[16].mxu1 %vm73_vm1, %v2395_v62 }
  0x53   :  { %1964 = vmatpush3.bf16.msra.mxu0 %v2105_v61  ;;  %1976 = vmatpush3.bf16.msra.mxu1 %v2106_v63 }
  0x54   :  { %1965 = vmatprep.subr.bf16.mxu0 %v2139_v0  ;;  %1977 = vmatprep.subr.bf16.mxu1 %v2139_v0 }
  0x55   :  { %1971 = vmatprep.mubr.msk.bf16.mxu0 %vm2140_vm0, %v2139_v0  ;;  %1983 = vmatprep.mubr.msk.bf16.mxu1 %vm2140_vm0, %v2139_v0 }
  0x57   :  { %1966 = vmatpush3.bf16.msra.mxu0 %v2107_v2  ;;  %1978 = vmatpush3.bf16.msra.mxu1 %v2108_v4 }
  0x58   :  { %1967 = vmatprep.subr.bf16.mxu0 %v2139_v0  ;;  %1979 = vmatprep.subr.bf16.mxu1 %v2139_v0 }
  0x5b   :  { %1968 = vmatpush3.bf16.msra.mxu0 %v2109_v5  ;;  %1980 = vmatpush3.bf16.msra.mxu1 %v2110_v7 }
  0x5c   :  { %1969 = vmatprep.subr.bf16.mxu0 %v2139_v0  ;;  %1981 = vmatprep.subr.bf16.mxu1 %v2139_v0 }
  0x5f   :  { %1970 = vmatpush3.bf16.msra.mxu0 %v2111_v8  ;;  %1982 = vmatpush3.bf16.msra.mxu1 %v2112_v11 }
  0x60   :  { %1987 = vmatprep.subr.bf16.mxu0 %v2139_v0  ;;  %1999 = vmatprep.subr.bf16.mxu1 %v2139_v0 }
  0x62   :  { %1972 = vmatmul.mubr.msk.bf16.vlgmr.msra.gmra.mrb[20].mxu0 %vm73_vm1, %v1637_v1  ;;  %1984 = vmatmul.mubr.msk.bf16.vlgmr.msra.gmra.mrb[20].mxu1 %vm73_vm1, %v956_v12  ;;  %v10_v1 = vstv %s2604_s4 }
  0x63   :  { %1988 = vmatpush3.bf16.msra.mxu0 %v2114_v13  ;;  %2000 = vmatpush3.bf16.msra.mxu1 %v2115_v14  ;;  %11 = vst [vmem:[#allocation2] sm:$0x1] %v10_v1 }
  0x64   :  { %1989 = vmatprep.subr.bf16.mxu0 %v2139_v0  ;;  %2001 = vmatprep.subr.bf16.mxu1 %v2139_v0 }
  0x65   :  { %1995 = vmatprep.mubr.msk.bf16.mxu0 %vm2140_vm0, %v2139_v0  ;;  %2007 = vmatprep.mubr.msk.bf16.mxu1 %vm2140_vm0, %v2139_v0 }
  0x67   :  { %1990 = vmatpush3.bf16.msra.mxu0 %v2116_v15  ;;  %2002 = vmatpush3.bf16.msra.mxu1 %v2117_v16 }
  0x68   :  { %1991 = vmatprep.subr.bf16.mxu0 %v2139_v0  ;;  %2003 = vmatprep.subr.bf16.mxu1 %v2139_v0 }
  0x6b   :  { %1992 = vmatpush3.bf16.msra.mxu0 %v2118_v17  ;;  %2004 = vmatpush3.bf16.msra.mxu1 %v2119_v18 }
  0x6c   :  { %1993 = vmatprep.subr.bf16.mxu0 %v2139_v0  ;;  %2005 = vmatprep.subr.bf16.mxu1 %v2139_v0 }
  0x6f   :  { %1994 = vmatpush3.bf16.msra.mxu0 %v2120_v19  ;;  %2006 = vmatpush3.bf16.msra.mxu1 %v2121_v20 }
  0x70   :  { %2011 = vmatprep.subr.bf16.mxu0 %v2139_v0  ;;  %2023 = vmatprep.subr.bf16.mxu1 %v2139_v0 }
  0x72   :  { %1996 = vmatmul.mubr.msk.bf16.vlgmr.msra.gmra.mrb[24].mxu0 %vm73_vm1, %v1639_v21  ;;  %2008 = vmatmul.mubr.msk.bf16.vlgmr.msra.gmra.mrb[24].mxu1 %vm73_vm1, %v1640_v23 }
  0x73   :  { %2012 = vmatpush3.bf16.msra.mxu0 %v2123_v22  ;;  %2024 = vmatpush3.bf16.msra.mxu1 %v2124_v24 }
  0x74   :  { %2013 = vmatprep.subr.bf16.mxu0 %v2139_v0  ;;  %2025 = vmatprep.subr.bf16.mxu1 %v2139_v0 }
  0x75   :  { %2019 = vmatprep.mubr.msk.bf16.mxu0 %vm2140_vm0, %v2139_v0  ;;  %2031 = vmatprep.mubr.msk.bf16.mxu1 %vm2140_vm0, %v2139_v0 }
  0x77   :  { %2014 = vmatpush3.bf16.msra.mxu0 %v2125_v26  ;;  %2026 = vmatpush3.bf16.msra.mxu1 %v2126_v27  ;;  %v2579_v26 = vld [vmem:[%s2605_s2] ss:$0 sm:$0xff] }
  0x78   :  { %2015 = vmatprep.subr.bf16.mxu0 %v2139_v0  ;;  %2027 = vmatprep.subr.bf16.mxu1 %v2139_v0 }
  0x7b   :  { %2016 = vmatpush3.bf16.msra.mxu0 %v2127_v29  ;;  %2028 = vmatpush3.bf16.msra.mxu1 %v2128_v30 }
  0x7c   :  { %2017 = vmatprep.subr.bf16.mxu0 %v2139_v0  ;;  %2029 = vmatprep.subr.bf16.mxu1 %v2139_v0 }
  0x7f   :  { %2018 = vmatpush3.bf16.msra.mxu0 %v2129_v33  ;;  %2030 = vmatpush3.bf16.msra.mxu1 %v2130_v34 }
  0x80   :  { %2035 = vmatprep.subr.bf16.mxu0 %v2139_v0  ;;  %2047 = vmatprep.subr.bf16.mxu1 %v2139_v0 }
  0x82   :  { %2020 = vmatmul.mubr.msk.bf16.vlgmr.msra.gmra.mrb[28].mxu0 %vm73_vm1, %v1194_v35  ;;  %2032 = vmatmul.mubr.msk.bf16.vlgmr.msra.gmra.mrb[28].mxu1 %vm73_vm1, %v1271_v36 }
  0x83   :  { %2036 = vmatpush3.bf16.msra.mxu0 %v2131_v37  ;;  %2048 = vmatpush3.bf16.msra.mxu1 %v2132_v38  ;;  %v1635_v38 = vld [vmem:[%s2605_s2 + $0x1] ss:$0 sm:$0xff] }
  0x84   :  { %2037 = vmatprep.subr.bf16.mxu0 %v2139_v0  ;;  %2049 = vmatprep.subr.bf16.mxu1 %v2139_v0 }
  0x85   :  { %2043 = vmatprep.mubr.msk.bf16.mxu0 %vm2140_vm0, %v2139_v0  ;;  %2055 = vmatprep.mubr.msk.bf16.mxu1 %vm2140_vm0, %v2139_v0 }
  0x87   :  { %2038 = vmatpush3.bf16.msra.mxu0 %v2133_v39  ;;  %2050 = vmatpush3.bf16.msra.mxu1 %v2134_v40  ;;  %v1636_v39 = vld [vmem:[%s2605_s2 + $0x2] ss:$0 sm:$0xff] }
  0x88   :  { %2039 = vmatprep.subr.bf16.mxu0 %v2139_v0  ;;  %2051 = vmatprep.subr.bf16.mxu1 %v2139_v0 }
  0x8b   :  { %2040 = vmatpush3.bf16.msra.mxu0 %v2135_v41  ;;  %2052 = vmatpush3.bf16.msra.mxu1 %v2136_v42  ;;  %v26_v42 = vld [vmem:[%s2606_s3] sm:$0x3] }
  0x8c   :  { %2041 = vmatprep.subr.bf16.mxu0 %v2139_v0  ;;  %2053 = vmatprep.subr.bf16.mxu1 %v2139_v0 }
  0x8f   :  { %2042 = vmatpush3.bf16.msra.mxu0 %v2137_v46  ;;  %2054 = vmatpush3.bf16.msra.mxu1 %v2138_v47 }
  0x92   :  { %2044 = vmatmul.mubr.msk.bf16.vlgmr.msra.gmra.mrb[32].mxu0 %vm73_vm1, %v1351_v48  ;;  %2056 = vmatmul.mubr.msk.bf16.vlgmr.msra.gmra.mrb[32].mxu1 %vm73_vm1, %v1430_v49 }
  0xe5   :  { %v111_v50 = vpop.f32.mrb[0].mxu0  ;;  %v178_v51 = vpop.f32.mrb[0].mxu1 }
  0xe6   :  { %v1853_v52 = vpop.f32.mrb[1].mxu0  ;;  %v179_v53 = vadd.f32 %v178_v51, %v111_v50  ;;  %v1865_v54 = vpop.f32.mrb[1].mxu1 }
  0xe7   :  { %v114_v55 = vpop.f32.mrb[2].mxu0  ;;  %v181_v56 = vpop.f32.mrb[2].mxu1 }
  0xe8   :  { %v1854_v57 = vpop.f32.mrb[3].mxu0  ;;  %v1866_v58 = vpop.f32.mrb[3].mxu1 }
  0xf5   :  { %v264_v59 = vpop.f32.mrb[4].mxu0  ;;  %v341_v0 = vpop.f32.mrb[4].mxu1 }
  0xf6   :  { %v270_v60 = vadd.f32 %v264_v59, %v179_v53  ;;  %v1877_v61 = vpop.f32.mrb[5].mxu0  ;;  %v1889_v62 = vpop.f32.mrb[5].mxu1 }
  0xf7   :  { %v267_v63 = vpop.f32.mrb[6].mxu0  ;;  %v344_v3 = vpop.f32.mrb[6].mxu1 }
  0xf8   :  { %v347_v2 = vadd.f32 %v341_v0, %v270_v60  ;;  %v1878_v4 = vpop.f32.mrb[7].mxu0  ;;  %v1890_v5 = vpop.f32.mrb[7].mxu1 }
 0x105   :  { %v418_v6 = vpop.f32.mrb[8].mxu0  ;;  %v505_v8 = vpop.f32.mrb[8].mxu1 }
 0x106   :  { %v424_v7 = vadd.f32 %v418_v6, %v347_v2  ;;  %v1901_v9 = vpop.f32.mrb[9].mxu0  ;;  %v1913_v10 = vpop.f32.mrb[9].mxu1 }
 0x107   :  { %v421_v11 = vpop.f32.mrb[10].mxu0  ;;  %v508_v13 = vpop.f32.mrb[10].mxu1 }
 0x108   :  { %v511_v12 = vadd.f32 %v505_v8, %v424_v7  ;;  %v1902_v14 = vpop.f32.mrb[11].mxu0  ;;  %v1914_v15 = vpop.f32.mrb[11].mxu1 }
 0x115   :  { %v583_v16 = vpop.f32.mrb[12].mxu0  ;;  %v664_v18 = vpop.f32.mrb[12].mxu1 }
 0x116   :  { %v589_v17 = vadd.f32 %v583_v16, %v511_v12  ;;  %v1925_v19 = vpop.f32.mrb[13].mxu0  ;;  %v1937_v20 = vpop.f32.mrb[13].mxu1 }
 0x117   :  { %v586_v21 = vpop.f32.mrb[14].mxu0  ;;  %v667_v23 = vpop.f32.mrb[14].mxu1 }
 0x118   :  { %v670_v22 = vadd.f32 %v664_v18, %v589_v17  ;;  %v1926_v24 = vpop.f32.mrb[15].mxu0  ;;  %v1938_v25 = vpop.f32.mrb[15].mxu1 }
 0x125   :  { %v744_v27 = vpop.f32.mrb[16].mxu0  ;;  %v866_v29 = vpop.f32.mrb[16].mxu1 }
 0x126   :  { %v750_v28 = vadd.f32 %v744_v27, %v670_v22  ;;  %v1949_v30 = vpop.f32.mrb[17].mxu0  ;;  %v1961_v31 = vpop.f32.mrb[17].mxu1 }
 0x127   :  { %v747_v32 = vpop.f32.mrb[18].mxu0  ;;  %v869_v34 = vpop.f32.mrb[18].mxu1 }
 0x128   :  { %v755_v33 = vadd.f32 %v2579_v26, %v750_v28  ;;  %v1950_v35 = vpop.f32.mrb[19].mxu0  ;;  %v1962_v36 = vpop.f32.mrb[19].mxu1 }
 0x12a   :  { %vm756_vm2 = vcmp.gt.f32.partialorder %v755_v33, 0.0  ;;  %v757_v37 = vmul.f32 0.2, %v755_v33 }
 0x12c   :  { %v758_v40 = vsel %vm756_vm2, %v755_v33, %v757_v37  ;;  %v27_v37 = vld [vmem:[#allocation2] sm:$0x1] }
 0x12d   :  { %v763_v41 = vmul.f32 %v1635_v38, %v758_v40 }
 0x12f   :  { %v768_v43 = vadd.f32 %v1636_v39, %v763_v41 }
 0x131   :  { %v769_v44 = vmul.f32 %v768_v43, %v26_v42 }
 0x133   :  { %v771_v45 = vsel %vm770_vm3, %v769_v44, 0.0 }
 0x134   :  { %772 = vadd.xlane.f32.xlu0 %v771_v45 }
 0x135   :  { %v933_v46 = vpop.f32.mrb[20].mxu0  ;;  %v1018_v48 = vpop.f32.mrb[20].mxu1 }
 0x136   :  { %v934_v47 = vadd.f32 %v933_v46, %v866_v29  ;;  %v1973_v49 = vpop.f32.mrb[21].mxu0  ;;  %v1985_v50 = vpop.f32.mrb[21].mxu1 }
 0x137   :  { %v936_v51 = vpop.f32.mrb[22].mxu0  ;;  %v1021_v53 = vpop.f32.mrb[22].mxu1 }
 0x138   :  { %v1024_v52 = vadd.f32 %v1018_v48, %v934_v47  ;;  %v1974_v54 = vpop.f32.mrb[23].mxu0  ;;  %v1986_v55 = vpop.f32.mrb[23].mxu1 }
 0x145   :  { %v1094_v56 = vpop.f32.mrb[24].mxu0  ;;  %v1170_v58 = vpop.f32.mrb[24].mxu1 }
 0x146   :  { %v1100_v57 = vadd.f32 %v1094_v56, %v1024_v52  ;;  %v1997_v59 = vpop.f32.mrb[25].mxu0  ;;  %v2009_v60 = vpop.f32.mrb[25].mxu1 }
 0x147   :  { %v1097_v0 = vpop.f32.mrb[26].mxu0  ;;  %v1173_v62 = vpop.f32.mrb[26].mxu1 }
 0x148   :  { %v1176_v61 = vadd.f32 %v1170_v58, %v1100_v57  ;;  %v1998_v63 = vpop.f32.mrb[27].mxu0  ;;  %v2010_v1 = vpop.f32.mrb[27].mxu1 }
 0x155   :  { %v1256_v2 = vpop.f32.mrb[28].mxu0  ;;  %v1333_v4 = vpop.f32.mrb[28].mxu1 }
 0x156   :  { %v1262_v3 = vadd.f32 %v1256_v2, %v1176_v61  ;;  %v2021_v5 = vpop.f32.mrb[29].mxu0  ;;  %v2033_v6 = vpop.f32.mrb[29].mxu1 }
 0x157   :  { %v1259_v7 = vpop.f32.mrb[30].mxu0  ;;  %v1336_v9 = vpop.f32.mrb[30].mxu1 }
 0x158   :  { %v1339_v8 = vadd.f32 %v1333_v4, %v1262_v3  ;;  %v2022_v10 = vpop.f32.mrb[31].mxu0  ;;  %v2034_v11 = vpop.f32.mrb[31].mxu1 }
 0x165   :  { %v1413_v12 = vpop.f32.mrb[32].mxu0  ;;  %v1492_v14 = vpop.f32.mrb[32].mxu1 }
 0x166   :  { %v1419_v13 = vadd.f32 %v1413_v12, %v1339_v8  ;;  %v2045_v15 = vpop.f32.mrb[33].mxu0  ;;  %v2057_v16 = vpop.f32.mrb[33].mxu1 }
 0x167   :  { %v1416_v17 = vpop.f32.mrb[34].mxu0  ;;  %v1495_v19 = vpop.f32.mrb[34].mxu1 }
 0x168   :  { %v1498_v18 = vadd.f32 %v1492_v14, %v1419_v13  ;;  %v2046_v20 = vpop.f32.mrb[35].mxu0  ;;  %v2058_v21 = vpop.f32.mrb[35].mxu1 }
 0x16a   :  { %v1499_v22 = vadd.f32 %v2579_v26, %v1498_v18 }
 0x16c   :  { %vm1500_vm4 = vcmp.gt.f32.partialorder %v1499_v22, 0.0  ;;  %v1501_v23 = vmul.f32 0.2, %v1499_v22 }
 0x16e   :  { %v1502_v24 = vsel %vm1500_vm4, %v1499_v22, %v1501_v23 }
 0x16f   :  { %v1503_v25 = vmul.f32 %v1635_v38, %v1502_v24 }
 0x171   :  { %v1504_v27 = vadd.f32 %v1636_v39, %v1503_v25 }
 0x173   :  { %v1505_v28 = vmul.f32 %v1504_v27, %v26_v42 }
 0x175   :  { %v1506_v29 = vsel %vm770_vm3, %v1505_v28, 0.0 }
 0x176   :  { %1507 = vadd.xlane.f32.xlu0 %v1506_v29 }
 0x1c1   :  { %v773_v30 = vpop.xlane.xlu0 %772 }
 0x1c2   :  { %v774_v31 = vsel %vm770_vm3, %v773_v30, 0.0 }
 0x1c3   :  { %v775_v32 = vrot.slane %v774_v31, 4 }
 0x1c5   :  { %v776_v33 = vadd.f32 %v775_v32, %v774_v31 }
 0x1c7   :  { %v777_v34 = vrot.slane %v776_v33, 2 }
 0x1c9   :  { %v778_v35 = vadd.f32 %v777_v34, %v776_v33 }
 0x1cb   :  { %v779_v36 = vrot.slane %v778_v35, 1 }
 0x1cd   :  { %v780_v40 = vadd.f32 %v779_v36, %v778_v35 }
 0x1cf   :  { %v781_v26 = vadd.f32 %v780_v40, %v27_v37 }
 0x1d1   :  { %783 = vst.msk [vmem:[%s2607_s5] sm:$0x1] %vm782_vm5, %v781_v26 }
 0x203   :  { %v1508_v38 = vpop.xlane.xlu0 %1507 }
 0x204   :  { %v1509_v39 = vsel %vm770_vm3, %v1508_v38, 0.0 }
 0x205   :  { %v1510_v41 = vrot.slane %v1509_v39, 4 }
 0x207   :  { %v1511_v42 = vadd.f32 %v1510_v41, %v1509_v39 }
 0x209   :  { %v1512_v43 = vrot.slane %v1511_v42, 2 }
 0x20b   :  { %v1513_v44 = vadd.f32 %v1512_v43, %v1511_v42 }
 0x20d   :  { %v1514_v45 = vrot.slane %v1513_v44, 1 }
 0x20f   :  { %v1515_v46 = vadd.f32 %v1514_v45, %v1513_v44 }
 0x211   :  { %v1516_v47 = vadd.f32 %v1515_v46, %v27_v37 }
 0x213   :  { %1517 = vst.msk [vmem:[%s2607_s5 + $0x1] sm:$0x1] %vm782_vm5, %v1516_v47 }

</bundles_post_ra>
